<compile_context>
chip_gen: v7x
topology: tpu7x:2x2x1
jax: 0.10.0
libtpu: 0.0.40
codegen_flags: <defaults>
</compile_context>

<pallas_src>
import functools

import jax
import jax.numpy as jnp
import numpy as np
from jax import lax
from jax.experimental import pallas as pl
from jax.experimental.pallas import tpu as pltpu

_EPS = 1e-5
_LANE = 128


def _round_up(x, m):
    return ((x + m - 1) // m) * m


def _pick_band_rows(H, target):
    """Largest divisor of H that is <= target (whole image if only 1 works)."""
    target = max(1, min(target, H))
    for t in range(target, 0, -1):
        if H % t == 0:
            return t
    return H


# ---------------------------------------------------------------------------
# Kernel
# ---------------------------------------------------------------------------
def _block_kernel(learnable_res, tH, W, *refs):
    if learnable_res:
        (x_ref, w1_ref, b1_ref, w2_ref, b2_ref,
         w3_ref, b3_ref, out_ref, h1b_ref) = refs
    else:
        (x_ref, w1_ref, b1_ref, w2_ref, b2_ref, out_ref, h1b_ref) = refs

    Cp = out_ref.shape[-1]
    band = pl.program_id(1)
    n_bands = pl.num_programs(1)

    # Output rows [band*tH, band*tH+tH) need (after chaining the two 1-row conv
    # halos) padded-x rows [band*tH, band*tH+tH+4).  x was H-padded by 2 and
    # W-padded by 1 in the wrapper, so this window is always in range.
    row0 = pl.multiple_of(band * tH, tH)
    xb = x_ref[0, pl.ds(row0, tH + 4), :, :]            # (tH+4, W+2, Cp) bf16

    # ---- conv1 (BN1 folded) [+ learnable-res conv, sharing tap slices]:
    # 9 accumulated per-tap MXU dots — no im2col materialization.
    # conv1 is computed for tH+2 rows (2 halo rows recomputed per band).
    m1 = (tH + 2) * W
    acc1 = jnp.zeros((m1, Cp), jnp.float32)
    acc3 = jnp.zeros((m1, Cp), jnp.float32) if learnable_res else None
    center = None
    t = 0
    for dy in range(3):
        for dx in range(3):
            tap3d = xb[dy:dy + tH + 2, dx:dx + W, :]     # (tH+2, W, Cp)
            tap = tap3d.reshape(m1, Cp)
            acc1 = acc1 + jnp.dot(tap, w1_ref[t],
                                  preferred_element_type=jnp.float32)
            if learnable_res:
                acc3 = acc3 + jnp.dot(tap, w3_ref[t],
                                      preferred_element_type=jnp.float32)
            elif dy == 1 and dx == 1:
                center = tap3d                           # identity residual
            t += 1

    # Bias + ReLU in one VPU pass, cast once for the second MXU pass.
    h1 = jnp.maximum(acc1 + b1_ref[...], 0.0).astype(jnp.bfloat16)
    h1 = h1.reshape(tH + 2, W, Cp)

    # ---- persistent h1 halo scratch: store only the interior, then refresh
    # the 1-element halo with tiny stores (columns always, rows only at the
    # image top/bottom edges where h1's SAME padding is zero).
    h1b_ref[:, 1:W + 1, :] = h1
    zcol = jnp.zeros((tH + 2, 1, Cp), jnp.bfloat16)
    h1b_ref[:, 0:1, :] = zcol
    h1b_ref[:, W + 1:W + 2, :] = zcol
    zrow = jnp.zeros((1, W + 2, Cp), jnp.bfloat16)

    @pl.when(band == 0)
    def _():
        h1b_ref[0:1, :, :] = zrow

    @pl.when(band == n_bands - 1)
    def _():
        h1b_ref[tH + 1:tH + 2, :, :] = zrow

    # ---- conv2 (BN2 folded): per-tap dots reading from the halo scratch.
    m2 = tH * W
    acc2 = jnp.zeros((m2, Cp), jnp.float32)
    t = 0
    for dy in range(3):
        for dx in range(3):
            tap = h1b_ref[dy:dy + tH, dx:dx + W, :].reshape(m2, Cp)
            acc2 = acc2 + jnp.dot(tap, w2_ref[t],
                                  preferred_element_type=jnp.float32)
            t += 1
    acc2 = acc2 + b2_ref[...]

    # ---- residual branch.
    if learnable_res:
        # Middle tH rows of the shared-tap accumulator + folded BN3 bias.
        res = acc3.reshape(tH + 2, W, Cp)[1:tH + 1].reshape(m2, Cp) + b3_ref[...]
    else:
        # Identity skip: centre tap (dy=dx=1), rows of this band only.
        # TODO(synk): x is carried in bf16 to halve HBM traffic; carry an f32
        # copy of this slice if a full-precision skip connection is required.
        res = center[1:tH + 1].reshape(m2, Cp).astype(jnp.float32)

    out = jnp.maximum(acc2 + res, 0.0)
    out_ref[...] = out.reshape(1, tH, W, Cp)             # lane-dense store


# ---------------------------------------------------------------------------
# Parameter setup / BN folding (plain-JAX glue)
# ---------------------------------------------------------------------------
def _init_conv_bn(key, C):
    kw, kb, kg, kbe, km, kv = jax.random.split(key, 6)
    return dict(
        w=0.1 * jax.random.normal(kw, (3, 3, C, C), jnp.float32),   # HWIO
        b=0.1 * jax.random.normal(kb, (C,), jnp.float32),
        gamma=1.0 + 0.1 * jax.random.normal(kg, (C,), jnp.float32),
        beta=0.1 * jax.random.normal(kbe, (C,), jnp.float32),
        mean=0.1 * jax.random.normal(km, (C,), jnp.float32),
        var=jnp.abs(jax.random.normal(kv, (C,), jnp.float32)) + 0.5,
    )


def init_block_params(key, width, learnable_res=False):
    k1, k2, k3 = jax.random.split(key, 3)
    params = {"conv1": _init_conv_bn(k1, width), "conv2": _init_conv_bn(k2, width)}
    if learnable_res:
        params["res"] = _init_conv_bn(k3, width)
    return params


def _fold_conv_bn(p, C, Cp):
    """Fold eval-mode BN into the conv: scaled (9, Cp, Cp) weight + bias."""
    scale = p["gamma"] / jnp.sqrt(p["var"] + _EPS)                 # (C,)
    bias = p["beta"] + scale * (p["b"] - p["mean"])                # (C,)
    w = p["w"] * scale[None, None, None, :]                        # (3,3,C,C)
    w = jnp.pad(w, ((0, 0), (0, 0), (0, Cp - C), (0, Cp - C)))
    w = w.reshape(9, Cp, Cp).astype(jnp.bfloat16)                  # dy-major
    bias = jnp.pad(bias, (0, Cp - C)).reshape(1, Cp).astype(jnp.float32)
    return w, bias


# ---------------------------------------------------------------------------
# Pallas wrapper
# ---------------------------------------------------------------------------
@functools.partial(jax.jit, static_argnames=("learnable_res", "band_rows"))
def block_forward_pallas(x_nchw, params, learnable_res=False, band_rows=8):
    x = jnp.transpose(x_nchw, (0, 2, 3, 1)).astype(jnp.float32)    # NCHW -> NHWC
    N, H, W, C = x.shape
    Cp = _round_up(C, _LANE)                                        # lane-dense
    tH = _pick_band_rows(H, band_rows)   # tune upward (multiple of 8, tH*W>=512)
    n_bands = H // tH

    # Single fused wrapper pass over x (under jit): transpose + H-halo(2) +
    # W-halo(1) + channel pad + bf16 cast.
    xpad = jnp.pad(x, ((0, 0), (2, 2), (1, 1), (0, Cp - C))).astype(jnp.bfloat16)

    args = [xpad]
    in_specs = [pl.BlockSpec((1, H + 4, W + 2, Cp), lambda n, i: (n, 0, 0, 0))]
    names = ["conv1", "conv2"] + (["res"] if learnable_res else [])
    for name in names:
        w, b = _fold_conv_bn(params[name], C, Cp)
        args += [w, b]
        # Constant block index -> weights / biases stay VMEM-resident across
        # the whole grid.  (Single-buffering them is a possible ~1 MB saving.)
        in_specs += [pl.BlockSpec((9, Cp, Cp), lambda n, i: (0, 0, 0)),
                     pl.BlockSpec((1, Cp), lambda n, i: (0, 0))]

    rows_c1 = N * n_bands * (tH + 2) * W            # conv1 rows (incl. halo recompute)
    rows_c2 = N * H * W                             # conv2 rows
    rows_res = rows_c1 if learnable_res else 0
    flops = 2 * 9 * Cp * Cp * (rows_c1 + rows_c2 + rows_res)
    bytes_accessed = int(sum(int(a.size) * a.dtype.itemsize for a in args)
                         + N * H * W * Cp * 4)

    out_nhwc = pl.pallas_call(
        functools.partial(_block_kernel, learnable_res, tH, W),
        out_shape=jax.ShapeDtypeStruct((N, H, W, Cp), jnp.float32),
        grid=(N, n_bands),
        in_specs=in_specs,
        out_specs=pl.BlockSpec((1, tH, W, Cp), lambda n, i: (n, i, 0, 0)),
        scratch_shapes=[pltpu.VMEM((tH + 2, W + 2, Cp), jnp.bfloat16)],
        compiler_params=pltpu.CompilerParams(
            dimension_semantics=("parallel", "parallel"),   # batch x H-bands
            # 64 MiB: within v7x physical VMEM; on v5e/v6e (128 MiB) this can
            # be raised toward ~100 MiB if bands are enlarged.
            vmem_limit_bytes=64 * 1024 * 1024,
        ),
        cost_estimate=pl.CostEstimate(
            flops=flops, transcendentals=0, bytes_accessed=bytes_accessed),
    )(*args)

    # Drop channel padding + back to NCHW (one fused pass under jit).
    return jnp.transpose(out_nhwc[..., :C], (0, 3, 1, 2))


# ---------------------------------------------------------------------------
# Pure-JAX reference (eval-mode BN, full f32), for correctness checking
# ---------------------------------------------------------------------------
def block_forward_ref(x_nchw, params, learnable_res=False):
    x = jnp.transpose(x_nchw, (0, 2, 3, 1)).astype(jnp.float32)

    def conv_bn(inp, p):
        y = lax.conv_general_dilated(
            inp, p["w"], (1, 1), "SAME",
            dimension_numbers=("NHWC", "HWIO", "NHWC"),
            precision=lax.Precision.HIGHEST) + p["b"]
        return p["gamma"] * (y - p["mean"]) / jnp.sqrt(p["var"] + _EPS) + p["beta"]

    h = jax.nn.relu(conv_bn(x, params["conv1"]))
    h2 = conv_bn(h, params["conv2"])
    res = conv_bn(x, params["res"]) if learnable_res else x
    out = jax.nn.relu(h2 + res)
    return jnp.transpose(out, (0, 3, 1, 2))


if __name__ == "__main__":
    width = 4
    key = jax.random.PRNGKey(0)
    kx, kp0, kp1 = jax.random.split(key, 3)
    x = jax.random.normal(kx, (2, width, 16, 16), jnp.float32)      # NCHW like PyTorch

    # (learnable_res, params key, band_rows): exercises multi-band (2 bands,
    # edge-row zeroing), the learnable-res branch, and the single-band case.
    configs = [(False, kp0, 8), (True, kp1, 8), (False, kp0, 16)]
    for learnable_res, kp, band_rows in configs:
        params = init_block_params(kp, width, learnable_res)
        out = jax.block_until_ready(
            block_forward_pallas(x, params, learnable_res=learnable_res,
                                 band_rows=band_rows))
        ref = jax.block_until_ready(block_forward_ref(x, params, learnable_res))
        assert out.shape == x.shape and out.dtype == jnp.float32
        # Kernel feeds bf16 activations/weights to the MXU (f32 accumulation),
        # reference is full f32 -> compare at a bf16-appropriate tolerance.
        np.testing.assert_allclose(np.asarray(out), np.asarray(ref),
                                   rtol=3e-2, atol=3e-2)

    print("KERNEL_OK")
</pallas_src>

<mosaic_0001>
module attributes {stable_mosaic.version = 11 : i64} {
  func.func @_block_kernel(%arg0: i32, %arg1: i32, %arg2: memref<1x20x18x128xbf16, #tpu.memory_space<vmem>>, %arg3: memref<9x128x128xbf16, #tpu.memory_space<vmem>>, %arg4: memref<1x128xf32, #tpu.memory_space<vmem>>, %arg5: memref<9x128x128xbf16, #tpu.memory_space<vmem>>, %arg6: memref<1x128xf32, #tpu.memory_space<vmem>>, %arg7: memref<1x8x16x128xf32, #tpu.memory_space<vmem>>, %arg8: memref<10x18x128xbf16, #tpu.memory_space<vmem>>) attributes {dimension_semantics = [#tpu.dimension_semantics<parallel>, #tpu.dimension_semantics<parallel>], iteration_bounds = array<i64: 2, 2>, scalar_prefetch = 0 : i64, scratch_operands = 1 : i64, tpu.core_type = #tpu.core_type<tc>, window_params = [{transform_indices = @transform_0, window_bounds = array<i64: 1, 20, 18, 128>}, {pipeline_mode = #tpu.pipeline_mode<synchronous>, transform_indices = @transform_1, window_bounds = array<i64: 9, 128, 128>}, {pipeline_mode = #tpu.pipeline_mode<synchronous>, transform_indices = @transform_2, window_bounds = array<i64: 1, 128>}, {pipeline_mode = #tpu.pipeline_mode<synchronous>, transform_indices = @transform_3, window_bounds = array<i64: 9, 128, 128>}, {pipeline_mode = #tpu.pipeline_mode<synchronous>, transform_indices = @transform_4, window_bounds = array<i64: 1, 128>}, {transform_indices = @transform_5, window_bounds = array<i64: 1, 8, 16, 128>}]} {
    %c8_i32 = arith.constant 8 : i32
    %0 = arith.muli %arg1, %c8_i32 : i32
    %1 = tpu.assume_multiple %0, 8 : i32
    %c0 = arith.constant 0 : index
    %2 = arith.index_cast %1 : i32 to index
    %c0_0 = arith.constant 0 : index
    %c0_1 = arith.constant 0 : index
    %3 = vector.load %arg2[%c0, %2, %c0_0, %c0_1] : memref<1x20x18x128xbf16, #tpu.memory_space<vmem>>, vector<1x12x18x128xbf16>
    %4 = vector.shape_cast %3 : vector<1x12x18x128xbf16> to vector<12x18x128xbf16>
    %cst = arith.constant 0.000000e+00 : f32
    %5 = vector.broadcast %cst : f32 to vector<160x128xf32>
    %6 = vector.extract_strided_slice %4 {offsets = [0, 0, 0], sizes = [10, 16, 128], strides = [1, 1, 1]} : vector<12x18x128xbf16> to vector<10x16x128xbf16>
    %7 = vector.shape_cast %6 : vector<10x16x128xbf16> to vector<160x128xbf16>
    %c0_2 = arith.constant 0 : index
    %c0_3 = arith.constant 0 : index
    %c0_4 = arith.constant 0 : index
    %8 = vector.load %arg3[%c0_2, %c0_3, %c0_4] : memref<9x128x128xbf16, #tpu.memory_space<vmem>>, vector<1x128x128xbf16>
    %9 = vector.shape_cast %8 : vector<1x128x128xbf16> to vector<128x128xbf16>
    %cst_5 = arith.constant dense<0.000000e+00> : vector<160x128xf32>
    %10 = tpu.matmul %7, %9, %cst_5 {dimension_numbers = #tpu.dot_dimension_numbers<[1], [0], [0], [1], [0, 0, 1, 1], [], []>} : vector<160x128xbf16>, vector<128x128xbf16>, vector<160x128xf32> -> vector<160x128xf32>
    %11 = arith.addf %5, %10 : vector<160x128xf32>
    %12 = vector.extract_strided_slice %4 {offsets = [0, 1, 0], sizes = [10, 16, 128], strides = [1, 1, 1]} : vector<12x18x128xbf16> to vector<10x16x128xbf16>
    %13 = vector.shape_cast %12 : vector<10x16x128xbf16> to vector<160x128xbf16>
    %c1 = arith.constant 1 : index
    %c0_6 = arith.constant 0 : index
    %c0_7 = arith.constant 0 : index
    %14 = vector.load %arg3[%c1, %c0_6, %c0_7] : memref<9x128x128xbf16, #tpu.memory_space<vmem>>, vector<1x128x128xbf16>
    %15 = vector.shape_cast %14 : vector<1x128x128xbf16> to vector<128x128xbf16>
    %cst_8 = arith.constant dense<0.000000e+00> : vector<160x128xf32>
    %16 = tpu.matmul %13, %15, %cst_8 {dimension_numbers = #tpu.dot_dimension_numbers<[1], [0], [0], [1], [0, 0, 1, 1], [], []>} : vector<160x128xbf16>, vector<128x128xbf16>, vector<160x128xf32> -> vector<160x128xf32>
    %17 = arith.addf %11, %16 : vector<160x128xf32>
    %18 = vector.extract_strided_slice %4 {offsets = [0, 2, 0], sizes = [10, 16, 128], strides = [1, 1, 1]} : vector<12x18x128xbf16> to vector<10x16x128xbf16>
    %19 = vector.shape_cast %18 : vector<10x16x128xbf16> to vector<160x128xbf16>
    %c2 = arith.constant 2 : index
    %c0_9 = arith.constant 0 : index
    %c0_10 = arith.constant 0 : index
    %20 = vector.load %arg3[%c2, %c0_9, %c0_10] : memref<9x128x128xbf16, #tpu.memory_space<vmem>>, vector<1x128x128xbf16>
    %21 = vector.shape_cast %20 : vector<1x128x128xbf16> to vector<128x128xbf16>
    %cst_11 = arith.constant dense<0.000000e+00> : vector<160x128xf32>
    %22 = tpu.matmul %19, %21, %cst_11 {dimension_numbers = #tpu.dot_dimension_numbers<[1], [0], [0], [1], [0, 0, 1, 1], [], []>} : vector<160x128xbf16>, vector<128x128xbf16>, vector<160x128xf32> -> vector<160x128xf32>
    %23 = arith.addf %17, %22 : vector<160x128xf32>
    %24 = vector.extract_strided_slice %4 {offsets = [1, 0, 0], sizes = [10, 16, 128], strides = [1, 1, 1]} : vector<12x18x128xbf16> to vector<10x16x128xbf16>
    %25 = vector.shape_cast %24 : vector<10x16x128xbf16> to vector<160x128xbf16>
    %c3 = arith.constant 3 : index
    %c0_12 = arith.constant 0 : index
    %c0_13 = arith.constant 0 : index
    %26 = vector.load %arg3[%c3, %c0_12, %c0_13] : memref<9x128x128xbf16, #tpu.memory_space<vmem>>, vector<1x128x128xbf16>
    %27 = vector.shape_cast %26 : vector<1x128x128xbf16> to vector<128x128xbf16>
    %cst_14 = arith.constant dense<0.000000e+00> : vector<160x128xf32>
    %28 = tpu.matmul %25, %27, %cst_14 {dimension_numbers = #tpu.dot_dimension_numbers<[1], [0], [0], [1], [0, 0, 1, 1], [], []>} : vector<160x128xbf16>, vector<128x128xbf16>, vector<160x128xf32> -> vector<160x128xf32>
    %29 = arith.addf %23, %28 : vector<160x128xf32>
    %30 = vector.extract_strided_slice %4 {offsets = [1, 1, 0], sizes = [10, 16, 128], strides = [1, 1, 1]} : vector<12x18x128xbf16> to vector<10x16x128xbf16>
    %31 = vector.shape_cast %30 : vector<10x16x128xbf16> to vector<160x128xbf16>
    %c4 = arith.constant 4 : index
    %c0_15 = arith.constant 0 : index
    %c0_16 = arith.constant 0 : index
    %32 = vector.load %arg3[%c4, %c0_15, %c0_16] : memref<9x128x128xbf16, #tpu.memory_space<vmem>>, vector<1x128x128xbf16>
    %33 = vector.shape_cast %32 : vector<1x128x128xbf16> to vector<128x128xbf16>
    %cst_17 = arith.constant dense<0.000000e+00> : vector<160x128xf32>
    %34 = tpu.matmul %31, %33, %cst_17 {dimension_numbers = #tpu.dot_dimension_numbers<[1], [0], [0], [1], [0, 0, 1, 1], [], []>} : vector<160x128xbf16>, vector<128x128xbf16>, vector<160x128xf32> -> vector<160x128xf32>
    %35 = arith.addf %29, %34 : vector<160x128xf32>
    %36 = vector.extract_strided_slice %4 {offsets = [1, 2, 0], sizes = [10, 16, 128], strides = [1, 1, 1]} : vector<12x18x128xbf16> to vector<10x16x128xbf16>
    %37 = vector.shape_cast %36 : vector<10x16x128xbf16> to vector<160x128xbf16>
    %c5 = arith.constant 5 : index
    %c0_18 = arith.constant 0 : index
    %c0_19 = arith.constant 0 : index
    %38 = vector.load %arg3[%c5, %c0_18, %c0_19] : memref<9x128x128xbf16, #tpu.memory_space<vmem>>, vector<1x128x128xbf16>
    %39 = vector.shape_cast %38 : vector<1x128x128xbf16> to vector<128x128xbf16>
    %cst_20 = arith.constant dense<0.000000e+00> : vector<160x128xf32>
    %40 = tpu.matmul %37, %39, %cst_20 {dimension_numbers = #tpu.dot_dimension_numbers<[1], [0], [0], [1], [0, 0, 1, 1], [], []>} : vector<160x128xbf16>, vector<128x128xbf16>, vector<160x128xf32> -> vector<160x128xf32>
    %41 = arith.addf %35, %40 : vector<160x128xf32>
    %42 = vector.extract_strided_slice %4 {offsets = [2, 0, 0], sizes = [10, 16, 128], strides = [1, 1, 1]} : vector<12x18x128xbf16> to vector<10x16x128xbf16>
    %43 = vector.shape_cast %42 : vector<10x16x128xbf16> to vector<160x128xbf16>
    %c6 = arith.constant 6 : index
    %c0_21 = arith.constant 0 : index
    %c0_22 = arith.constant 0 : index
    %44 = vector.load %arg3[%c6, %c0_21, %c0_22] : memref<9x128x128xbf16, #tpu.memory_space<vmem>>, vector<1x128x128xbf16>
    %45 = vector.shape_cast %44 : vector<1x128x128xbf16> to vector<128x128xbf16>
    %cst_23 = arith.constant dense<0.000000e+00> : vector<160x128xf32>
    %46 = tpu.matmul %43, %45, %cst_23 {dimension_numbers = #tpu.dot_dimension_numbers<[1], [0], [0], [1], [0, 0, 1, 1], [], []>} : vector<160x128xbf16>, vector<128x128xbf16>, vector<160x128xf32> -> vector<160x128xf32>
    %47 = arith.addf %41, %46 : vector<160x128xf32>
    %48 = vector.extract_strided_slice %4 {offsets = [2, 1, 0], sizes = [10, 16, 128], strides = [1, 1, 1]} : vector<12x18x128xbf16> to vector<10x16x128xbf16>
    %49 = vector.shape_cast %48 : vector<10x16x128xbf16> to vector<160x128xbf16>
    %c7 = arith.constant 7 : index
    %c0_24 = arith.constant 0 : index
    %c0_25 = arith.constant 0 : index
    %50 = vector.load %arg3[%c7, %c0_24, %c0_25] : memref<9x128x128xbf16, #tpu.memory_space<vmem>>, vector<1x128x128xbf16>
    %51 = vector.shape_cast %50 : vector<1x128x128xbf16> to vector<128x128xbf16>
    %cst_26 = arith.constant dense<0.000000e+00> : vector<160x128xf32>
    %52 = tpu.matmul %49, %51, %cst_26 {dimension_numbers = #tpu.dot_dimension_numbers<[1], [0], [0], [1], [0, 0, 1, 1], [], []>} : vector<160x128xbf16>, vector<128x128xbf16>, vector<160x128xf32> -> vector<160x128xf32>
    %53 = arith.addf %47, %52 : vector<160x128xf32>
    %54 = vector.extract_strided_slice %4 {offsets = [2, 2, 0], sizes = [10, 16, 128], strides = [1, 1, 1]} : vector<12x18x128xbf16> to vector<10x16x128xbf16>
    %55 = vector.shape_cast %54 : vector<10x16x128xbf16> to vector<160x128xbf16>
    %c8 = arith.constant 8 : index
    %c0_27 = arith.constant 0 : index
    %c0_28 = arith.constant 0 : index
    %56 = vector.load %arg3[%c8, %c0_27, %c0_28] : memref<9x128x128xbf16, #tpu.memory_space<vmem>>, vector<1x128x128xbf16>
    %57 = vector.shape_cast %56 : vector<1x128x128xbf16> to vector<128x128xbf16>
    %cst_29 = arith.constant dense<0.000000e+00> : vector<160x128xf32>
    %58 = tpu.matmul %55, %57, %cst_29 {dimension_numbers = #tpu.dot_dimension_numbers<[1], [0], [0], [1], [0, 0, 1, 1], [], []>} : vector<160x128xbf16>, vector<128x128xbf16>, vector<160x128xf32> -> vector<160x128xf32>
    %59 = arith.addf %53, %58 : vector<160x128xf32>
    %c0_30 = arith.constant 0 : index
    %c0_31 = arith.constant 0 : index
    %60 = vector.load %arg4[%c0_30, %c0_31] : memref<1x128xf32, #tpu.memory_space<vmem>>, vector<1x128xf32>
    %61 = vector.broadcast %60 : vector<1x128xf32> to vector<160x128xf32>
    %62 = arith.addf %59, %61 : vector<160x128xf32>
    %cst_32 = arith.constant 0.000000e+00 : f32
    %63 = vector.broadcast %cst_32 : f32 to vector<160x128xf32>
    %64 = arith.maximumf %62, %63 : vector<160x128xf32>
    %65 = arith.truncf %64 : vector<160x128xf32> to vector<160x128xbf16>
    %66 = vector.shape_cast %65 : vector<160x128xbf16> to vector<10x16x128xbf16>
    %c0_33 = arith.constant 0 : index
    %c1_34 = arith.constant 1 : index
    %c0_35 = arith.constant 0 : index
    %67 = vector.load %arg8[%c0_33, %c1_34, %c0_35] : memref<10x18x128xbf16, #tpu.memory_space<vmem>>, vector<10x16x128xbf16>
    tpu.vector_store %arg8[%c0_33, %c1_34, %c0_35], %66 {strides = array<i32>} : memref<10x18x128xbf16, #tpu.memory_space<vmem>>, vector<10x16x128xbf16>,
    %cst_36 = arith.constant 0.000000e+00 : bf16
    %68 = vector.broadcast %cst_36 : bf16 to vector<10x1x128xbf16>
    %c0_37 = arith.constant 0 : index
    %c0_38 = arith.constant 0 : index
    %c0_39 = arith.constant 0 : index
    %69 = vector.load %arg8[%c0_37, %c0_38, %c0_39] : memref<10x18x128xbf16, #tpu.memory_space<vmem>>, vector<10x1x128xbf16>
    tpu.vector_store %arg8[%c0_37, %c0_38, %c0_39], %68 {strides = array<i32>} : memref<10x18x128xbf16, #tpu.memory_space<vmem>>, vector<10x1x128xbf16>,
    %c0_40 = arith.constant 0 : index
    %c17 = arith.constant 17 : index
    %c0_41 = arith.constant 0 : index
    %70 = vector.load %arg8[%c0_40, %c17, %c0_41] : memref<10x18x128xbf16, #tpu.memory_space<vmem>>, vector<10x1x128xbf16>
    tpu.vector_store %arg8[%c0_40, %c17, %c0_41], %68 {strides = array<i32>} : memref<10x18x128xbf16, #tpu.memory_space<vmem>>, vector<10x1x128xbf16>,
    %cst_42 = arith.constant 0.000000e+00 : bf16
    %71 = vector.broadcast %cst_42 : bf16 to vector<1x18x128xbf16>
    %c0_i32 = arith.constant 0 : i32
    %72 = arith.cmpi eq, %arg1, %c0_i32 : i32
    %73 = arith.extui %72 : i1 to i32
    %c0_i32_43 = arith.constant 0 : i32
    %74 = arith.cmpi ne, %73, %c0_i32_43 : i32
    scf.if %74 {
      %c0_116 = arith.constant 0 : index
      %c0_117 = arith.constant 0 : index
      %c0_118 = arith.constant 0 : index
      %144 = vector.load %arg8[%c0_116, %c0_117, %c0_118] : memref<10x18x128xbf16, #tpu.memory_space<vmem>>, vector<1x18x128xbf16>
      tpu.vector_store %arg8[%c0_116, %c0_117, %c0_118], %71 {strides = array<i32>} : memref<10x18x128xbf16, #tpu.memory_space<vmem>>, vector<1x18x128xbf16>,
    } else {
    }
    %c1_i32 = arith.constant 1 : i32
    %75 = arith.cmpi eq, %arg1, %c1_i32 : i32
    %76 = arith.extui %75 : i1 to i32
    %c0_i32_44 = arith.constant 0 : i32
    %77 = arith.cmpi ne, %76, %c0_i32_44 : i32
    scf.if %77 {
      %c9 = arith.constant 9 : index
      %c0_116 = arith.constant 0 : index
      %c0_117 = arith.constant 0 : index
      %144 = vector.load %arg8[%c9, %c0_116, %c0_117] : memref<10x18x128xbf16, #tpu.memory_space<vmem>>, vector<1x18x128xbf16>
      tpu.vector_store %arg8[%c9, %c0_116, %c0_117], %71 {strides = array<i32>} : memref<10x18x128xbf16, #tpu.memory_space<vmem>>, vector<1x18x128xbf16>,
    } else {
    }
    %cst_45 = arith.constant 0.000000e+00 : f32
    %78 = vector.broadcast %cst_45 : f32 to vector<128x128xf32>
    %c0_46 = arith.constant 0 : index
    %c0_47 = arith.constant 0 : index
    %c0_48 = arith.constant 0 : index
    %79 = vector.load %arg8[%c0_46, %c0_47, %c0_48] : memref<10x18x128xbf16, #tpu.memory_space<vmem>>, vector<8x16x128xbf16>
    %80 = vector.shape_cast %79 : vector<8x16x128xbf16> to vector<128x128xbf16>
    %c0_49 = arith.constant 0 : index
    %c0_50 = arith.constant 0 : index
    %c0_51 = arith.constant 0 : index
    %81 = vector.load %arg5[%c0_49, %c0_50, %c0_51] : memref<9x128x128xbf16, #tpu.memory_space<vmem>>, vector<1x128x128xbf16>
    %82 = vector.shape_cast %81 : vector<1x128x128xbf16> to vector<128x128xbf16>
    %cst_52 = arith.constant dense<0.000000e+00> : vector<128x128xf32>
    %83 = tpu.matmul %80, %82, %cst_52 {dimension_numbers = #tpu.dot_dimension_numbers<[1], [0], [0], [1], [0, 0, 1, 1], [], []>} : vector<128x128xbf16>, vector<128x128xbf16>, vector<128x128xf32> -> vector<128x128xf32>
    %84 = arith.addf %78, %83 : vector<128x128xf32>
    %c0_53 = arith.constant 0 : index
    %c1_54 = arith.constant 1 : index
    %c0_55 = arith.constant 0 : index
    %85 = vector.load %arg8[%c0_53, %c1_54, %c0_55] : memref<10x18x128xbf16, #tpu.memory_space<vmem>>, vector<8x16x128xbf16>
    %86 = vector.shape_cast %85 : vector<8x16x128xbf16> to vector<128x128xbf16>
    %c1_56 = arith.constant 1 : index
    %c0_57 = arith.constant 0 : index
    %c0_58 = arith.constant 0 : index
    %87 = vector.load %arg5[%c1_56, %c0_57, %c0_58] : memref<9x128x128xbf16, #tpu.memory_space<vmem>>, vector<1x128x128xbf16>
    %88 = vector.shape_cast %87 : vector<1x128x128xbf16> to vector<128x128xbf16>
    %cst_59 = arith.constant dense<0.000000e+00> : vector<128x128xf32>
    %89 = tpu.matmul %86, %88, %cst_59 {dimension_numbers = #tpu.dot_dimension_numbers<[1], [0], [0], [1], [0, 0, 1, 1], [], []>} : vector<128x128xbf16>, vector<128x128xbf16>, vector<128x128xf32> -> vector<128x128xf32>
    %90 = arith.addf %84, %89 : vector<128x128xf32>
    %c0_60 = arith.constant 0 : index
    %c2_61 = arith.constant 2 : index
    %c0_62 = arith.constant 0 : index
    %91 = vector.load %arg8[%c0_60, %c2_61, %c0_62] : memref<10x18x128xbf16, #tpu.memory_space<vmem>>, vector<8x16x128xbf16>
    %92 = vector.shape_cast %91 : vector<8x16x128xbf16> to vector<128x128xbf16>
    %c2_63 = arith.constant 2 : index
    %c0_64 = arith.constant 0 : index
    %c0_65 = arith.constant 0 : index
    %93 = vector.load %arg5[%c2_63, %c0_64, %c0_65] : memref<9x128x128xbf16, #tpu.memory_space<vmem>>, vector<1x128x128xbf16>
    %94 = vector.shape_cast %93 : vector<1x128x128xbf16> to vector<128x128xbf16>
    %cst_66 = arith.constant dense<0.000000e+00> : vector<128x128xf32>
    %95 = tpu.matmul %92, %94, %cst_66 {dimension_numbers = #tpu.dot_dimension_numbers<[1], [0], [0], [1], [0, 0, 1, 1], [], []>} : vector<128x128xbf16>, vector<128x128xbf16>, vector<128x128xf32> -> vector<128x128xf32>
    %96 = arith.addf %90, %95 : vector<128x128xf32>
    %c1_67 = arith.constant 1 : index
    %c0_68 = arith.constant 0 : index
    %c0_69 = arith.constant 0 : index
    %97 = vector.load %arg8[%c1_67, %c0_68, %c0_69] : memref<10x18x128xbf16, #tpu.memory_space<vmem>>, vector<8x16x128xbf16>
    %98 = vector.shape_cast %97 : vector<8x16x128xbf16> to vector<128x128xbf16>
    %c3_70 = arith.constant 3 : index
    %c0_71 = arith.constant 0 : index
    %c0_72 = arith.constant 0 : index
    %99 = vector.load %arg5[%c3_70, %c0_71, %c0_72] : memref<9x128x128xbf16, #tpu.memory_space<vmem>>, vector<1x128x128xbf16>
    %100 = vector.shape_cast %99 : vector<1x128x128xbf16> to vector<128x128xbf16>
    %cst_73 = arith.constant dense<0.000000e+00> : vector<128x128xf32>
    %101 = tpu.matmul %98, %100, %cst_73 {dimension_numbers = #tpu.dot_dimension_numbers<[1], [0], [0], [1], [0, 0, 1, 1], [], []>} : vector<128x128xbf16>, vector<128x128xbf16>, vector<128x128xf32> -> vector<128x128xf32>
    %102 = arith.addf %96, %101 : vector<128x128xf32>
    %c1_74 = arith.constant 1 : index
    %c1_75 = arith.constant 1 : index
    %c0_76 = arith.constant 0 : index
    %103 = vector.load %arg8[%c1_74, %c1_75, %c0_76] : memref<10x18x128xbf16, #tpu.memory_space<vmem>>, vector<8x16x128xbf16>
    %104 = vector.shape_cast %103 : vector<8x16x128xbf16> to vector<128x128xbf16>
    %c4_77 = arith.constant 4 : index
    %c0_78 = arith.constant 0 : index
    %c0_79 = arith.constant 0 : index
    %105 = vector.load %arg5[%c4_77, %c0_78, %c0_79] : memref<9x128x128xbf16, #tpu.memory_space<vmem>>, vector<1x128x128xbf16>
    %106 = vector.shape_cast %105 : vector<1x128x128xbf16> to vector<128x128xbf16>
    %cst_80 = arith.constant dense<0.000000e+00> : vector<128x128xf32>
    %107 = tpu.matmul %104, %106, %cst_80 {dimension_numbers = #tpu.dot_dimension_numbers<[1], [0], [0], [1], [0, 0, 1, 1], [], []>} : vector<128x128xbf16>, vector<128x128xbf16>, vector<128x128xf32> -> vector<128x128xf32>
    %108 = arith.addf %102, %107 : vector<128x128xf32>
    %c1_81 = arith.constant 1 : index
    %c2_82 = arith.constant 2 : index
    %c0_83 = arith.constant 0 : index
    %109 = vector.load %arg8[%c1_81, %c2_82, %c0_83] : memref<10x18x128xbf16, #tpu.memory_space<vmem>>, vector<8x16x128xbf16>
    %110 = vector.shape_cast %109 : vector<8x16x128xbf16> to vector<128x128xbf16>
    %c5_84 = arith.constant 5 : index
    %c0_85 = arith.constant 0 : index
    %c0_86 = arith.constant 0 : index
    %111 = vector.load %arg5[%c5_84, %c0_85, %c0_86] : memref<9x128x128xbf16, #tpu.memory_space<vmem>>, vector<1x128x128xbf16>
    %112 = vector.shape_cast %111 : vector<1x128x128xbf16> to vector<128x128xbf16>
    %cst_87 = arith.constant dense<0.000000e+00> : vector<128x128xf32>
    %113 = tpu.matmul %110, %112, %cst_87 {dimension_numbers = #tpu.dot_dimension_numbers<[1], [0], [0], [1], [0, 0, 1, 1], [], []>} : vector<128x128xbf16>, vector<128x128xbf16>, vector<128x128xf32> -> vector<128x128xf32>
    %114 = arith.addf %108, %113 : vector<128x128xf32>
    %c2_88 = arith.constant 2 : index
    %c0_89 = arith.constant 0 : index
    %c0_90 = arith.constant 0 : index
    %115 = vector.load %arg8[%c2_88, %c0_89, %c0_90] : memref<10x18x128xbf16, #tpu.memory_space<vmem>>, vector<8x16x128xbf16>
    %116 = vector.shape_cast %115 : vector<8x16x128xbf16> to vector<128x128xbf16>
    %c6_91 = arith.constant 6 : index
    %c0_92 = arith.constant 0 : index
    %c0_93 = arith.constant 0 : index
    %117 = vector.load %arg5[%c6_91, %c0_92, %c0_93] : memref<9x128x128xbf16, #tpu.memory_space<vmem>>, vector<1x128x128xbf16>
    %118 = vector.shape_cast %117 : vector<1x128x128xbf16> to vector<128x128xbf16>
    %cst_94 = arith.constant dense<0.000000e+00> : vector<128x128xf32>
    %119 = tpu.matmul %116, %118, %cst_94 {dimension_numbers = #tpu.dot_dimension_numbers<[1], [0], [0], [1], [0, 0, 1, 1], [], []>} : vector<128x128xbf16>, vector<128x128xbf16>, vector<128x128xf32> -> vector<128x128xf32>
    %120 = arith.addf %114, %119 : vector<128x128xf32>
    %c2_95 = arith.constant 2 : index
    %c1_96 = arith.constant 1 : index
    %c0_97 = arith.constant 0 : index
    %121 = vector.load %arg8[%c2_95, %c1_96, %c0_97] : memref<10x18x128xbf16, #tpu.memory_space<vmem>>, vector<8x16x128xbf16>
    %122 = vector.shape_cast %121 : vector<8x16x128xbf16> to vector<128x128xbf16>
    %c7_98 = arith.constant 7 : index
    %c0_99 = arith.constant 0 : index
    %c0_100 = arith.constant 0 : index
    %123 = vector.load %arg5[%c7_98, %c0_99, %c0_100] : memref<9x128x128xbf16, #tpu.memory_space<vmem>>, vector<1x128x128xbf16>
    %124 = vector.shape_cast %123 : vector<1x128x128xbf16> to vector<128x128xbf16>
    %cst_101 = arith.constant dense<0.000000e+00> : vector<128x128xf32>
    %125 = tpu.matmul %122, %124, %cst_101 {dimension_numbers = #tpu.dot_dimension_numbers<[1], [0], [0], [1], [0, 0, 1, 1], [], []>} : vector<128x128xbf16>, vector<128x128xbf16>, vector<128x128xf32> -> vector<128x128xf32>
    %126 = arith.addf %120, %125 : vector<128x128xf32>
    %c2_102 = arith.constant 2 : index
    %c2_103 = arith.constant 2 : index
    %c0_104 = arith.constant 0 : index
    %127 = vector.load %arg8[%c2_102, %c2_103, %c0_104] : memref<10x18x128xbf16, #tpu.memory_space<vmem>>, vector<8x16x128xbf16>
    %128 = vector.shape_cast %127 : vector<8x16x128xbf16> to vector<128x128xbf16>
    %c8_105 = arith.constant 8 : index
    %c0_106 = arith.constant 0 : index
    %c0_107 = arith.constant 0 : index
    %129 = vector.load %arg5[%c8_105, %c0_106, %c0_107] : memref<9x128x128xbf16, #tpu.memory_space<vmem>>, vector<1x128x128xbf16>
    %130 = vector.shape_cast %129 : vector<1x128x128xbf16> to vector<128x128xbf16>
    %cst_108 = arith.constant dense<0.000000e+00> : vector<128x128xf32>
    %131 = tpu.matmul %128, %130, %cst_108 {dimension_numbers = #tpu.dot_dimension_numbers<[1], [0], [0], [1], [0, 0, 1, 1], [], []>} : vector<128x128xbf16>, vector<128x128xbf16>, vector<128x128xf32> -> vector<128x128xf32>
    %132 = arith.addf %126, %131 : vector<128x128xf32>
    %c0_109 = arith.constant 0 : index
    %c0_110 = arith.constant 0 : index
    %133 = vector.load %arg6[%c0_109, %c0_110] : memref<1x128xf32, #tpu.memory_space<vmem>>, vector<1x128xf32>
    %134 = vector.broadcast %133 : vector<1x128xf32> to vector<128x128xf32>
    %135 = arith.addf %132, %134 : vector<128x128xf32>
    %136 = vector.extract_strided_slice %30 {offsets = [1, 0, 0], sizes = [8, 16, 128], strides = [1, 1, 1]} : vector<10x16x128xbf16> to vector<8x16x128xbf16>
    %137 = vector.shape_cast %136 : vector<8x16x128xbf16> to vector<128x128xbf16>
    %138 = arith.extf %137 : vector<128x128xbf16> to vector<128x128xf32>
    %139 = arith.addf %135, %138 : vector<128x128xf32>
    %cst_111 = arith.constant 0.000000e+00 : f32
    %140 = vector.broadcast %cst_111 : f32 to vector<128x128xf32>
    %141 = arith.maximumf %139, %140 : vector<128x128xf32>
    %142 = vector.shape_cast %141 : vector<128x128xf32> to vector<1x8x16x128xf32>
    %c0_112 = arith.constant 0 : index
    %c0_113 = arith.constant 0 : index
    %c0_114 = arith.constant 0 : index
    %c0_115 = arith.constant 0 : index
    %143 = vector.load %arg7[%c0_112, %c0_113, %c0_114, %c0_115] : memref<1x8x16x128xf32, #tpu.memory_space<vmem>>, vector<1x8x16x128xf32>
    tpu.vector_store %arg7[%c0_112, %c0_113, %c0_114, %c0_115], %142 {strides = array<i32>} : memref<1x8x16x128xf32, #tpu.memory_space<vmem>>, vector<1x8x16x128xf32>,
    return
  }
  func.func @transform_0(%arg0: i32, %arg1: i32) -> (i32, i32, i32, i32) {
    %c0_i32 = arith.constant 0 : i32
    %c0_i32_0 = arith.constant 0 : i32
    %c0_i32_1 = arith.constant 0 : i32
    %c0_i32_2 = arith.constant 0 : i32
    return %arg0, %c0_i32, %c0_i32_0, %c0_i32_1 : i32, i32, i32, i32
  }
  func.func @transform_1(%arg0: i32, %arg1: i32) -> (i32, i32, i32) {
    %c0_i32 = arith.constant 0 : i32
    %c0_i32_0 = arith.constant 0 : i32
    %c0_i32_1 = arith.constant 0 : i32
    %c0_i32_2 = arith.constant 0 : i32
    return %c0_i32, %c0_i32_0, %c0_i32_1 : i32, i32, i32
  }
  func.func @transform_2(%arg0: i32, %arg1: i32) -> (i32, i32) {
    %c0_i32 = arith.constant 0 : i32
    %c0_i32_0 = arith.constant 0 : i32
    %c0_i32_1 = arith.constant 0 : i32
    return %c0_i32, %c0_i32_0 : i32, i32
  }
  func.func @transform_3(%arg0: i32, %arg1: i32) -> (i32, i32, i32) {
    %c0_i32 = arith.constant 0 : i32
    %c0_i32_0 = arith.constant 0 : i32
    %c0_i32_1 = arith.constant 0 : i32
    %c0_i32_2 = arith.constant 0 : i32
    return %c0_i32, %c0_i32_0, %c0_i32_1 : i32, i32, i32
  }
  func.func @transform_4(%arg0: i32, %arg1: i32) -> (i32, i32) {
    %c0_i32 = arith.constant 0 : i32
    %c0_i32_0 = arith.constant 0 : i32
    %c0_i32_1 = arith.constant 0 : i32
    return %c0_i32, %c0_i32_0 : i32, i32
  }
  func.func @transform_5(%arg0: i32, %arg1: i32) -> (i32, i32, i32, i32) {
    %c0_i32 = arith.constant 0 : i32
    %c0_i32_0 = arith.constant 0 : i32
    %c0_i32_1 = arith.constant 0 : i32
    return %arg0, %arg1, %c0_i32, %c0_i32_0 : i32, i32, i32, i32
  }
}

</mosaic_0001>

<bundles_post_ra>
// kernel: block_forward_pallas.1
= control target key start
LH: loop header
LB: loop body
LE: loop exit
PB: predicated region body
PF: predicated region fallthrough
CT: control target
= control target key end

     0   :  { %s10258_s0 = inlined_call_operand.hbm [shape: bf16[2,20,18,128], index: 0, kind: input, shape index: {}]   ;;  %s10259_s1 = inlined_call_operand.hbm [shape: bf16[9,128,128], index: 1, kind: input, shape index: {}]   ;;  %s10260_s2 = inlined_call_operand.hbm [shape: f32[1,128], index: 2, kind: input, shape index: {}]   ;;  %s10261_s3 = inlined_call_operand.hbm [shape: bf16[9,128,128], index: 3, kind: input, shape index: {}]   ;;  %s10262_s4 = inlined_call_operand.hbm [shape: f32[1,128], index: 4, kind: input, shape index: {}]   ;;  %s10263_s5 = inlined_call_operand.hbm [shape: f32[2,16,16,128], index: 5, kind: output, shape index: {}]  }
   0x1   :  { %10288 = sst [smem:[#allocation32_spill]] %s10259_s1 }
   0x2   :  { %10289 = sst [smem:[#allocation33_spill]] %s10260_s2 }
   0x3   :  { %10290 = sst [smem:[#allocation34_spill]] %s10263_s5 }
   0x4   :  { %10 = vsyncpa [#allocation4], 0 }
   0x5   :  { %12 = vsyncpa [#allocation4 + $0x1], 0 }
   0x6   :  { %13 = vsyncpa [#allocation7], 0 }
   0x7   :  { %14 = vsyncpa [#allocation10], 0 }
   0x8   :  { %15 = vsyncpa [#allocation5], 0 }
   0x9   :  { %17 = vsyncpa [#allocation5 + $0x1], 0  ;;  %s8418_s18 = smov 0   ;;  %s8420_s19 = smov 0  }
   0xa   :  { %s8422_s20 = smov 0   ;;  %s8424_s21 = smov 0  }
   0xb   :  { %s8426_s22 = smov 0   ;;  %s8428_s23 = smov 0  }
   0xc   :  { %s8430_s24 = smov 0   ;;  %s8432_s25 = smov 0  }
   0xd   :  { %s8434_s26 = smov 0   ;;  %s8436_s27 = smov 0  }
   0xe   :  { %s8438_s28 = smov 0  }
   0xf LB: > { %10291 = sst [smem:[#allocation17_spill]] %s8334_s18  ;;  %s6203_s29 = sadd.s32 4294967295, %s8374_s28   ;;  %s8374_s28 = sphi %s8438_s28, %s23_s28   ;;  %s8370_s27 = sphi %s8436_s27, %s10391_s27   ;;  %s8366_s26 = sphi %s8434_s26, %s10390_s26   ;;  %s8362_s25 = sphi %s8432_s25, %s10389_s25   ;;  %s8358_s24 = sphi %s8430_s24, %s10388_s24   ;;  %s8354_s23 = sphi %s8428_s23, %s10387_s23   ;;  %s8350_s22 = sphi %s8426_s22, %s10386_s22   ;;  %s8346_s21 = sphi %s8424_s21, %s10385_s21   ;;  %s8342_s20 = sphi %s8422_s20, %s10384_s20   ;;  %s8338_s19 = sphi %s8420_s19, %s10383_s19   ;;  %s8334_s18 = sphi %s8418_s18, %s10382_s18  }
  0x10   : > { %10292 = sst [smem:[#allocation18_spill]] %s8338_s19  ;;  %s6204_s30 = sadd.s32 4294967294, %s8374_s28  }
  0x11   : > { %10293 = sst [smem:[#allocation19_spill]] %s8362_s25  ;;  %p55_p0 = scmp.ne.s32.totalorder %s8350_s22, %s8346_s21 }
  0x12   : > { %p8474_p1 = scmp.eq.s32.totalorder %s6203_s29, 0  ;;  %p164_p2 = scmp.ne.s32.totalorder %s8342_s20, %s8338_s19 }
  0x13   : > { %p165_p3 = scmp.eq.s32.totalorder %s6203_s29, 3  ;;  %p170_p5 = scmp.ne.s32.totalorder %s8338_s19, %s8334_s18 }
  0x14   : > { %s10294_s6 = scalar_select %p8474_p1, 1, 0 }
  0x15   : > { %p8482_p4 = por %p8474_p1, %p55_p0  ;;  %p8488_p6 = por %p165_p3, %p164_p2 }
  0x16   : > { %p171_p7 = scmp.eq.s32.totalorder %s6204_s30, 3  ;;  %p6205_p8 = scmp.ge.s32.totalorder %s8374_s28, 1 }
  0x17   : > { %s10295_s7 = scalar_select %p8482_p4, 1, 0 }
  0x18   : > { %s10296_s8 = scalar_select %p8488_p6, 1, 0 }
  0x19   : > { %p178_p9 = scmp.lt.s32.totalorder %s8374_s28, 5  ;;  %p8494_p10 = por %p171_p7, %p170_p5 }
  0x1a   : > { %10297 = sst [smem:[#allocation20_spill]] %s10296_s8  ;;  %s8376_s11 = smov [#allocation6]  }
  0x1b   : > { %s10298_s9 = scalar_select %p8494_p10, 1, 0 }
  0x1c   : > { %p8498_p11 = pnand %p6205_p8, %p178_p9  ;;  %s190_s12 = sshll.u32 %s8376_s11, 4  ;;  %s191_s12 = int_to_ptr.vmem [resolvable:$true] %s190_s12 }
  0x1d   : > { %10299 = sst [smem:[#allocation21_spill]] %s10298_s9  ;;  %s8377_s14 = smov [#allocation9]  }
  0x1e   : > { %s10300_s10 = scalar_select %p8498_p11, 1, 0 }
  0x1f   : > { %p7791_p12 = pneg %p8498_p11  ;;  %s214_s15 = sshll.u32 %s8377_s14, 4  ;;  %s8510_s15 = int_to_ptr.vmem [resolvable:$true] %s214_s15 }
  0x20   : > { %s10302_s1 = sld [smem:[#allocation32_spill]] }
  0x21   : > { %p8506_p13 = pnand %p7791_p12, %p8474_p1 }
  0x23   : > { %p8520_p2 = pneg %p8506_p13 }
  0x26   : > { %s8102_s21 = scalar_lea.hbm %s10302_s1, 9216 }
  0x27   : > { %p8103_p0 = scmp.ne.s32.totalorder %s10302_s1, %s8102_s21  ;;  %p8109_p7 = scmp.lt.u32.totalorder %s8102_s21, %s10302_s1 }
  0x29   : > { %p8105_p3 = pnand %p8520_p2, %p8103_p0 }
  0x2b   : > { %p8106_p5 = pneg %p8105_p3 }
  0x2d   : > { %p8111_p8 = pnand %p8109_p7, %p8106_p5 }
  0x2f   : > { %8114 = shalt.err (!%p8111_p8)
}
  0x30   : > { %s8115_s16 = scalar_lea.vmem %s191_s12, 9216  ;;  %p8123_p6 = scmp.lt.s32.totalorder %s191_s12, %s191_s12 }
  0x31   : > { %p8116_p9 = scmp.ne.s32.totalorder %s191_s12, %s8115_s16  ;;  %p8124_p1 = scmp.lt.s32.totalorder %s8115_s16, %s8115_s16 }
  0x33   : > { %p8118_p12 = pnand %p8116_p9, %p8520_p2  ;;  %p8125_p4 = por %p8124_p1, %p8123_p6 }
  0x35   : > { %p8119_p10 = pneg %p8118_p12 }
  0x37   : > { %p8126_p11 = pnand %p8125_p4, %p8119_p10 }
  0x39   : > { %8129 = shalt.err (!%p8126_p11)
}
  0x3a   : > { %s10276_s17 = smov 64   ;;  %s10277_s29 = smov 4  }
  0x3b   : > { %7794 = dma.hbm_to_vmem [thread:$0]  (!%p8506_p13), %s10302_s1, 9216, %s191_s12, [#allocation7], %s10276_s17, %s10276_s17, %s10277_s29  }
  0x3c   : > { %s8130_s18 = scalar_lea.hbm %s10261_s3, 9216 }
  0x3d   : > { %p8131_p1 = scmp.ne.s32.totalorder %s10261_s3, %s8130_s18  ;;  %p8137_p10 = scmp.lt.u32.totalorder %s8130_s18, %s10261_s3 }
  0x3f   : > { %p8133_p4 = pnand %p8131_p1, %p8520_p2 }
  0x41   : > { %p8134_p6 = pneg %p8133_p4 }
  0x43   : > { %p8139_p11 = pnand %p8137_p10, %p8134_p6 }
  0x45   : > { %8142 = shalt.err (!%p8139_p11)
}
  0x46   : > { %s8143_s12 = scalar_lea.vmem %s8510_s15, 9216  ;;  %p8151_p7 = scmp.lt.s32.totalorder %s8510_s15, %s8510_s15 }
  0x47   : > { %p8144_p0 = scmp.ne.s32.totalorder %s8510_s15, %s8143_s12  ;;  %p8152_p8 = scmp.lt.s32.totalorder %s8143_s12, %s8143_s12 }
  0x49   : > { %p8146_p3 = pnand %p8144_p0, %p8520_p2  ;;  %p8153_p9 = por %p8152_p8, %p8151_p7 }
  0x4b   : > { %p8147_p5 = pneg %p8146_p3 }
  0x4d   : > { %p8154_p12 = pnand %p8153_p9, %p8147_p5 }
  0x4f   : > { %8157 = shalt.err (!%p8154_p12)
}
  0x50   : > { %7800 = dma.hbm_to_vmem [thread:$0]  (!%p8506_p13), %s10261_s3, 9216, %s8510_s15, [#allocation10], %s10276_s17, %s10276_s17, %s10277_s29  }
  0x51   : > { %s8380_s25 = smov [#allocation8]   ;;  %s8381_s9 = smov [#allocation11]  }
  0x52   : > { %s204_s8 = sshll.u32 %s8380_s25, 4  ;;  %s228_s21 = sshll.u32 %s8381_s9, 4  ;;  %s205_s8 = int_to_ptr.vmem [resolvable:$true] %s204_s8  ;;  %s229_s21 = int_to_ptr.vmem [resolvable:$true] %s228_s21 }
  0x53   : > { %s10304_s2 = sld [smem:[#allocation33_spill]] }
  0x59   : > { %s8158_s16 = scalar_lea.hbm %s10304_s2, 16 }
  0x5a   : > { %p8159_p1 = scmp.ne.s32.totalorder %s10304_s2, %s8158_s16  ;;  %p8165_p10 = scmp.lt.u32.totalorder %s8158_s16, %s10304_s2 }
  0x5c   : > { %p8161_p4 = pnand %p8159_p1, %p8520_p2 }
  0x5e   : > { %p8162_p6 = pneg %p8161_p4 }
  0x60   : > { %p8167_p11 = pnand %p8165_p10, %p8162_p6 }
  0x62   : > { %8170 = shalt.err (!%p8167_p11)
}
  0x63   : > { %s8171_s15 = scalar_lea.vmem %s205_s8, 16  ;;  %s8178_s18 = scalar_lea.vmem %s205_s8, 32 }
  0x64   : > { %p8172_p0 = scmp.ne.s32.totalorder %s205_s8, %s8171_s15  ;;  %p8179_p7 = scmp.lt.s32.totalorder %s205_s8, %s205_s8 }
  0x65   : > { %p8180_p8 = scmp.lt.s32.totalorder %s8178_s18, %s8171_s15 }
  0x66   : > { %p8174_p3 = pnand %p8172_p0, %p8520_p2 }
  0x67   : > { %p8181_p9 = por %p8180_p8, %p8179_p7 }
  0x68   : > { %p8175_p5 = pneg %p8174_p3 }
  0x6a   : > { %p8182_p12 = pnand %p8181_p9, %p8175_p5 }
  0x6c   : > { %8185 = shalt.err (!%p8182_p12)
}
  0x6d   : > { %7797 = dma.hbm_to_vmem [thread:$0]  (!%p8506_p13), %s10304_s2, 16, %s205_s8, [#allocation7]  }
  0x6e   : > { %s8186_s30 = scalar_lea.hbm %s10262_s4, 16 }
  0x6f   : > { %p8187_p1 = scmp.ne.s32.totalorder %s10262_s4, %s8186_s30  ;;  %p8193_p10 = scmp.lt.u32.totalorder %s8186_s30, %s10262_s4 }
  0x71   : > { %p8189_p4 = pnand %p8187_p1, %p8520_p2 }
  0x73   : > { %p8190_p6 = pneg %p8189_p4 }
  0x75   : > { %p8195_p11 = pnand %p8193_p10, %p8190_p6 }
  0x77   : > { %8198 = shalt.err (!%p8195_p11)
}
  0x78   : > { %s8199_s15 = scalar_lea.vmem %s229_s21, 16  ;;  %s8206_s8 = scalar_lea.vmem %s229_s21, 32 }
  0x79   : > { %p8200_p0 = scmp.ne.s32.totalorder %s229_s21, %s8199_s15  ;;  %p8207_p7 = scmp.lt.s32.totalorder %s229_s21, %s229_s21 }
  0x7a   : > { %p8208_p8 = scmp.lt.s32.totalorder %s8206_s8, %s8199_s15 }
  0x7b   : > { %p8202_p3 = pnand %p8200_p0, %p8520_p2 }
  0x7c   : > { %p8209_p9 = por %p8208_p8, %p8207_p7 }
  0x7d   : > { %p8203_p5 = pneg %p8202_p3 }
  0x7f   : > { %p8210_p12 = pnand %p8209_p9, %p8203_p5 }
  0x81   : > { %8213 = shalt.err (!%p8210_p12)
}
  0x82   : > { %7803 = dma.hbm_to_vmem [thread:$0]  (!%p8506_p13), %s10262_s4, 16, %s229_s21, [#allocation10]  }
  0x83   : > { %s32_s11 = sadd.s32 1, %s8366_s26  ;;  %s35_s13 = sadd.s32 1, %s8370_s27 }
  0x84   : > { %p33_p2 = scmp.ge.s32.totalorder %s32_s11, 2  ;;  %s42_s25 = sadd.s32 1, %s8354_s23 }
  0x85   : > { %p49_p1 = scmp.ne.s32.totalorder %s8354_s23, %s8350_s22  ;;  %p50_p4 = scmp.eq.s32.totalorder %s8374_s28, 0 }
  0x86   : > { %s10393_s11 = smov (%p33_p2, %s32_s11), 0  ;;  %s10395_s13 = smov (!%p33_p2, %s35_s13), %s8370_s27 }
  0x87   : > { %s150_s19 = ssub.s32 %s8366_s26, %s10393_s11  ;;  %p37_p6 = scmp.ge.s32.totalorder %s10395_s13, 2 }
  0x88   : > { %s154_s9 = sadd.s32 1, %s8342_s20  ;;  %p8613_p10 = por %p50_p4, %p49_p1 }
  0x89   : > { %p7816_p13 = scmp.lt.s32.totalorder %s8374_s28, 4  ;;  %s10397_s13 = smov (%p37_p6, %s10395_s13), 0 }
  0x8a   : > { %s239_s30 = sand.u32 1, %s8354_s23   ;;  %s7769_s14 = smul.u32 3840, %s8370_s27 }
  0x8b   : > { %s39_s16 = ssub.s32 %s8370_s27, %s10397_s13  ;;  %s7768_s5 = smul.u32 240, %s239_s30 }
  0x8c   : > { %p40_p11 = scmp.eq.s32.totalorder %s39_s16, 0  ;;  %s151_s12 = sor.u32 %s150_s19, %s39_s16 }
  0x8d   : > { %p152_p0 = scmp.eq.s32.totalorder %s151_s12, 0  ;;  %s8633_s17 = scalar_lea.hbm %s10258_s0, %s7769_s14 }
  0x8e   : > { %s8625_s15 = scalar_select %p40_p11, %s8354_s23, %s42_s25  }
  0x8f   : > { %s8628_s8 = scalar_select %p152_p0, %s8342_s20, %s154_s9  }
  0x90   : > { %s243_s29 = scalar_lea.vmem [#allocation3], %s7768_s5  ;;  %p8639_p3 = pnand %p7816_p13, %p8613_p10 }
  0x91   : > { %s250_s2 = sshll.u32 %s243_s29, 4  ;;  %s8645_s25 = scalar_lea.sflag [#allocation4], %s239_s30  ;;  %s8643_s2 = int_to_ptr.vmem [resolvable:$true] %s250_s2 }
  0x92   : > { %s8214_s9 = scalar_lea.hbm %s8633_s17, 3840  ;;  %p8216_p7 = pneg %p8639_p3 }
  0x93   : > { %p8215_p5 = scmp.ne.s32.totalorder %s8633_s17, %s8214_s9  ;;  %s8219_s14 = scalar_lea.hbm %s10258_s0, 7680 }
  0x94   : > { %p8220_p12 = scmp.lt.u32.totalorder %s8633_s17, %s10258_s0  ;;  %p8221_p2 = scmp.lt.u32.totalorder %s8219_s14, %s8214_s9 }
  0x95   : > { %p8217_p8 = pnand %p8216_p7, %p8215_p5  ;;  %p8223_p4 = scmp.lt.u32.totalorder %s8214_s9, %s8633_s17 }
  0x96   : > { %p8222_p1 = por %p8221_p2, %p8220_p12 }
  0x97   : > { %p8218_p9 = pneg %p8217_p8 }
  0x98   : > { %p8224_p6 = por %p8223_p4, %p8222_p1 }
  0x9a   : > { %p8225_p10 = pnand %p8224_p6, %p8218_p9 }
  0x9c   : > { %8228 = shalt.err (!%p8225_p10)
}
  0x9d   : > { %s8229_s30 = scalar_lea.vmem %s8643_s2, 3840  ;;  %s8382_s5 = smov [#allocation3]  }
  0x9e   : > { %p8230_p13 = scmp.ne.s32.totalorder %s8643_s2, %s8229_s30  ;;  %s8234_s18 = sshll.u32 %s8382_s5, 4  ;;  %s8235_s18 = int_to_ptr.vmem [resolvable:$false] %s8234_s18 }
  0x9f   : > { %s8236_s1 = scalar_lea.vmem %s8235_s18, 7680  ;;  %p8237_p5 = scmp.lt.s32.totalorder %s8643_s2, %s8235_s18 }
  0xa0   : > { %p8232_p11 = pnand %p8230_p13, %p8216_p7  ;;  %p8238_p8 = scmp.lt.s32.totalorder %s8236_s1, %s8229_s30 }
  0xa2   : > { %p8233_p0 = pneg %p8232_p11  ;;  %p8239_p12 = por %p8238_p8, %p8237_p5 }
  0xa4   : > { %p8240_p2 = pnand %p8239_p12, %p8233_p0 }
  0xa6   : > { %8243 = shalt.err (!%p8240_p2)
}
  0xa7   : > { %s10307_s9 = smov 4   ;;  %s10308_s29 = smov 64  }
  0xa8   : > { %7807 = dma.hbm_to_vmem [thread:$0]  (!%p8639_p3), %s8633_s17, 3840, %s8643_s2, %s8645_s25, %s10308_s29, %s10308_s29, %s10307_s9  }
  0xa9   : > { %p10309_p7 = scmp.ne.s32.totalorder %s10300_s10, 0 }
  0xab   : > { %262 = sbr.rel (%p10309_p7) target bundleno = 1348 (0x544), region = 40 }
  0xb2   : > { %s264_s21 = sand.u32 1, %s8350_s22   ;;  %p10310_p9 = scmp.ne.s32.totalorder %s10295_s7, 0 }
  0xb3   : > { %s7770_s14 = smul.u32 240, %s264_s21  ;;  %s265_s16 = scalar_lea.sflag [#allocation4], %s264_s21 }
  0xb5   : > { %s268_s12 = scalar_lea.vmem [#allocation3], %s7770_s14 }
  0xb6   : > { %8317 = dma.done.wait (%p10310_p9), %s265_s16, 3840  }
  0xb7   : > { %8319 = vsyncadd (%p10310_p9), %s265_s16, 4294963456  ;;  %p10311_p1 = scmp.ne.s32.totalorder %s10294_s6, 0 }
  0xb9   : > { %8321 = dma.done.wait (%p10311_p1), [#allocation7], 9232  }
  0xba   : > { %8323 = vsyncadd (%p10311_p1), [#allocation7], 4294958064 }
  0xbb   : > { %8325 = dma.done.wait (%p10311_p1), [#allocation10], 9232  }
  0xbc   : > { %8327 = vsyncadd (%p10311_p1), [#allocation10], 4294958064  ;;  %v7920_v0 = vld [vmem:[#allocation6] sm:$0xff]   ;;  %v7921_v1 = vld [vmem:[#allocation6 + $0x8] sm:$0xff]   ;;  %s6540_s2 = smul.u32 96, %s8358_s24  ;;  %vm1061_vm0 = vcmask 1042432  }
  0xbd   : > { %6904 = vmatprep.subr.bf16.mxu0 %v7920_v0  ;;  %v7922_v2 = vld [vmem:[#allocation6 + $0x10] sm:$0xff]   ;;  %v7923_v3 = vld [vmem:[#allocation6 + $0x18] sm:$0xff]   ;;  %v7924_v7 = vld [vmem:[#allocation6 + $0x20] sm:$0xff]   ;;  %vm1062_vm1 = vcmask 1046532   ;;  %vm369_vm3 = vsmask.f32 3328 }
  0xbe   : > { %6905 = vmatpush3.bf16.msra.mxu0 %v7920_v0  ;;  %s8692_s7 = scalar_lea.vmem %s268_s12, %s6540_s2 [#allocation3]  ;;  %v7925_v8 = vld [vmem:[#allocation6 + $0x28] sm:$0xff]   ;;  %v7926_v15 = vld [vmem:[#allocation6 + $0x30] sm:$0xff]   ;;  %v7927_v23 = vld [vmem:[#allocation6 + $0x38] sm:$0xff]   ;;  %vm370_vm4 = vsmask.f32 7440  ;;  %s10355_s6 = sld [smem:[#allocation18_spill]] }
  0xbf   : > { %6906 = vmatprep.subr.bf16.mxu0 %v7921_v1  ;;  %v8695_v4 = vld [vmem:[%s8692_s7] sm:$0xf]  ;;  %v8698_v5 = vld [vmem:[%s8692_s7 + $0x4] sm:$0xf]  ;;  %v8703_v9 = vld [vmem:[%s8692_s7 + $0x18] sm:$0xf] }
  0xc0   : > { %v6239_v6 = vcombine.low %v8695_v4, %v8698_v5  ;;  %v8706_v10 = vld [vmem:[%s8692_s7 + $0x1c] sm:$0xf]  ;;  %v421_v11 = vshrl.u32 %v8703_v9, 16  ;;  %v424_v12 = vshll.u32 %v8703_v9, 16  ;;  %v8713_v16 = vld [vmem:[%s8692_s7 + $0x10] sm:$0xf]  ;;  %vm8830_vm2 = vmor %vm1061_vm0, %vm1062_vm1 }
  0xc1   : > { %v430_v13 = vshll.u32 %v8706_v10, 16  ;;  %v434_v14 = vshrl.u32 %v8706_v10, 16  ;;  %v1073_v17 = vrot.slane %v8713_v16, 5  ;;  %v8717_v18 = vld [vmem:[%s8692_s7 + $0xc] sm:$0xf]  ;;  %v6257_v24 = vrot.slane %v8695_v4, 9  ;;  %vm8932_vm5 = vmor %vm369_vm3, %vm370_vm4 }
  0xc2   : > { %6907 = vmatpush3.bf16.msra.mxu0 %v7921_v1  ;;  %6920 = vmatprep.mubr.bf16.mxu0 %v6239_v6  ;;  %v423_v19 = vrot.slane %v421_v11, 4  ;;  %v426_v20 = vrot.slane %v424_v12, 5  ;;  %v1066_v25 = vrot.slane %v8698_v5, 5  ;;  %v397_v26 = vshrl.u32 %v8717_v18, 16  ;;  %v8732_v31 = vld [vmem:[%s8692_s7 + $0x24] sm:$0xf] }
  0xc3   : > { %6908 = vmatprep.subr.bf16.mxu0 %v7922_v2  ;;  %v8719_v21 = vrot.slane %v430_v13, 5  ;;  %v436_v22 = vrot.slane %v434_v14, 4  ;;  %v400_v27 = vshll.u32 %v8717_v18, 16  ;;  %v410_v28 = vshrl.u32 %v8713_v16, 16  ;;  %v7930_v32 = vld [vmem:[#allocation6 + $0x80] sm:$0xff]   ;;  %v7931_v47 = vld [vmem:[#allocation6 + $0x88] sm:$0xff]  }
  0xc4   : > { %v6258_v29 = vrot.slane %v8717_v18, 9  ;;  %v8729_v30 = vrot.slane %v1073_v17, 4  ;;  %v427_v33 = vor.u32 %v426_v20, %v423_v19  ;;  %v8736_v35 = vld [vmem:[%s8692_s7 + $0x28] sm:$0xf]  ;;  %v445_v36 = vshrl.u32 %v8732_v31, 16  ;;  %v7936_v12 = vld [vmem:[#allocation6 + $0x98] sm:$0xff]  }
  0xc5   : > { %v437_v34 = vor.u32 %v436_v22, %v8719_v21  ;;  %v448_v37 = vshll.u32 %v8732_v31, 16  ;;  %v8741_v38 = vld [vmem:[%s8692_s7 + $0x30] sm:$0xf]  ;;  %v8744_v39 = vld [vmem:[%s8692_s7 + $0x34] sm:$0xf]  ;;  %v8758_v46 = vcombine.low %v8717_v18, %v8713_v16  ;;  %v8766_v50 = vcombine.low %v8703_v9, %v8706_v10  ;;  %v7934_v60 = vld [vmem:[#allocation6 + $0x90] sm:$0xff]  }
  0xc6   : > { %6909 = vmatpush3.bf16.msra.mxu0 %v7922_v2  ;;  %v8751_v44 = vld [vmem:[%s8692_s7 + $0x3c] sm:$0xf]  ;;  %v8754_v45 = vld [vmem:[%s8692_s7 + $0x40] sm:$0xf]  ;;  %v8760_v48 = vrot.slane %v427_v33, 4  ;;  %v1080_v19 = vrot.slane %v8706_v10, 5  ;;  %v8817_v20 = vcombine.low %v8741_v38, %v8744_v39  ;;  %v8853_v56 = vsel %vm8830_vm2, %v6257_v24, %v1066_v25 }
  0xc7   : > { %6910 = vmatprep.subr.bf16.mxu0 %v7923_v3  ;;  %v8762_v49 = vrot.slane %v437_v34, 4  ;;  %v8771_v53 = vld [vmem:[%s8692_s7 + $0x48] sm:$0xf]  ;;  %v8775_v55 = vld [vmem:[%s8692_s7 + $0x4c] sm:$0xf]  ;;  %v1068_v33 = vrot.slane %v1066_v25, 4  ;;  %v8873_v54 = vcombine.low %v8751_v44, %v8754_v45 }
  0xc8   : > { %v8781_v59 = vld [vmem:[%s8692_s7 + $0x54] sm:$0xf]  ;;  %v8785_v61 = vld [vmem:[%s8692_s7 + $0x58] sm:$0xf]  ;;  %v8790_v0 = vld [vmem:[%s8692_s7 + $0x60] sm:$0xf] }
  0xc9   : > { %v8794_v1 = vld [vmem:[%s8692_s7 + $0x64] sm:$0xf]  ;;  %v8799_v6 = vld [vmem:[%s8692_s7 + $0x6c] sm:$0xf]  ;;  %v8809_v11 = vld [vmem:[%s8692_s7 + $0x14] sm:$0x1] }
  0xca   : > { %6911 = vmatpush3.bf16.msra.mxu0 %v7923_v3  ;;  %v325_v22 = vld [vmem:[%s8692_s7 + $0x20] sm:$0x1]  ;;  %v8836_v14 = vld [vmem:[%s8692_s7 + $0x2c] sm:$0x1]  ;;  %v1087_v13 = vrot.slane %v8736_v35, 5  ;;  %v1082_v3 = vrot.slane %v1080_v19, 4 }
  0xcb   : > { %6912 = vmatprep.subr.bf16.mxu0 %v7924_v7  ;;  %v1083_v2 = vrot.slane %v325_v22, 5  ;;  %v8841_v63 = vld [vmem:[%s8692_s7 + $0x38] sm:$0x1]  ;;  %v440_v58 = vshll.u32 %v325_v22, 16  ;;  %v1094_v57 = vrot.slane %v8744_v39, 5  ;;  %v1090_v22 = vrot.slane %v8836_v14, 5 }
  0xcc   : > { %v6261_v62 = vrot.slane %v8741_v38, 9  ;;  %v1089_v24 = vrot.slane %v1087_v13, 4  ;;  %v1097_v25 = vrot.slane %v8841_v63, 5  ;;  %v399_v51 = vrot.slane %v397_v26, 4  ;;  %s308_s10 = sand.u32 1, %s10355_s6   ;;  %p6362_p3 = scmp.ne.s32.totalorder %s8358_s24, 0 }
  0xcd   : > { %v1096_v52 = vrot.slane %v1094_v57, 4  ;;  %v442_v43 = vrot.slane %v440_v58, 5  ;;  %v406_v41 = vshll.u32 %v8713_v16, 16  ;;  %s9223_s17 = sshll.u32 %s308_s10, 7  ;;  %vm2759_vm6 = vsmask.f32 256 }
  0xce   : > { %6913 = vmatpush3.bf16.msra.mxu0 %v7924_v7  ;;  %v8803_v7 = vcombine.low %v8732_v31, %v8736_v35  ;;  %v1091_v40 = vsel %vm8830_vm2, %v1089_v24, %v1090_v22  ;;  %v412_v22 = vrot.slane %v410_v28, 4  ;;  %v416_v28 = vshll.u32 %v8809_v11, 16  ;;  %s9546_s19 = scalar_lea.vmem [#allocation12], %s9223_s17 }
  0xcf   : > { %6914 = vmatprep.subr.bf16.mxu0 %v7925_v8  ;;  %v1098_v58 = vsel %vm8830_vm2, %v1096_v52, %v1097_v25  ;;  %v408_v52 = vrot.slane %v406_v41, 5  ;;  %v8950_v41 = vsel %vm8932_vm5, %v8762_v49, %v442_v43  ;;  %v10318_v43 = vshrl.u32 %v8741_v38, 16 }
  0xd0   : > { %10316 = vst [vmem:[#allocation22_spill] sm:$0xff] %v8950_v41  ;;  %vm2962_vm7 = vcmask 1043456   ;;  %vm2963_vm8 = vsmask.f32 7938  ;;  %vm2969_vm9 = vcmask 1040384  }
  0xd1   : > { %v471_v49 = vrot.slane %v10318_v43, 4  ;;  %vm2760_vm10 = vsmask.f32 4368  ;;  %vm9358_vm11 = vmand %vm2962_vm7, %vm2963_vm8 }
  0xd2   : > { %6915 = vmatpush3.bf16.msra.mxu0 %v7925_v8  ;;  %v8806_v8 = vld [vmem:[%s8692_s7 + $0x8] sm:$0x1]  ;;  %vm9365_vm12 = vmand %vm2969_vm9, %vm2759_vm6 }
  0xd3   : > { %6916 = vmatprep.subr.bf16.mxu0 %v7926_v15  ;;  %v1069_v34 = vrot.slane %v8806_v8, 5  ;;  %vm9371_vm13 = vmor %vm2759_vm6, %vm2760_vm10 }
  0xd4   : > { %vm9407_vm14 = vmand %vm2969_vm9, %vm2963_vm8 }
  0xd5   : > { %v8865_v5 = vsel %vm8830_vm2, %v1068_v33, %v1069_v34  ;;  %v1084_v33 = vsel %vm8830_vm2, %v1082_v3, %v1083_v2  ;;  %v8884_v34 = vld [vmem:[%s8692_s7 + $0x44] sm:$0x1] }
  0xd6   : > { %6917 = vmatpush3.bf16.msra.mxu0 %v7926_v15  ;;  %v1076_v15 = vrot.slane %v8809_v11, 5  ;;  %v6267_v3 = vcombine.low %v8853_v56, %v8865_v5  ;;  %v7945_v11 = vld [vmem:[#allocation6 + $0xb8] sm:$0xff]  }
  0xd7   : > { %6918 = vmatprep.subr.bf16.mxu0 %v7927_v23 }
  0xd8   : > { %v1077_v4 = vsel %vm8830_vm2, %v8729_v30, %v1076_v15  ;;  %v8888_v30 = vcombine.low %v8781_v59, %v8785_v61  ;;  %v8892_v15 = vcombine.low %v8790_v0, %v8794_v1 }
  0xda   : > { %6919 = vmatpush3.bf16.msra.mxu0 %v7927_v23  ;;  %v8821_v23 = vld [vmem:[%s8692_s7 + $0x70] sm:$0xf] }
  0xdb   : > { %6940 = vmatprep.subr.bf16.mxu0 %v7930_v32  ;;  %v8898_v2 = vcombine.low %v8799_v6, %v8821_v23 }
  0xdd   : > { %6921 = vmatmul.mubr.bf16.vlgmr.msra.gmra.mrb[0].mxu0 %v8758_v46 }
  0xde   : > { %6941 = vmatpush3.bf16.msra.mxu0 %v7930_v32  ;;  %6924 = vmatprep.mubr.bf16.mxu0 %v8766_v50  ;;  %v7938_v32 = vld [vmem:[#allocation6 + $0xa0] sm:$0xff]  }
  0xdf   : > { %6942 = vmatprep.subr.bf16.mxu0 %v7931_v47 }
  0xe2   : > { %6943 = vmatpush3.bf16.msra.mxu0 %v7931_v47  ;;  %v6259_v47 = vrot.slane %v8703_v9, 9  ;;  %v6260_v9 = vrot.slane %v8732_v31, 9  ;;  %v478_v31 = vshll.u32 %v8744_v39, 16 }
  0xe3   : > { %6944 = vmatprep.subr.bf16.mxu0 %v7934_v60 }
  0xe4   : > { %v1088_v26 = vsel %vm8830_vm2, %v6260_v9, %v1087_v13 }
  0xe5   : > { %6925 = vmatmul.mubr.bf16.gmra.mrb[4].mxu0 %v8803_v7  ;;  %v8928_v25 = vcombine.low %v1088_v26, %v1091_v40  ;;  %v8945_v40 = vsel %vm8932_vm5, %v8760_v48, %v8719_v21  ;;  %v418_v26 = vrot.slane %v416_v28, 5  ;;  %v10317_v21 = vshrl.u32 %v8736_v35, 16 }
  0xe6   : > { %6945 = vmatpush3.bf16.msra.mxu0 %v7934_v60  ;;  %6928 = vmatprep.mubr.bf16.mxu0 %v8817_v20  ;;  %v1074_v60 = vsel %vm8830_vm2, %v6258_v29, %v1073_v17  ;;  %v8877_v17 = vcombine.low %v8771_v53, %v8775_v55  ;;  %v1081_v29 = vsel %vm8830_vm2, %v6259_v47, %v1080_v19  ;;  %v7941_v19 = vld [vmem:[#allocation6 + $0xa8] sm:$0xff]   ;;  %v402_v47 = vrot.slane %v400_v27, 5  ;;  %v7942_v27 = vld [vmem:[#allocation6 + $0xb0] sm:$0xff]  }
  0xe7   : > { %6946 = vmatprep.subr.bf16.mxu0 %v7936_v12  ;;  %v8906_v42 = vcombine.low %v1081_v29, %v1084_v33  ;;  %v447_v33 = vrot.slane %v445_v36, 4  ;;  %v8954_v36 = vcombine.low %v8945_v40, %v8950_v41  ;;  %v460_v48 = vrot.slane %v10317_v21, 4  ;;  %v7949_v41 = vld [vmem:[#allocation6 + $0xd8] sm:$0xff]  }
  0xe8   : > { %v403_v18 = vor.u32 %v402_v47, %v399_v51  ;;  %v413_v51 = vor.u32 %v412_v22, %v408_v52  ;;  %v488_v21 = vshll.u32 %v8841_v63, 16 }
  0xea   : > { %6947 = vmatpush3.bf16.msra.mxu0 %v7936_v12  ;;  %v8902_v12 = vcombine.low %v1074_v60, %v1077_v4  ;;  %v1095_v60 = vsel %vm8830_vm2, %v6261_v62, %v1094_v57  ;;  %v404_v24 = vrot.slane %v403_v18, 4  ;;  %v414_v18 = vrot.slane %v413_v51, 4 }
  0xeb   : > { %6948 = vmatprep.subr.bf16.mxu0 %v7938_v32  ;;  %v8930_v29 = vcombine.low %v1095_v60, %v1098_v58  ;;  %v454_v60 = vshll.u32 %v8736_v35, 16  ;;  %v464_v58 = vshll.u32 %v8836_v14, 16  ;;  %v10320_v14 = vshrl.u32 %v8744_v39, 16 }
  0xec   : > { %v409_v47 = vsel %vm8932_vm5, %v404_v24, %v408_v52  ;;  %v10319_v52 = vshll.u32 %v8741_v38, 16  ;;  %v419_v35 = vsel %vm8932_vm5, %v414_v18, %v418_v26  ;;  %v10321_v57 = vshrl.u32 %v8751_v44, 16 }
  0xed   : > { %6929 = vmatmul.mubr.bf16.gmra.mrb[8].mxu0 %v8873_v54  ;;  %v456_v24 = vrot.slane %v454_v60, 5  ;;  %v484_v51 = vrot.slane %v10320_v14, 4  ;;  %v10322_v18 = vshll.u32 %v8751_v44, 16 }
  0xee   : > { %6949 = vmatpush3.bf16.msra.mxu0 %v7938_v32  ;;  %6932 = vmatprep.mubr.bf16.mxu0 %v8877_v17  ;;  %v474_v28 = vrot.slane %v10319_v52, 5  ;;  %v480_v52 = vrot.slane %v478_v31, 5  ;;  %v495_v26 = vrot.slane %v10321_v57, 4  ;;  %v512_v31 = vshll.u32 %v8884_v34, 16  ;;  %v8992_v57 = vld [vmem:[%s8692_s7 + $0x50] sm:$0x1] }
  0xef   : > { %6950 = vmatprep.subr.bf16.mxu0 %v7941_v19  ;;  %v461_v60 = vor.u32 %v460_v48, %v456_v24  ;;  %v498_v39 = vrot.slane %v10322_v18, 5  ;;  %v10327_v18 = vshll.u32 %v8771_v53, 16 }
  0xf0   : > { %v475_v43 = vor.u32 %v474_v28, %v471_v49  ;;  %v485_v48 = vor.u32 %v484_v51, %v480_v52  ;;  %v10323_v49 = vshrl.u32 %v8754_v45, 16  ;;  %v10326_v51 = vshrl.u32 %v8771_v53, 16 }
  0xf2   : > { %6951 = vmatpush3.bf16.msra.mxu0 %v7941_v19  ;;  %v450_v19 = vrot.slane %v448_v37, 5  ;;  %v466_v37 = vrot.slane %v464_v58, 5  ;;  %v462_v58 = vrot.slane %v461_v60, 4  ;;  %v476_v14 = vrot.slane %v475_v43, 4 }
  0xf3   : > { %6952 = vmatprep.subr.bf16.mxu0 %v7942_v27  ;;  %v508_v28 = vrot.slane %v10323_v49, 4  ;;  %v486_v60 = vrot.slane %v485_v48, 4  ;;  %v10331_v49 = vshrl.u32 %v8781_v59, 16 }
  0xf4   : > { %v451_v22 = vor.u32 %v450_v19, %v447_v33  ;;  %v8974_v33 = vld [vmem:[#allocation6 + $0xc0] sm:$0xff]   ;;  %v8976_v19 = vcombine.low %v409_v47, %v419_v35  ;;  %v502_v47 = vshll.u32 %v8754_v45, 16  ;;  %v9000_v35 = vsel %vm8932_vm5, %v476_v14, %v480_v52 }
  0xf5   : > { %6933 = vmatmul.mubr.bf16.gmra.mrb[12].mxu0 %v8888_v30  ;;  %10325 = vst [vmem:[#allocation24_spill] sm:$0xff] %v9000_v35  ;;  %v526_v52 = vshll.u32 %v8775_v55, 16 }
  0xf6   : > { %6936 = vmatprep.mubr.bf16.mxu0 %v8892_v15  ;;  %6953 = vmatpush3.bf16.msra.mxu0 %v7942_v27  ;;  %v452_v38 = vrot.slane %v451_v22, 4  ;;  %v490_v27 = vrot.slane %v488_v21, 5  ;;  %v499_v22 = vor.u32 %v498_v39, %v495_v26  ;;  %v519_v21 = vrot.slane %v10326_v51, 4  ;;  %v9033_v51 = vld [vmem:[%s8692_s7 + $0x5c] sm:$0x1] }
  0xf7   : > { %6954 = vmatprep.subr.bf16.mxu0 %v7945_v11  ;;  %v514_v26 = vrot.slane %v512_v31, 5  ;;  %v522_v39 = vrot.slane %v10327_v18, 5  ;;  %v10333_v18 = vshrl.u32 %v8785_v61, 16 }
  0xf8   : > { %v8984_v63 = vsel %vm8932_vm5, %v452_v38, %v456_v24  ;;  %v8996_v24 = vsel %vm8932_vm5, %v462_v58, %v466_v37  ;;  %v500_v43 = vrot.slane %v499_v22, 4  ;;  %v10328_v58 = vshrl.u32 %v8775_v55, 16 }
  0xf9   : > { %10324 = vst [vmem:[#allocation23_spill] sm:$0xff] %v8996_v24  ;;  %v9006_v38 = vcombine.low %v8984_v63, %v8996_v24  ;;  %v536_v22 = vshll.u32 %v8992_v57, 16  ;;  %v523_v5 = vor.u32 %v522_v39, %v519_v21  ;;  %v560_v21 = vshll.u32 %v9033_v51, 16 }
  0xfa   : > { %6955 = vmatpush3.bf16.msra.mxu0 %v7945_v11  ;;  %v504_v11 = vrot.slane %v502_v47, 5  ;;  %v532_v14 = vrot.slane %v10328_v58, 4  ;;  %v9019_v47 = vsel %vm8932_vm5, %v486_v60, %v490_v27  ;;  %v10332_v60 = vshll.u32 %v8781_v59, 16 }
  0xfb   : > { %6976 = vmatprep.subr.bf16.mxu0 %v8974_v33  ;;  %10329 = vst [vmem:[#allocation25_spill] sm:$0xff] %v9019_v47  ;;  %v9030_v31 = vcombine.low %v9000_v35, %v9019_v47  ;;  %v538_v27 = vrot.slane %v536_v22, 5  ;;  %v556_v58 = vrot.slane %v10333_v18, 4  ;;  %v524_v9 = vrot.slane %v523_v5, 4  ;;  %v7947_v18 = vld [vmem:[#allocation6 + $0xc8] sm:$0xff]  }
  0xfc   : > { %v509_v37 = vor.u32 %v508_v28, %v504_v11  ;;  %v9023_v48 = vsel %vm8932_vm5, %v500_v43, %v504_v11  ;;  %v543_v28 = vrot.slane %v10331_v49, 4  ;;  %v546_v11 = vrot.slane %v10332_v60, 5 }
  0xfd   : > { %6937 = vmatmul.mubr.bf16.gmra.mrb[16].mxu0 %v8898_v2  ;;  %10330 = vst [vmem:[#allocation26_spill] sm:$0xff] %v9023_v48  ;;  %v550_v43 = vshll.u32 %v8785_v61, 16  ;;  %v10335_v60 = vshrl.u32 %v8790_v0, 16  ;;  %v10337_v5 = vshll.u32 %v8790_v0, 16 }
  0xfe   : > { %6956 = vmatprep.mubr.bf16.mxu0 %v6267_v3  ;;  %v510_v56 = vrot.slane %v509_v37, 4  ;;  %v528_v3 = vrot.slane %v526_v52, 5  ;;  %v9046_v37 = vld [vmem:[%s8692_s7 + $0x68] sm:$0x1]  ;;  %v547_v52 = vor.u32 %v546_v11, %v543_v28  ;;  %v10338_v28 = vshrl.u32 %v8794_v1, 16 }
  0xff   : > { %v552_v22 = vrot.slane %v550_v43, 5  ;;  %v567_v32 = vrot.slane %v10335_v60, 4  ;;  %v570_v62 = vrot.slane %v10337_v5, 5  ;;  %v7948_v43 = vld [vmem:[#allocation6 + $0xd0] sm:$0xff]  }
 0x100   : > { %v9042_v49 = vsel %vm8932_vm5, %v510_v56, %v514_v26  ;;  %v533_v4 = vor.u32 %v532_v14, %v528_v3  ;;  %v9056_v26 = vsel %vm8932_vm5, %v524_v9, %v528_v3  ;;  %v562_v56 = vrot.slane %v560_v21, 5 }
 0x101   : > { %10334 = vst [vmem:[#allocation27_spill] sm:$0xff] %v9042_v49  ;;  %v9050_v39 = vcombine.low %v9023_v48, %v9042_v49  ;;  %10336 = vst [vmem:[#allocation28_spill] sm:$0xff] %v9056_v26  ;;  %v548_v13 = vrot.slane %v547_v52, 4  ;;  %v557_v47 = vor.u32 %v556_v58, %v552_v22  ;;  %v574_v49 = vshll.u32 %v8794_v1, 16  ;;  %v9074_v58 = vld [vmem:[%s8692_s7 + $0x74] sm:$0x1] }
 0x102   : > { %v534_v14 = vrot.slane %v533_v4, 4  ;;  %v580_v11 = vrot.slane %v10338_v28, 4  ;;  %v571_v3 = vor.u32 %v570_v62, %v567_v32  ;;  %v584_v4 = vshll.u32 %v9046_v37, 16 }
 0x103   : > { %v10340_v21 = vshrl.u32 %v8799_v6, 16  ;;  %v558_v62 = vrot.slane %v557_v47, 4  ;;  %v576_v32 = vrot.slane %v574_v49, 5  ;;  %v10342_v28 = vshll.u32 %v8799_v6, 16 }
 0x104   : > { %v9066_v9 = vsel %vm8932_vm5, %v534_v14, %v538_v27  ;;  %v9082_v27 = vsel %vm8932_vm5, %v548_v13, %v552_v22  ;;  %v572_v14 = vrot.slane %v571_v3, 4  ;;  %v586_v5 = vrot.slane %v584_v4, 5 }
 0x105   : > { %6957 = vmatmul.mubr.bf16.vlgmr.msra.gmra.mrb[0].mxu0 %v8902_v12  ;;  %10339 = vst [vmem:[#allocation29_spill] sm:$0xff] %v9066_v9  ;;  %v591_v60 = vrot.slane %v10340_v21, 4  ;;  %v9078_v52 = vcombine.low %v9056_v26, %v9066_v9  ;;  %10341 = vst [vmem:[#allocation30_spill] sm:$0xff] %v9082_v27  ;;  %v598_v21 = vshll.u32 %v8821_v23, 16  ;;  %v9089_v35 = vsel %vm8932_vm5, %v558_v62, %v562_v56 }
 0x106   : > { %6977 = vmatpush3.bf16.msra.mxu0 %v8974_v33  ;;  %6960 = vmatprep.mubr.bf16.mxu0 %v8906_v42  ;;  %v594_v33 = vrot.slane %v10342_v28, 5  ;;  %10343 = vst [vmem:[#allocation31_spill] sm:$0xff] %v9089_v35  ;;  %v581_v9 = vor.u32 %v580_v11, %v576_v32  ;;  %v10344_v26 = vshrl.u32 %v8821_v23, 16  ;;  %v608_v13 = vshll.u32 %v9074_v58, 16 }
 0x107   : > { %6978 = vmatprep.subr.bf16.mxu0 %v7947_v18  ;;  %v9096_v47 = vcombine.low %v9082_v27, %v9089_v35  ;;  %v9100_v49 = vsel %vm8932_vm5, %v572_v14, %v576_v32  ;;  %v600_v3 = vrot.slane %v598_v21, 5  ;;  %v10345_v56 = vrot.slane %v8754_v45, 5 }
 0x108   : > { %v604_v48 = vrot.slane %v10344_v26, 4  ;;  %v595_v22 = vor.u32 %v594_v33, %v591_v60  ;;  %v10346_v11 = vrot.slane %v8775_v55, 5  ;;  %v1111_v26 = vrot.slane %v8992_v57, 5  ;;  %v7950_v57 = vld [vmem:[#allocation6 + $0xe0] sm:$0xff]   ;;  %v7951_v55 = vld [vmem:[#allocation6 + $0xe8] sm:$0xff]  }
 0x109   : > { %v1103_v4 = vrot.slane %v10345_v56, 4  ;;  %v582_v28 = vrot.slane %v581_v9, 4  ;;  %v1118_v35 = vrot.slane %v9033_v51, 5  ;;  %v610_v32 = vrot.slane %v608_v13, 5 }
 0x10a   : > { %6979 = vmatpush3.bf16.msra.mxu0 %v7947_v18  ;;  %v1110_v62 = vrot.slane %v10346_v11, 4  ;;  %v596_v27 = vrot.slane %v595_v22, 4  ;;  %v605_v24 = vor.u32 %v604_v48, %v600_v3  ;;  %v10347_v60 = vrot.slane %v8785_v61, 5 }
 0x10b   : > { %6980 = vmatprep.subr.bf16.mxu0 %v7948_v43  ;;  %v6265_v18 = vrot.slane %v8790_v0, 9  ;;  %v9113_v33 = vsel %vm8932_vm5, %v582_v28, %v586_v5  ;;  %v1122_v9 = vrot.slane %v8794_v1, 5  ;;  %v10348_v0 = vmov %v10345_v56 }
 0x10c   : > { %v1117_v14 = vrot.slane %v10347_v60, 4  ;;  %v9119_v51 = vcombine.low %v9100_v49, %v9113_v33  ;;  %v9123_v48 = vsel %vm8932_vm5, %v596_v27, %v600_v3  ;;  %v606_v21 = vrot.slane %v605_v24, 4 }
 0x10d   : > { %6961 = vmatmul.mubr.bf16.gmra.mrb[4].mxu0 %v8928_v25  ;;  %v10349_v5 = vrot.slane %v8751_v44, 9  ;;  %v10350_v1 = vrot.slane %v8884_v34, 5  ;;  %v1125_v27 = vrot.slane %v9046_v37, 5  ;;  %v6266_v24 = vrot.slane %v8799_v6, 9 }
 0x10e   : > { %6981 = vmatpush3.bf16.msra.mxu0 %v7948_v43  ;;  %6964 = vmatprep.mubr.bf16.mxu0 %v8930_v29  ;;  %v10351_v43 = vmov %v10346_v11  ;;  %v10352_v45 = vrot.slane %v8771_v53, 9  ;;  %v1112_v34 = vsel %vm8830_vm2, %v1110_v62, %v1111_v26  ;;  %v9148_v3 = vsel %vm8932_vm5, %v606_v21, %v610_v32  ;;  %v9160_v11 = vld [vmem:[%s8692_s7 + $0x78] sm:$0xf] }
 0x10f   : > { %v1102_v13 = vsel %vm8830_vm2, %v10349_v5, %v10348_v0  ;;  %v1105_v22 = vsel %vm8830_vm2, %v1103_v4, %v10350_v1  ;;  %6982 = vmatprep.subr.bf16.mxu0 %v7949_v41  ;;  %v9152_v6 = vcombine.low %v9123_v48, %v9148_v3  ;;  %v1124_v53 = vrot.slane %v1122_v9, 4 }
 0x110   : > { %v1109_v44 = vsel %vm8830_vm2, %v10352_v45, %v10351_v43  ;;  %v9154_v37 = vcombine.low %v1102_v13, %v1105_v22  ;;  %v1129_v56 = vrot.slane %v8821_v23, 5  ;;  %v10353_v62 = vmov %v10347_v60  ;;  %v7952_v60 = vld [vmem:[#allocation6 + $0xf0] sm:$0xff]   ;;  %v9172_v23 = vld [vmem:[%s8692_s7 + $0x7c] sm:$0xf] }
 0x111   : > { %v9157_v4 = vcombine.low %v1109_v44, %v1112_v34  ;;  %v10354_v26 = vrot.slane %v8781_v59, 9  ;;  %v1119_v32 = vsel %vm8830_vm2, %v1117_v14, %v1118_v35  ;;  %v1132_v21 = vrot.slane %v9074_v58, 5  ;;  %v7953_v58 = vld [vmem:[#allocation6 + $0xf8] sm:$0xff]   ;;  %v7955_v34 = vld [vmem:[#allocation6 + $0x108] sm:$0xff]  }
 0x112   : > { %6983 = vmatpush3.bf16.msra.mxu0 %v7949_v41  ;;  %v9175_v41 = vld [vmem:[%s8692_s7 + $0x80] sm:$0x1]  ;;  %v6303_v61 = vrot.slane %v9160_v11, 9  ;;  %v1805_v59 = vrot.slane %v9172_v23, 5  ;;  %v1123_v35 = vsel %vm8830_vm2, %v6265_v18, %v1122_v9  ;;  %v1126_v14 = vsel %vm8830_vm2, %v1124_v53, %v1125_v27  ;;  %v7954_v27 = vld [vmem:[#allocation6 + $0x100] sm:$0xff]  }
 0x113   : > { %6984 = vmatprep.subr.bf16.mxu0 %v7950_v57  ;;  %v1116_v28 = vsel %vm8830_vm2, %v10354_v26, %v10353_v62  ;;  %v1808_v0 = vrot.slane %v9175_v41, 5  ;;  %v1131_v5 = vrot.slane %v1129_v56, 4  ;;  %v9190_v22 = vcombine.low %v1123_v35, %v1126_v14  ;;  %v7958_v53 = vld [vmem:[#allocation6 + $0x120] sm:$0xff]   ;;  %v7962_v62 = vld [vmem:[#allocation6 + $0x138] sm:$0xff]  }
 0x114   : > { %v1807_v13 = vrot.slane %v1805_v59, 4  ;;  %v9188_v1 = vcombine.low %v1116_v28, %v1119_v32  ;;  %v1130_v18 = vsel %vm8830_vm2, %v6266_v24, %v1129_v56  ;;  %v7956_v24 = vld [vmem:[#allocation6 + $0x110] sm:$0xff]   ;;  %v7963_v26 = vld [vmem:[#allocation6 + $0x140] sm:$0xff]   ;;  %v9216_v28 = vcombine.low %v9160_v11, %v9172_v23  ;;  %v7995_v35 = vld [vmem:[#allocation6 + $0x58] sm:$0xff]  }
 0x115   : > { %6965 = vmatmul.mubr.bf16.gmra.mrb[8].mxu0 %v9154_v37  ;;  %v1133_v9 = vsel %vm8830_vm2, %v1131_v5, %v1132_v21  ;;  %v7960_v56 = vld [vmem:[#allocation6 + $0x130] sm:$0xff]   ;;  %v7990_v32 = vld [vmem:[#allocation6 + $0x40] sm:$0xff]   ;;  %v7991_v21 = vld [vmem:[#allocation6 + $0x48] sm:$0xff]   ;;  %v1577_v14 = vshrl.u32 %v9160_v11, 16  ;;  %v1580_v5 = vshll.u32 %v9160_v11, 16 }
 0x116   : > { %6985 = vmatpush3.bf16.msra.mxu0 %v7950_v57  ;;  %6968 = vmatprep.mubr.bf16.mxu0 %v9157_v4  ;;  %v1806_v57 = vsel %vm8830_vm2, %v6303_v61, %v1805_v59  ;;  %v1809_v43 = vsel %vm8830_vm2, %v1807_v13, %v1808_v0  ;;  %v9202_v44 = vcombine.low %v1130_v18, %v1133_v9  ;;  %v7993_v61 = vld [vmem:[#allocation6 + $0x50] sm:$0xff]   ;;  %v7966_v0 = vld [vmem:[#allocation6 + $0x158] sm:$0xff]   ;;  %v1586_v13 = vshll.u32 %v9172_v23, 16 }
 0x117   : > { %6986 = vmatprep.subr.bf16.mxu0 %v7951_v55  ;;  %v9194_v45 = vcombine.low %v1806_v57, %v1809_v43  ;;  %6868 = vmatprep.subr.bf16.mxu1 %v7990_v32  ;;  %v7965_v59 = vld [vmem:[#allocation6 + $0x150] sm:$0xff]   ;;  %v1590_v57 = vshrl.u32 %v9172_v23, 16  ;;  %v7967_v43 = vld [vmem:[#allocation6 + $0x160] sm:$0xff]   ;;  %v1579_v18 = vrot.slane %v1577_v14, 4  ;;  %v1582_v9 = vrot.slane %v1580_v5, 5 }
 0x118   : > { %6869 = vmatpush3.bf16.msra.mxu1 %v7990_v32  ;;  %v1588_v11 = vrot.slane %v1586_v13, 5  ;;  %v8005_v23 = vld [vmem:[%s8692_s7 + $0x4] sm:$0xf] }
 0x119   : > { %6870 = vmatprep.subr.bf16.mxu1 %v7991_v21 }
 0x11a   : > { %6987 = vmatpush3.bf16.msra.mxu0 %v7951_v55  ;;  %v7957_v55 = vld [vmem:[#allocation6 + $0x118] sm:$0xff]  }
 0x11b   : > { %6988 = vmatprep.subr.bf16.mxu0 %v7952_v60 }
 0x11c   : > { %6871 = vmatpush3.bf16.msra.mxu1 %v7991_v21  ;;  %v382_v21 = vshll.u32 %v8005_v23, 16 }
 0x11d   : > { %6969 = vmatmul.mubr.bf16.gmra.mrb[12].mxu0 %v9188_v1  ;;  %6872 = vmatprep.subr.bf16.mxu1 %v7993_v61 }
 0x11e   : > { %6972 = vmatprep.mubr.bf16.mxu0 %v9190_v22  ;;  %6989 = vmatpush3.bf16.msra.mxu0 %v7952_v60  ;;  %v7964_v60 = vld [vmem:[#allocation6 + $0x148] sm:$0xff]   ;;  %v384_v14 = vrot.slane %v382_v21, 5  ;;  %v7978_v21 = vld [vmem:[#allocation6 + $0x1b8] sm:$0xff]  }
 0x11f   : > { %6990 = vmatprep.subr.bf16.mxu0 %v7953_v58 }
 0x120   : > { %6873 = vmatpush3.bf16.msra.mxu1 %v7993_v61  ;;  %v7969_v61 = vld [vmem:[#allocation6 + $0x170] sm:$0xff]  }
 0x121   : > { %6874 = vmatprep.subr.bf16.mxu1 %v7995_v35 }
 0x122   : > { %6991 = vmatpush3.bf16.msra.mxu0 %v7953_v58  ;;  %v7997_v58 = vld [vmem:[#allocation6 + $0x60] sm:$0xff]  }
 0x123   : > { %7012 = vmatprep.subr.bf16.mxu0 %v7954_v27 }
 0x124   : > { %6875 = vmatpush3.bf16.msra.mxu1 %v7995_v35 }
 0x125   : > { %6973 = vmatmul.mubr.bf16.gmra.mrb[16].mxu0 %v9202_v44  ;;  %6876 = vmatprep.subr.bf16.mxu1 %v7997_v58 }
 0x126   : > { %6992 = vmatprep.mubr.bf16.mxu0 %v8758_v46  ;;  %v7959_v46 = vld [vmem:[#allocation6 + $0x128] sm:$0xff]  }
 0x128   : > { %6877 = vmatpush3.bf16.msra.mxu1 %v7997_v58 }
 0x12d   : > { %6993 = vmatmul.mubr.bf16.vlgmr.msra.gmra.mrb[0].mxu0 %v8766_v50 }
 0x12e   : > { %7013 = vmatpush3.bf16.msra.mxu0 %v7954_v27  ;;  %6996 = vmatprep.mubr.bf16.mxu0 %v8803_v7  ;;  %v1592_v27 = vrot.slane %v1590_v57, 4 }
 0x12f   : > { %7014 = vmatprep.subr.bf16.mxu0 %v7955_v34 }
 0x130   : > { %v1593_v32 = vor.u32 %v1592_v27, %v1588_v11 }
 0x132   : > { %7015 = vmatpush3.bf16.msra.mxu0 %v7955_v34  ;;  %v7968_v34 = vld [vmem:[#allocation6 + $0x168] sm:$0xff]   ;;  %v1594_v57 = vrot.slane %v1593_v32, 4 }
 0x133   : > { %7016 = vmatprep.subr.bf16.mxu0 %v7956_v24  ;;  %v7976_v32 = vld [vmem:[#allocation6 + $0x1a8] sm:$0xff]  }
 0x135   : > { %6997 = vmatmul.mubr.bf16.gmra.mrb[4].mxu0 %v8817_v20 }
 0x136   : > { %7017 = vmatpush3.bf16.msra.mxu0 %v7956_v24  ;;  %7000 = vmatprep.mubr.bf16.mxu0 %v8873_v54  ;;  %v8004_v24 = vld [vmem:[%s8692_s7] sm:$0xf] }
 0x137   : > { %7018 = vmatprep.subr.bf16.mxu0 %v7957_v55 }
 0x13a   : > { %7019 = vmatpush3.bf16.msra.mxu0 %v7957_v55  ;;  %v373_v55 = vshrl.u32 %v8004_v24, 16 }
 0x13b   : > { %7020 = vmatprep.subr.bf16.mxu0 %v7958_v53 }
 0x13d   : > { %7001 = vmatmul.mubr.bf16.gmra.mrb[8].mxu0 %v8877_v17 }
 0x13e   : > { %7021 = vmatpush3.bf16.msra.mxu0 %v7958_v53  ;;  %7004 = vmatprep.mubr.bf16.mxu0 %v8888_v30  ;;  %v376_v53 = vshll.u32 %v8004_v24, 16 }
 0x13f   : > { %7022 = vmatprep.subr.bf16.mxu0 %v7959_v46 }
 0x142   : > { %7023 = vmatpush3.bf16.msra.mxu0 %v7959_v46  ;;  %v7999_v46 = vld [vmem:[#allocation6 + $0x68] sm:$0xff]  }
 0x143   : > { %7024 = vmatprep.subr.bf16.mxu0 %v7960_v56  ;;  %6878 = vmatprep.subr.bf16.mxu1 %v7999_v46 }
 0x144   : > { %6879 = vmatpush3.bf16.msra.mxu1 %v7999_v46  ;;  %v7971_v46 = vld [vmem:[#allocation6 + $0x180] sm:$0xff]  }
 0x145   : > { %7005 = vmatmul.mubr.bf16.gmra.mrb[12].mxu0 %v8892_v15 }
 0x146   : > { %7008 = vmatprep.mubr.bf16.mxu0 %v8898_v2  ;;  %7025 = vmatpush3.bf16.msra.mxu0 %v7960_v56  ;;  %v386_v56 = vshrl.u32 %v8005_v23, 16 }
 0x147   : > { %7026 = vmatprep.subr.bf16.mxu0 %v7962_v62 }
 0x148   : > { %v388_v5 = vrot.slane %v386_v56, 4 }
 0x14a   : > { %7027 = vmatpush3.bf16.msra.mxu0 %v7962_v62  ;;  %v1583_v62 = vor.u32 %v1582_v9, %v1579_v18  ;;  %v7970_v18 = vld [vmem:[#allocation6 + $0x178] sm:$0xff]  }
 0x14b   : > { %7048 = vmatprep.subr.bf16.mxu0 %v7963_v26  ;;  %v8002_v9 = vld [vmem:[#allocation6 + $0x78] sm:$0xff]  }
 0x14c   : > { %v1584_v35 = vrot.slane %v1583_v62, 4 }
 0x14d   : > { %7009 = vmatmul.mubr.bf16.gmra.mrb[16].mxu0 %v9216_v28 }
 0x14e   : > { %7028 = vmatprep.mubr.bf16.mxu0 %v8976_v19 }
 0x155   : > { %7029 = vmatmul.mubr.bf16.vlgmr.msra.gmra.mrb[0].mxu0 %v8954_v36 }
 0x156   : > { %7049 = vmatpush3.bf16.msra.mxu0 %v7963_v26  ;;  %7032 = vmatprep.mubr.bf16.mxu0 %v9006_v38  ;;  %v8000_v26 = vld [vmem:[#allocation6 + $0x70] sm:$0xff]  }
 0x157   : > { %7050 = vmatprep.subr.bf16.mxu0 %v7964_v60  ;;  %6880 = vmatprep.subr.bf16.mxu1 %v8000_v26 }
 0x158   : > { %6881 = vmatpush3.bf16.msra.mxu1 %v8000_v26  ;;  %v7973_v26 = vld [vmem:[#allocation6 + $0x190] sm:$0xff]  }
 0x159   : > { %6882 = vmatprep.subr.bf16.mxu1 %v8002_v9 }
 0x15a   : > { %7051 = vmatpush3.bf16.msra.mxu0 %v7964_v60  ;;  %v1596_v60 = vshll.u32 %v9175_v41, 16  ;;  %v389_v41 = vor.u32 %v388_v5, %v384_v14  ;;  %v7988_v5 = vld [vmem:[#allocation6 + $0x200] sm:$0xff]  }
 0x15b   : > { %7052 = vmatprep.subr.bf16.mxu0 %v7965_v59 }
 0x15c   : > { %v1598_v13 = vrot.slane %v1596_v60, 5  ;;  %6883 = vmatpush3.bf16.msra.mxu1 %v8002_v9  ;;  %v7977_v60 = vld [vmem:[#allocation6 + $0x1b0] sm:$0xff]  }
 0x15d   : > { %7033 = vmatmul.mubr.bf16.gmra.mrb[4].mxu0 %v9030_v31  ;;  %v352_v9 = vld [vmem:[%s8692_s7 + $0x8c] sm:$0x1] }
 0x15e   : > { %7053 = vmatpush3.bf16.msra.mxu0 %v7965_v59  ;;  %7036 = vmatprep.mubr.bf16.mxu0 %v9050_v39  ;;  %v375_v59 = vrot.slane %v373_v55, 4  ;;  %v390_v55 = vrot.slane %v389_v41, 4 }
 0x15f   : > { %7054 = vmatprep.subr.bf16.mxu0 %v7966_v0 }
 0x162   : > { %7055 = vmatpush3.bf16.msra.mxu0 %v7966_v0  ;;  %v378_v0 = vrot.slane %v376_v53, 5  ;;  %v1599_v53 = vsel %vm8932_vm5, %v1594_v57, %v1598_v13 }
 0x163   : > { %7056 = vmatprep.subr.bf16.mxu0 %v7967_v43 }
 0x164   : > { %v379_v58 = vor.u32 %v378_v0, %v375_v59  ;;  %v7980_v59 = vld [vmem:[#allocation6 + $0x1c8] sm:$0xff]   ;;  %v7981_v0 = vld [vmem:[#allocation6 + $0x1d0] sm:$0xff]  }
 0x165   : > { %7037 = vmatmul.mubr.bf16.gmra.mrb[8].mxu0 %v9078_v52 }
 0x166   : > { %7057 = vmatpush3.bf16.msra.mxu0 %v7967_v43  ;;  %7040 = vmatprep.mubr.bf16.mxu0 %v9096_v47  ;;  %v392_v43 = vshll.u32 %v8806_v8, 16  ;;  %v380_v27 = vrot.slane %v379_v58, 4 }
 0x167   : > { %7058 = vmatprep.subr.bf16.mxu0 %v7968_v34 }
 0x168   : > { %v394_v24 = vrot.slane %v392_v43, 5  ;;  %v385_v8 = vsel %vm8932_vm5, %v380_v27, %v384_v14  ;;  %v7983_v14 = vld [vmem:[#allocation6 + $0x1e0] sm:$0xff]  }
 0x16a   : > { %7059 = vmatpush3.bf16.msra.mxu0 %v7968_v34  ;;  %v1589_v34 = vsel %vm8932_vm5, %v1584_v35, %v1588_v11  ;;  %v395_v23 = vsel %vm8932_vm5, %v390_v55, %v394_v24  ;;  %v7972_v11 = vld [vmem:[#allocation6 + $0x188] sm:$0xff]   ;;  %v7982_v35 = vld [vmem:[#allocation6 + $0x1d8] sm:$0xff]   ;;  %v8001_v55 = vld [vmem:[#allocation6 + $0x230] sm:$0xff]  }
 0x16b   : > { %7060 = vmatprep.subr.bf16.mxu0 %v7969_v61  ;;  %v6221_v56 = vcombine.low %v385_v8, %v395_v23  ;;  %v9249_v62 = vcombine.low %v1589_v34, %v1599_v53 }
 0x16d   : > { %7041 = vmatmul.mubr.bf16.gmra.mrb[12].mxu0 %v9119_v51  ;;  %6884 = vmatprep.mubr.bf16.mxu1 %v6221_v56 }
 0x16e   : > { %7044 = vmatprep.mubr.bf16.mxu0 %v9152_v6  ;;  %7061 = vmatpush3.bf16.msra.mxu0 %v7969_v61  ;;  %v7979_v61 = vld [vmem:[#allocation6 + $0x1c0] sm:$0xff]  }
 0x16f   : > { %7062 = vmatprep.subr.bf16.mxu0 %v7970_v18  ;;  %6885 = vmatmul.mubr.bf16.vlgmr.msra.gmra.mrb[0].mxu1 %v8976_v19  ;;  %v7974_v19 = vld [vmem:[#allocation6 + $0x198] sm:$0xff]  }
 0x170   : > { %6888 = vmatprep.mubr.bf16.mxu1 %v8954_v36 }
 0x172   : > { %7063 = vmatpush3.bf16.msra.mxu0 %v7970_v18 }
 0x173   : > { %7084 = vmatprep.subr.bf16.mxu0 %v7971_v46 }
 0x175   : > { %7045 = vmatmul.mubr.bf16.gmra.mrb[16].mxu0 %v9249_v62 }
 0x176   : > { %7064 = vmatprep.mubr.bf16.mxu0 %v8902_v12  ;;  %v7975_v12 = vld [vmem:[#allocation6 + $0x1a0] sm:$0xff]  }
 0x177   : > { %6889 = vmatmul.mubr.bf16.gmra.mrb[4].mxu1 %v9006_v38 }
 0x178   : > { %6892 = vmatprep.mubr.bf16.mxu1 %v9030_v31 }
 0x17d   : > { %7065 = vmatmul.mubr.bf16.vlgmr.msra.gmra.mrb[0].mxu0 %v8906_v42 }
 0x17e   : > { %7085 = vmatpush3.bf16.msra.mxu0 %v7971_v46  ;;  %7068 = vmatprep.mubr.bf16.mxu0 %v8928_v25  ;;  %v8003_v46 = vld [vmem:[#allocation6 + $0x238] sm:$0xff]  }
 0x17f   : > { %7086 = vmatprep.subr.bf16.mxu0 %v7972_v11  ;;  %6893 = vmatmul.mubr.bf16.gmra.mrb[8].mxu1 %v9050_v39 }
 0x180   : > { %6896 = vmatprep.mubr.bf16.mxu1 %v9078_v52 }
 0x182   : > { %7087 = vmatpush3.bf16.msra.mxu0 %v7972_v11  ;;  %v2448_v11 = vrot.slane %v352_v9, 5 }
 0x183   : > { %7088 = vmatprep.subr.bf16.mxu0 %v7973_v26 }
 0x185   : > { %7069 = vmatmul.mubr.bf16.gmra.mrb[4].mxu0 %v8930_v29 }
 0x186   : > { %7089 = vmatpush3.bf16.msra.mxu0 %v7973_v26  ;;  %7072 = vmatprep.mubr.bf16.mxu0 %v9154_v37 }
 0x187   : > { %7090 = vmatprep.subr.bf16.mxu0 %v7974_v19  ;;  %6897 = vmatmul.mubr.bf16.gmra.mrb[12].mxu1 %v9096_v47 }
 0x188   : > { %6900 = vmatprep.mubr.bf16.mxu1 %v9119_v51 }
 0x18a   : > { %7091 = vmatpush3.bf16.msra.mxu0 %v7974_v19 }
 0x18b   : > { %7092 = vmatprep.subr.bf16.mxu0 %v7975_v12 }
 0x18d   : > { %7073 = vmatmul.mubr.bf16.gmra.mrb[8].mxu0 %v9157_v4 }
 0x18e   : > { %7093 = vmatpush3.bf16.msra.mxu0 %v7975_v12  ;;  %7076 = vmatprep.mubr.bf16.mxu0 %v9188_v1 }
 0x18f   : > { %7094 = vmatprep.subr.bf16.mxu0 %v7976_v32  ;;  %6901 = vmatmul.mubr.bf16.gmra.mrb[16].mxu1 %v9152_v6 }
 0x192   : > { %7095 = vmatpush3.bf16.msra.mxu0 %v7976_v32 }
 0x193   : > { %7096 = vmatprep.subr.bf16.mxu0 %v7977_v60 }
 0x195   : > { %7077 = vmatmul.mubr.bf16.gmra.mrb[12].mxu0 %v9190_v22 }
 0x196   : > { %7080 = vmatprep.mubr.bf16.mxu0 %v9202_v44  ;;  %7097 = vmatpush3.bf16.msra.mxu0 %v7977_v60 }
 0x197   : > { %7098 = vmatprep.subr.bf16.mxu0 %v7978_v21 }
 0x19a   : > { %7099 = vmatpush3.bf16.msra.mxu0 %v7978_v21 }
 0x19b   : > { %7120 = vmatprep.subr.bf16.mxu0 %v7979_v61 }
 0x19d   : > { %7081 = vmatmul.mubr.bf16.gmra.mrb[16].mxu0 %v9194_v45 }
 0x19e   : > { %7100 = vmatprep.mubr.bf16.mxu0 %v8766_v50  ;;  %v7984_v50 = vld [vmem:[#allocation6 + $0x1e8] sm:$0xff]  }
 0x1a5   : > { %7101 = vmatmul.mubr.bf16.vlgmr.msra.gmra.mrb[0].mxu0 %v8803_v7  ;;  %v7985_v7 = vld [vmem:[#allocation6 + $0x1f0] sm:$0xff]  }
 0x1a6   : > { %7121 = vmatpush3.bf16.msra.mxu0 %v7979_v61  ;;  %7104 = vmatprep.mubr.bf16.mxu0 %v8817_v20  ;;  %v9281_v20 = vld [vmem:[%s8692_s7 + $0x84] sm:$0xf] }
 0x1a7   : > { %7122 = vmatprep.subr.bf16.mxu0 %v7980_v59  ;;  %v2217_v57 = vshrl.u32 %v9281_v20, 16  ;;  %v2220_v13 = vshll.u32 %v9281_v20, 16  ;;  %v6331_v56 = vrot.slane %v9281_v20, 9 }
 0x1a9   : > { %v2219_v58 = vrot.slane %v2217_v57, 4  ;;  %v2222_v43 = vrot.slane %v2220_v13, 5 }
 0x1aa   : > { %7123 = vmatpush3.bf16.msra.mxu0 %v7980_v59 }
 0x1ab   : > { %7124 = vmatprep.subr.bf16.mxu0 %v7981_v0  ;;  %v2223_v27 = vor.u32 %v2222_v43, %v2219_v58 }
 0x1ad   : > { %7105 = vmatmul.mubr.bf16.gmra.mrb[4].mxu0 %v8873_v54  ;;  %v7987_v54 = vld [vmem:[#allocation6 + $0x1f8] sm:$0xff]   ;;  %v2224_v34 = vrot.slane %v2223_v27, 4 }
 0x1ae   : > { %7125 = vmatpush3.bf16.msra.mxu0 %v7981_v0  ;;  %7108 = vmatprep.mubr.bf16.mxu0 %v8877_v17  ;;  %v9284_v17 = vld [vmem:[%s8692_s7 + $0x88] sm:$0xf] }
 0x1af   : > { %7126 = vmatprep.subr.bf16.mxu0 %v7982_v35 }
 0x1b2   : > { %7127 = vmatpush3.bf16.msra.mxu0 %v7982_v35 }
 0x1b3   : > { %7128 = vmatprep.subr.bf16.mxu0 %v7983_v14 }
 0x1b5   : > { %7109 = vmatmul.mubr.bf16.gmra.mrb[8].mxu0 %v8888_v30  ;;  %v6313_v30 = vcombine.low %v9281_v20, %v9284_v17 }
 0x1b6   : > { %7129 = vmatpush3.bf16.msra.mxu0 %v7983_v14  ;;  %7112 = vmatprep.mubr.bf16.mxu0 %v8892_v15  ;;  %v7989_v15 = vld [vmem:[#allocation6 + $0x208] sm:$0xff]  }
 0x1b7   : > { %7130 = vmatprep.subr.bf16.mxu0 %v7984_v50 }
 0x1ba   : > { %7131 = vmatpush3.bf16.msra.mxu0 %v7984_v50 }
 0x1bb   : > { %7132 = vmatprep.subr.bf16.mxu0 %v7985_v7 }
 0x1bd   : > { %7113 = vmatmul.mubr.bf16.gmra.mrb[12].mxu0 %v8898_v2  ;;  %v7992_v2 = vld [vmem:[#allocation6 + $0x210] sm:$0xff]  }
 0x1be   : > { %7116 = vmatprep.mubr.bf16.mxu0 %v9216_v28  ;;  %7133 = vmatpush3.bf16.msra.mxu0 %v7985_v7  ;;  %v7994_v28 = vld [vmem:[#allocation6 + $0x218] sm:$0xff]  }
 0x1bf   : > { %7134 = vmatprep.subr.bf16.mxu0 %v7987_v54 }
 0x1c2   : > { %7135 = vmatpush3.bf16.msra.mxu0 %v7987_v54 }
 0x1c3   : > { %7156 = vmatprep.subr.bf16.mxu0 %v7988_v5 }
 0x1c5   : > { %7117 = vmatmul.mubr.bf16.gmra.mrb[16].mxu0 %v6313_v30 }
 0x1c6   : > { %7136 = vmatprep.mubr.bf16.mxu0 %v8954_v36  ;;  %v2230_v36 = vshrl.u32 %v9284_v17, 16 }
 0x1c8   : > { %v2232_v41 = vrot.slane %v2230_v36, 4 }
 0x1cd   : > { %7137 = vmatmul.mubr.bf16.vlgmr.msra.gmra.mrb[0].mxu0 %v9006_v38  ;;  %v2226_v38 = vshll.u32 %v9284_v17, 16 }
 0x1ce   : > { %7157 = vmatpush3.bf16.msra.mxu0 %v7988_v5  ;;  %7140 = vmatprep.mubr.bf16.mxu0 %v9030_v31  ;;  %v7996_v31 = vld [vmem:[#allocation6 + $0x220] sm:$0xff]  }
 0x1cf   : > { %7158 = vmatprep.subr.bf16.mxu0 %v7989_v15  ;;  %v2228_v18 = vrot.slane %v2226_v38, 5 }
 0x1d1   : > { %v2233_v24 = vor.u32 %v2232_v41, %v2228_v18 }
 0x1d2   : > { %7159 = vmatpush3.bf16.msra.mxu0 %v7989_v15 }
 0x1d3   : > { %7160 = vmatprep.subr.bf16.mxu0 %v7992_v2  ;;  %v2234_v53 = vrot.slane %v2233_v24, 4 }
 0x1d5   : > { %7141 = vmatmul.mubr.bf16.gmra.mrb[4].mxu0 %v9050_v39  ;;  %v7998_v39 = vld [vmem:[#allocation6 + $0x228] sm:$0xff]  }
 0x1d6   : > { %7161 = vmatpush3.bf16.msra.mxu0 %v7992_v2  ;;  %7144 = vmatprep.mubr.bf16.mxu0 %v9078_v52  ;;  %v2236_v52 = vshll.u32 %v352_v9, 16 }
 0x1d7   : > { %7162 = vmatprep.subr.bf16.mxu0 %v7994_v28 }
 0x1d8   : > { %v2238_v8 = vrot.slane %v2236_v52, 5 }
 0x1da   : > { %7163 = vmatpush3.bf16.msra.mxu0 %v7994_v28 }
 0x1db   : > { %7164 = vmatprep.subr.bf16.mxu0 %v7996_v31 }
 0x1dd   : > { %7145 = vmatmul.mubr.bf16.gmra.mrb[8].mxu0 %v9096_v47  ;;  %v2229_v47 = vsel %vm8932_vm5, %v2224_v34, %v2228_v18 }
 0x1de   : > { %7165 = vmatpush3.bf16.msra.mxu0 %v7996_v31  ;;  %7148 = vmatprep.mubr.bf16.mxu0 %v9119_v51  ;;  %v2239_v51 = vsel %vm8932_vm5, %v2234_v53, %v2238_v8 }
 0x1df   : > { %7166 = vmatprep.subr.bf16.mxu0 %v7998_v39  ;;  %v6322_v23 = vcombine.low %v2229_v47, %v2239_v51 }
 0x1e2   : > { %7167 = vmatpush3.bf16.msra.mxu0 %v7998_v39 }
 0x1e3   : > { %7168 = vmatprep.subr.bf16.mxu0 %v8001_v55 }
 0x1e5   : > { %7149 = vmatmul.mubr.bf16.gmra.mrb[12].mxu0 %v9152_v6  ;;  %v2445_v6 = vrot.slane %v9284_v17, 5  ;;  %v9349_v17 = vld [vmem:[#allocation8] ss:$0 sm:$0xff] }
 0x1e6   : > { %7152 = vmatprep.mubr.bf16.mxu0 %v9249_v62  ;;  %7169 = vmatpush3.bf16.msra.mxu0 %v8001_v55 }
 0x1e7   : > { %7170 = vmatprep.subr.bf16.mxu0 %v8003_v46  ;;  %v2447_v62 = vrot.slane %v2445_v6, 4 }
 0x1ea   : > { %7171 = vmatpush3.bf16.msra.mxu0 %v8003_v46 }
 0x1ed   : > { %7153 = vmatmul.mubr.bf16.gmra.mrb[16].mxu0 %v6322_v23 }
 0x1ee   : > { %7172 = vmatprep.mubr.bf16.mxu0 %v8906_v42  ;;  %v2446_v42 = vsel %vm8830_vm2, %v6331_v56, %v2445_v6 }
 0x1f5   : > { %7173 = vmatmul.mubr.bf16.vlgmr.msra.gmra.mrb[0].mxu0 %v8928_v25  ;;  %v2449_v25 = vsel %vm8830_vm2, %v2447_v62, %v2448_v11 }
 0x1f6   : > { %7176 = vmatprep.mubr.bf16.mxu0 %v8930_v29  ;;  %v6332_v29 = vcombine.low %v2446_v42, %v2449_v25 }
 0x1fd   : > { %7177 = vmatmul.mubr.bf16.gmra.mrb[4].mxu0 %v9154_v37 }
 0x1fe   : > { %7180 = vmatprep.mubr.bf16.mxu0 %v9157_v4 }
 0x205   : > { %7181 = vmatmul.mubr.bf16.gmra.mrb[8].mxu0 %v9188_v1 }
 0x206   : > { %7184 = vmatprep.mubr.bf16.mxu0 %v9190_v22 }
 0x20d   : > { %7185 = vmatmul.mubr.bf16.gmra.mrb[12].mxu0 %v9202_v44 }
 0x20e   : > { %7188 = vmatprep.mubr.bf16.mxu0 %v9194_v45 }
 0x215   : > { %7189 = vmatmul.mubr.bf16.gmra.mrb[16].mxu0 %v6332_v29 }
 0x242   : > { %v6886_v37 = vpop.f32.mrb[0].mxu1 }
 0x243   : > { %v751_v4 = vpop.f32.mrb[1].mxu1 }
 0x244   : > { %v6887_v1 = vpop.f32.mrb[2].mxu1 }
 0x245   : > { %v754_v22 = vpop.f32.mrb[3].mxu1 }
 0x24a   : > { %v6890_v26 = vpop.f32.mrb[4].mxu1 }
 0x24b   : > { %v767_v19 = vpop.f32.mrb[5].mxu1 }
 0x24c   : > { %v9321_v12 = vpop.f32.mrb[6].mxu1 }
 0x24d   : > { %v9323_v32 = vpop.f32.mrb[7].mxu1 }
 0x252   : > { %v9325_v44 = vpop.f32.mrb[8].mxu1 }
 0x253   : > { %v9327_v45 = vpop.f32.mrb[9].mxu1 }
 0x254   : > { %v9329_v60 = vpop.f32.mrb[10].mxu1 }
 0x255   : > { %v9331_v21 = vpop.f32.mrb[11].mxu1 }
 0x25a   : > { %v9333_v61 = vpop.f32.mrb[12].mxu1 }
 0x25b   : > { %v9335_v59 = vpop.f32.mrb[13].mxu1 }
 0x25c   : > { %v9337_v0 = vpop.f32.mrb[14].mxu1 }
 0x25d   : > { %v9339_v35 = vpop.f32.mrb[15].mxu1 }
 0x262   : > { %v9341_v14 = vpop.f32.mrb[16].mxu1 }
 0x263   : > { %v9343_v50 = vpop.f32.mrb[17].mxu1 }
 0x264   : > { %v9345_v7 = vpop.f32.mrb[18].mxu1 }
 0x265   : > { %v9347_v54 = vpop.f32.mrb[19].mxu1 }
 0x2c8   : > { %v7174_v20 = vpop.f32.mrb[0].mxu0 }
 0x2c9   : > { %v7480_v5 = vadd.f32 %v7174_v20, %v6886_v37  ;;  %v2553_v30 = vpop.f32.mrb[1].mxu0  ;;  %v2974_v37 = vld [vmem:[#allocation2 + $0xc] sm:$0xf] }
 0x2ca   : > { %v7481_v15 = vadd.f32 %v2553_v30, %v751_v4  ;;  %v7175_v2 = vpop.f32.mrb[2].mxu0  ;;  %v2965_v30 = vld [vmem:[#allocation2] sm:$0xf] }
 0x2cb   : > { %v2661_v28 = vadd.f32 %v7480_v5, %v9349_v17  ;;  %v7482_v57 = vadd.f32 %v7175_v2, %v6887_v1  ;;  %v2556_v13 = vpop.f32.mrb[3].mxu0 }
 0x2cc   : > { %v2659_v36 = vadd.f32 %v7481_v15, %v9349_v17  ;;  %v7483_v38 = vadd.f32 %v2556_v13, %v754_v22 }
 0x2cd   : > { %v2681_v31 = vmax.f32 %v2661_v28, 0.0  ;;  %v2662_v58 = vadd.f32 %v7482_v57, %v9349_v17 }
 0x2ce   : > { %v2679_v43 = vmax.f32 %v2659_v36, 0.0  ;;  %v2660_v18 = vadd.f32 %v7483_v38, %v9349_v17  ;;  %v2978_v36 = vld [vmem:[#allocation2 + $0x14] sm:$0x1] }
 0x2cf   : > { %v6543_v41 = vpack.c.bf16 %v2681_v31, %v2681_v31  ;;  %v2682_v39 = vmax.f32 %v2662_v58, 0.0 }
 0x2d0   : > { %v6541_v9 = vpack.c.bf16 %v2679_v43, %v2679_v43  ;;  %v2680_v27 = vmax.f32 %v2660_v18, 0.0  ;;  %v7178_v24 = vpop.f32.mrb[4].mxu0 }
 0x2d1   : > { %v2780_v52 = vshrl.u32 %v6543_v41, 16  ;;  %v2783_v55 = vshll.u32 %v6543_v41, 16  ;;  %v6544_v34 = vpack.c.bf16 %v2682_v39, %v2682_v39  ;;  %v7484_v53 = vadd.f32 %v7178_v24, %v6890_v26  ;;  %v2569_v8 = vpop.f32.mrb[5].mxu0  ;;  %v2971_v41 = vld [vmem:[#allocation2 + $0x8] sm:$0x1] }
 0x2d2   : > { %v2763_v46 = vshrl.u32 %v6541_v9, 16  ;;  %v2766_v47 = vshll.u32 %v6541_v9, 16  ;;  %v6542_v51 = vpack.c.bf16 %v2680_v27, %v2680_v27  ;;  %v7485_v23 = vadd.f32 %v2569_v8, %v767_v19  ;;  %v7179_v6 = vpop.f32.mrb[6].mxu0 }
 0x2d3   : > { %v2782_v56 = vrot.slane %v2780_v52, 7  ;;  %v2788_v62 = vshrl.u32 %v6544_v34, 16  ;;  %v2791_v11 = vshll.u32 %v6544_v34, 16  ;;  %v2665_v42 = vadd.f32 %v7484_v53, %v9349_v17  ;;  %v2572_v25 = vpop.f32.mrb[7].mxu0 }
 0x2d4   : > { %v2765_v4 = vrot.slane %v2763_v46, 7  ;;  %v2771_v1 = vshrl.u32 %v6542_v51, 16  ;;  %v2774_v22 = vshll.u32 %v6542_v51, 16  ;;  %v2663_v26 = vadd.f32 %v7485_v23, %v9349_v17 }
 0x2d5   : > { %v2785_v19 = vor.u32 %v2783_v55, %v2782_v56  ;;  %v2786_v20 = vrot.slane %v2782_v56, 4  ;;  %v2790_v15 = vrot.slane %v2788_v62, 7  ;;  %v2685_v2 = vmax.f32 %v2665_v42, 0.0 }
 0x2d6   : > { %v2768_v28 = vor.u32 %v2766_v47, %v2765_v4  ;;  %v2769_v57 = vrot.slane %v2765_v4, 4  ;;  %v2773_v38 = vrot.slane %v2771_v1, 7  ;;  %v2683_v31 = vmax.f32 %v2663_v26, 0.0  ;;  %v2988_v26 = vld [vmem:[#allocation2 + $0x24] sm:$0xf] }
 0x2d7   : > { %v2975_v58 = vsel %vm9358_vm11, %v2785_v19, %v2974_v37  ;;  %v2793_v43 = vor.u32 %v2791_v11, %v2790_v15  ;;  %v2795_v18 = vrot.slane %v2790_v15, 4  ;;  %v6547_v39 = vpack.c.bf16 %v2685_v2, %v2685_v2 }
 0x2d8   : > { %2976 = vst [vmem:[#allocation2 + $0xc] sm:$0xf] %v2975_v58  ;;  %v2966_v9 = vsel %vm9358_vm11, %v2768_v28, %v2965_v30  ;;  %v2776_v27 = vor.u32 %v2774_v22, %v2773_v38  ;;  %v2778_v24 = vrot.slane %v2773_v38, 4  ;;  %v6545_v52 = vpack.c.bf16 %v2683_v31, %v2683_v31  ;;  %v7182_v55 = vpop.f32.mrb[8].mxu0 }
 0x2d9   : > { %2967 = vst [vmem:[#allocation2] sm:$0xf] %v2966_v9  ;;  %v2794_v34 = vsel %vm9371_vm13, %v2786_v20, %v2793_v43  ;;  %v2979_v53 = vsel %vm9365_vm12, %v2795_v18, %v2978_v36  ;;  %v2814_v8 = vshrl.u32 %v6547_v39, 16  ;;  %v2817_v46 = vshll.u32 %v6547_v39, 16  ;;  %v2585_v47 = vpop.f32.mrb[9].mxu0 }
 0x2da   : > { %2977 = vst [vmem:[#allocation2 + $0x10] sm:$0xf] %v2794_v34  ;;  %2980 = vst [vmem:[#allocation2 + $0x14] sm:$0x1] %v2979_v53  ;;  %v2777_v51 = vsel %vm9371_vm13, %v2769_v57, %v2776_v27  ;;  %v2972_v23 = vsel %vm9365_vm12, %v2778_v24, %v2971_v41  ;;  %v2797_v56 = vshrl.u32 %v6545_v52, 16  ;;  %v2800_v62 = vshll.u32 %v6545_v52, 16 }
 0x2db   : > { %v7183_v11 = vpop.f32.mrb[10].mxu0  ;;  %2968 = vst [vmem:[#allocation2 + $0x4] sm:$0xf] %v2777_v51  ;;  %2973 = vst [vmem:[#allocation2 + $0x8] sm:$0x1] %v2972_v23  ;;  %v9387_v42 = vrot.slane %v2814_v8, 7  ;;  %v7486_v37 = vadd.f32 %v7179_v6, %v9321_v12  ;;  %v7487_v4 = vadd.f32 %v2572_v25, %v9323_v32  ;;  %v7488_v1 = vadd.f32 %v7182_v55, %v9325_v44 }
 0x2dc   : > { %v2588_v22 = vpop.f32.mrb[11].mxu0  ;;  %v9392_v19 = vrot.slane %v2797_v56, 7  ;;  %v7489_v20 = vadd.f32 %v2585_v47, %v9327_v45  ;;  %v7490_v30 = vadd.f32 %v7183_v11, %v9329_v60  ;;  %v2981_v57 = vld [vmem:[#allocation2 + $0x18] sm:$0xf] }
 0x2dd   : > { %v7491_v15 = vadd.f32 %v2588_v22, %v9331_v21  ;;  %v2819_v2 = vor.u32 %v2817_v46, %v9387_v42  ;;  %v2820_v28 = vrot.slane %v9387_v42, 4  ;;  %v2666_v12 = vadd.f32 %v7486_v37, %v9349_v17 }
 0x2de   : > { %v2664_v32 = vadd.f32 %v7487_v4, %v9349_v17  ;;  %v2802_v44 = vor.u32 %v2800_v62, %v9392_v19  ;;  %v2803_v6 = vrot.slane %v9392_v19, 4  ;;  %v2669_v25 = vadd.f32 %v7488_v1, %v9349_v17 }
 0x2df   : > { %v2667_v45 = vadd.f32 %v7489_v20, %v9349_v17  ;;  %v3040_v60 = vld [vmem:[#allocation2 + $0xc] sm:$0x1]  ;;  %v2989_v36 = vsel %vm9358_vm11, %v2819_v2, %v2988_v26  ;;  %v2686_v38 = vmax.f32 %v2666_v12, 0.0  ;;  %v2670_v58 = vadd.f32 %v7490_v30, %v9349_v17 }
 0x2e0   : > { %v2684_v31 = vmax.f32 %v2664_v32, 0.0  ;;  %v3041_v43 = vsel %vm9365_vm12, 0, %v3040_v60  ;;  %v3037_v18 = vld [vmem:[#allocation2] sm:$0x1]  ;;  %2990 = vst [vmem:[#allocation2 + $0x24] sm:$0xf] %v2989_v36  ;;  %v2982_v41 = vsel %vm9358_vm11, %v2802_v44, %v2981_v57  ;;  %v2668_v56 = vadd.f32 %v7491_v15, %v9349_v17 }
 0x2e1   : > { %v2689_v39 = vmax.f32 %v2669_v25, 0.0  ;;  %v2687_v9 = vmax.f32 %v2667_v45, 0.0  ;;  %v7186_v27 = vpop.f32.mrb[12].mxu0  ;;  %3042 = vst [vmem:[#allocation2 + $0xc] sm:$0x1] %v3041_v43  ;;  %v3038_v24 = vsel %vm9365_vm12, 0, %v3037_v18  ;;  %v6548_v55 = vpack.c.bf16 %v2686_v38, %v2686_v38 }
 0x2e2   : > { %v3071_v52 = vld [vmem:[#allocation2 + $0x14] sm:$0x1]  ;;  %2983 = vst [vmem:[#allocation2 + $0x18] sm:$0xf] %v2982_v41  ;;  %v6546_v34 = vpack.c.bf16 %v2684_v31, %v2684_v31  ;;  %v2690_v53 = vmax.f32 %v2670_v58, 0.0  ;;  %v9420_v8 = vpop.f32.mrb[13].mxu0  ;;  %v7492_v31 = vadd.f32 %v7186_v27, %v9333_v61 }
 0x2e3   : > { %3039 = vst [vmem:[#allocation2] sm:$0x1] %v3038_v24  ;;  %v3072_v46 = vsel %vm9407_vm14, 0, %v3071_v52  ;;  %v3068_v47 = vld [vmem:[#allocation2 + $0x8] sm:$0x1]  ;;  %v6551_v51 = vpack.c.bf16 %v2689_v39, %v2689_v39  ;;  %v6549_v23 = vpack.c.bf16 %v2687_v9, %v2687_v9  ;;  %v7187_v62 = vpop.f32.mrb[14].mxu0 }
 0x2e4   : > { %3073 = vst [vmem:[#allocation2 + $0x14] sm:$0x1] %v3072_v46  ;;  %v3069_v11 = vsel %vm9407_vm14, 0, %v3068_v47  ;;  %v2822_v37 = vshrl.u32 %v6548_v55, 16  ;;  %v2825_v4 = vshll.u32 %v6548_v55, 16  ;;  %v2805_v1 = vshrl.u32 %v6546_v34, 16 }
 0x2e5   : > { %v2604_v22 = vpop.f32.mrb[15].mxu0  ;;  %3070 = vst [vmem:[#allocation2 + $0x8] sm:$0x1] %v3069_v11  ;;  %v2992_v26 = vld [vmem:[#allocation2 + $0x2c] sm:$0x1]  ;;  %v2808_v20 = vshll.u32 %v6546_v34, 16  ;;  %v6552_v15 = vpack.c.bf16 %v2690_v53, %v2690_v53 }
 0x2e6   : > { %v2848_v30 = vshrl.u32 %v6551_v51, 16  ;;  %v2851_v2 = vshll.u32 %v6551_v51, 16  ;;  %v2831_v57 = vshrl.u32 %v6549_v23, 16  ;;  %v2824_v12 = vrot.slane %v2822_v37, 7  ;;  %v2985_v44 = vld [vmem:[#allocation2 + $0x20] sm:$0x1] }
 0x2e7   : > { %v2807_v32 = vrot.slane %v2805_v1, 7  ;;  %v2834_v25 = vshll.u32 %v6549_v23, 16  ;;  %v3002_v60 = vld [vmem:[#allocation2 + $0x3c] sm:$0xf]  ;;  %v2688_v38 = vmax.f32 %v2668_v56, 0.0  ;;  %v2859_v37 = vshll.u32 %v6552_v15, 16 }
 0x2e8   : > { %v9427_v45 = vrot.slane %v2848_v30, 7  ;;  %v9429_v36 = vrot.slane %v2831_v57, 7  ;;  %v3046_v58 = vld [vmem:[#allocation2 + $0x24] sm:$0x1]  ;;  %v2827_v43 = vor.u32 %v2825_v4, %v2824_v12  ;;  %v2829_v18 = vrot.slane %v2824_v12, 4  ;;  %v7190_v46 = vpop.f32.mrb[16].mxu0 }
 0x2e9   : > { %v2810_v41 = vor.u32 %v2808_v20, %v2807_v32  ;;  %v2812_v39 = vrot.slane %v2807_v32, 4  ;;  %v2995_v9 = vld [vmem:[#allocation2 + $0x30] sm:$0xf]  ;;  %v3047_v24 = vsel %vm9365_vm12, 0, %v3046_v58  ;;  %v3043_v52 = vld [vmem:[#allocation2 + $0x18] sm:$0x1]  ;;  %v6550_v4 = vpack.c.bf16 %v2688_v38, %v2688_v38 }
 0x2ea   : > { %v2853_v55 = vor.u32 %v2851_v2, %v9427_v45  ;;  %v2854_v34 = vrot.slane %v9427_v45, 4  ;;  %v2836_v53 = vor.u32 %v2834_v25, %v9429_v36  ;;  %3048 = vst [vmem:[#allocation2 + $0x24] sm:$0x1] %v3047_v24  ;;  %v3044_v61 = vsel %vm9365_vm12, 0, %v3043_v52  ;;  %v9449_v23 = vpop.f32.mrb[17].mxu0 }
 0x2eb   : > { %v2828_v27 = vsel %vm9371_vm13, %v2820_v28, %v2827_v43  ;;  %v2993_v47 = vsel %vm9365_vm12, %v2829_v18, %v2992_v26  ;;  %v2811_v51 = vsel %vm9371_vm13, %v2803_v6, %v2810_v41  ;;  %3045 = vst [vmem:[#allocation2 + $0x18] sm:$0x1] %v3044_v61  ;;  %v2986_v42 = vsel %vm9365_vm12, %v2812_v39, %v2985_v44  ;;  %v9458_v11 = vpop.f32.mrb[18].mxu0  ;;  %v3006_v45 = vld [vmem:[#allocation2 + $0x44] sm:$0x1] }
 0x2ec   : > { %2991 = vst [vmem:[#allocation2 + $0x28] sm:$0xf] %v2828_v27  ;;  %2994 = vst [vmem:[#allocation2 + $0x2c] sm:$0x1] %v2993_v47  ;;  %v3003_v28 = vsel %vm9358_vm11, %v2853_v55, %v3002_v60  ;;  %v2837_v56 = vrot.slane %v9429_v36, 4  ;;  %v2996_v19 = vsel %vm9358_vm11, %v2836_v53, %v2995_v9  ;;  %v2856_v6 = vshrl.u32 %v6552_v15, 16 }
 0x2ed   : > { %2984 = vst [vmem:[#allocation2 + $0x1c] sm:$0xf] %v2811_v51  ;;  %2987 = vst [vmem:[#allocation2 + $0x20] sm:$0x1] %v2986_v42  ;;  %v2673_v1 = vadd.f32 %v7492_v31, %v9349_v17  ;;  %v9461_v26 = vpop.f32.mrb[19].mxu0  ;;  %v7493_v20 = vadd.f32 %v9420_v8, %v9335_v59  ;;  %v7494_v30 = vadd.f32 %v7187_v62, %v9337_v0  ;;  %v2839_v32 = vshrl.u32 %v6550_v4, 16 }
 0x2ee   : > { %3004 = vst [vmem:[#allocation2 + $0x3c] sm:$0xf] %v3003_v28  ;;  %2997 = vst [vmem:[#allocation2 + $0x30] sm:$0xf] %v2996_v19  ;;  %v7495_v2 = vadd.f32 %v2604_v22, %v9339_v35  ;;  %v7496_v57 = vadd.f32 %v7190_v46, %v9341_v14  ;;  %v2858_v12 = vrot.slane %v2856_v6, 7  ;;  %v2842_v44 = vshll.u32 %v6550_v4, 16 }
 0x2ef   : > { %v2693_v25 = vmax.f32 %v2673_v1, 0.0  ;;  %v2671_v15 = vadd.f32 %v7493_v20, %v9349_v17  ;;  %v2674_v60 = vadd.f32 %v7494_v30, %v9349_v17  ;;  %v2841_v0 = vrot.slane %v2839_v32, 7  ;;  %v2999_v35 = vld [vmem:[#allocation2 + $0x38] sm:$0x1]  ;;  %v3016_v4 = vld [vmem:[#allocation2 + $0x54] sm:$0xf] }
 0x2f0   : > { %v2672_v36 = vadd.f32 %v7495_v2, %v9349_v17  ;;  %v2677_v38 = vadd.f32 %v7496_v57, %v9349_v17  ;;  %v2861_v59 = vor.u32 %v2859_v37, %v2858_v12  ;;  %v2863_v8 = vrot.slane %v2858_v12, 4 }
 0x2f1   : > { %v6555_v62 = vpack.c.bf16 %v2693_v25, %v2693_v25  ;;  %v2691_v22 = vmax.f32 %v2671_v15, 0.0  ;;  %v2694_v14 = vmax.f32 %v2674_v60, 0.0  ;;  %v2844_v39 = vor.u32 %v2842_v44, %v2841_v0  ;;  %v3009_v44 = vld [vmem:[#allocation2 + $0x48] sm:$0xf] }
 0x2f2   : > { %v2692_v31 = vmax.f32 %v2672_v36, 0.0  ;;  %v2697_v58 = vmax.f32 %v2677_v38, 0.0  ;;  %v2862_v18 = vsel %vm9371_vm13, %v2854_v34, %v2861_v59  ;;  %v3007_v41 = vsel %vm9365_vm12, %v2863_v8, %v3006_v45  ;;  %v3020_v8 = vld [vmem:[#allocation2 + $0x5c] sm:$0x1] }
 0x2f3   : > { %v3077_v43 = vld [vmem:[#allocation2 + $0x2c] sm:$0x1]  ;;  %v2846_v9 = vrot.slane %v2841_v0, 4  ;;  %3005 = vst [vmem:[#allocation2 + $0x40] sm:$0xf] %v2862_v18  ;;  %v2882_v53 = vshrl.u32 %v6555_v62, 16  ;;  %v6553_v46 = vpack.c.bf16 %v2691_v22, %v2691_v22  ;;  %v6556_v61 = vpack.c.bf16 %v2694_v14, %v2694_v14 }
 0x2f4   : > { %v3078_v24 = vsel %vm9407_vm14, 0, %v3077_v43  ;;  %v3074_v52 = vld [vmem:[#allocation2 + $0x20] sm:$0x1]  ;;  %3008 = vst [vmem:[#allocation2 + $0x44] sm:$0x1] %v3007_v41  ;;  %v2845_v51 = vsel %vm9371_vm13, %v2837_v56, %v2844_v39  ;;  %v2885_v6 = vshll.u32 %v6555_v62, 16  ;;  %v6554_v2 = vpack.c.bf16 %v2692_v31, %v2692_v31 }
 0x2f5   : > { %v3052_v55 = vld [vmem:[#allocation2 + $0x3c] sm:$0x1]  ;;  %3079 = vst [vmem:[#allocation2 + $0x2c] sm:$0x1] %v3078_v24  ;;  %v3075_v27 = vsel %vm9407_vm14, 0, %v3074_v52  ;;  %v3000_v42 = vsel %vm9365_vm12, %v2846_v9, %v2999_v35  ;;  %v2884_v19 = vrot.slane %v2882_v53, 7  ;;  %v6559_v32 = vpack.c.bf16 %v2697_v58, %v2697_v58 }
 0x2f6   : > { %v3053_v34 = vsel %vm9365_vm12, 0, %v3052_v55  ;;  %v3049_v47 = vld [vmem:[#allocation2 + $0x30] sm:$0x1]  ;;  %3076 = vst [vmem:[#allocation2 + $0x20] sm:$0x1] %v3075_v27  ;;  %v2865_v37 = vshrl.u32 %v6553_v46, 16  ;;  %v7497_v60 = vadd.f32 %v9449_v23, %v9343_v50 }
 0x2f7   : > { %3054 = vst [vmem:[#allocation2 + $0x3c] sm:$0x1] %v3053_v34  ;;  %v3050_v28 = vsel %vm9365_vm12, 0, %v3049_v47  ;;  %2998 = vst [vmem:[#allocation2 + $0x34] sm:$0xf] %v2845_v51  ;;  %v2868_v1 = vshll.u32 %v6553_v46, 16  ;;  %v2887_v56 = vor.u32 %v2885_v6, %v2884_v19  ;;  %v7498_v47 = vadd.f32 %v9458_v11, %v9345_v7 }
 0x2f8   : > { %3001 = vst [vmem:[#allocation2 + $0x38] sm:$0x1] %v3000_v42  ;;  %3051 = vst [vmem:[#allocation2 + $0x30] sm:$0x1] %v3050_v28  ;;  %v2890_v20 = vshrl.u32 %v6556_v61, 16  ;;  %v2893_v30 = vshll.u32 %v6556_v61, 16  ;;  %v2675_v18 = vadd.f32 %v7497_v60, %v9349_v17  ;;  %v7499_v51 = vadd.f32 %v9461_v26, %v9347_v54 }
 0x2f9   : > { %v2888_v57 = vrot.slane %v2884_v19, 4  ;;  %v2867_v12 = vrot.slane %v2865_v37, 7  ;;  %v2873_v45 = vshrl.u32 %v6554_v2, 16  ;;  %v2876_v15 = vshll.u32 %v6554_v2, 16  ;;  %v3013_v50 = vld [vmem:[#allocation2 + $0x50] sm:$0x1] }
 0x2fa   : > { %v2892_v25 = vrot.slane %v2890_v20, 7  ;;  %v3017_v36 = vsel %vm9358_vm11, %v2887_v56, %v3016_v4  ;;  %v2916_v0 = vshrl.u32 %v6559_v32, 16  ;;  %v2919_v31 = vshll.u32 %v6559_v32, 16  ;;  %v3030_v55 = vld [vmem:[#allocation2 + $0x6c] sm:$0xf] }
 0x2fb   : > { %v2870_v38 = vor.u32 %v2868_v1, %v2867_v12  ;;  %v2871_v59 = vrot.slane %v2867_v12, 4  ;;  %v3083_v62 = vld [vmem:[#allocation2 + $0x44] sm:$0x1]  ;;  %3018 = vst [vmem:[#allocation2 + $0x54] sm:$0xf] %v3017_v36  ;;  %v2875_v14 = vrot.slane %v2873_v45, 7  ;;  %v2678_v19 = vadd.f32 %v7498_v47, %v9349_v17 }
 0x2fc   : > { %v2895_v35 = vor.u32 %v2893_v30, %v2892_v25  ;;  %v2897_v22 = vrot.slane %v2892_v25, 4  ;;  %v3084_v58 = vsel %vm9407_vm14, 0, %v3083_v62  ;;  %v9496_v23 = vrot.slane %v2916_v0, 7  ;;  %v3023_v56 = vld [vmem:[#allocation2 + $0x60] sm:$0xf] }
 0x2fd   : > { %v3010_v43 = vsel %vm9358_vm11, %v2870_v38, %v3009_v44  ;;  %3085 = vst [vmem:[#allocation2 + $0x44] sm:$0x1] %v3084_v58  ;;  %v2878_v24 = vor.u32 %v2876_v15, %v2875_v14  ;;  %v2880_v52 = vrot.slane %v2875_v14, 4  ;;  %v2695_v61 = vmax.f32 %v2675_v18, 0.0  ;;  %v3034_v14 = vld [vmem:[#allocation2 + $0x74] sm:$0x1] }
 0x2fe   : > { %3011 = vst [vmem:[#allocation2 + $0x48] sm:$0xf] %v3010_v43  ;;  %v2896_v39 = vsel %vm9371_vm13, %v2888_v57, %v2895_v35  ;;  %v3021_v9 = vsel %vm9365_vm12, %v2897_v22, %v3020_v8  ;;  %v2921_v46 = vor.u32 %v2919_v31, %v9496_v23  ;;  %v2676_v6 = vadd.f32 %v7499_v51, %v9349_v17  ;;  %v3027_v31 = vld [vmem:[#allocation2 + $0x68] sm:$0x1] }
 0x2ff   : > { %v3080_v41 = vld [vmem:[#allocation2 + $0x38] sm:$0x1]  ;;  %3019 = vst [vmem:[#allocation2 + $0x58] sm:$0xf] %v2896_v39  ;;  %3022 = vst [vmem:[#allocation2 + $0x5c] sm:$0x1] %v3021_v9  ;;  %v2879_v27 = vsel %vm9371_vm13, %v2871_v59, %v2878_v24  ;;  %v3014_v34 = vsel %vm9365_vm12, %v2880_v52, %v3013_v50  ;;  %v6557_v28 = vpack.c.bf16 %v2695_v61, %v2695_v61 }
 0x300   : > { %v3081_v53 = vsel %vm9407_vm14, 0, %v3080_v41  ;;  %3012 = vst [vmem:[#allocation2 + $0x4c] sm:$0xf] %v2879_v27  ;;  %3015 = vst [vmem:[#allocation2 + $0x50] sm:$0x1] %v3014_v34  ;;  %v3031_v42 = vsel %vm9358_vm11, %v2921_v46, %v3030_v55  ;;  %v2698_v7 = vmax.f32 %v2678_v19, 0.0 }
 0x301   : > { %3082 = vst [vmem:[#allocation2 + $0x38] sm:$0x1] %v3081_v53  ;;  %3032 = vst [vmem:[#allocation2 + $0x6c] sm:$0xf] %v3031_v42  ;;  %v2899_v4 = vshrl.u32 %v6557_v28, 16  ;;  %v2696_v11 = vmax.f32 %v2676_v6, 0.0 }
 0x302   : > { %v3058_v37 = vld [vmem:[#allocation2 + $0x54] sm:$0x1]  ;;  %v2902_v20 = vshll.u32 %v6557_v28, 16  ;;  %v6560_v57 = vpack.c.bf16 %v2698_v7, %v2698_v7  ;;  %v2922_v35 = vrot.slane %v9496_v23, 4  ;;  %v8383_v46 = vmov (!%p6362_p3), 0  }
 0x303   : > { %v3059_v1 = vsel %vm9365_vm12, 0, %v3058_v37  ;;  %v2901_v26 = vrot.slane %v2899_v4, 7  ;;  %v6558_v12 = vpack.c.bf16 %v2696_v11, %v2696_v11  ;;  %3102 = vst [vmem:[#allocation2] sm:$0xf] (!%p6362_p3), %v8383_v46  ;;  %3103 = vst [vmem:[#allocation2 + $0x4] sm:$0xf] (!%p6362_p3), %v8383_v46 }
 0x304   : > { %3060 = vst [vmem:[#allocation2 + $0x54] sm:$0x1] %v3059_v1  ;;  %v2924_v25 = vshrl.u32 %v6560_v57, 16  ;;  %v2927_v38 = vshll.u32 %v6560_v57, 16  ;;  %3104 = vst [vmem:[#allocation2 + $0x8] sm:$0x1] (!%p6362_p3), %v8383_v46 }
 0x305   : > { %v3055_v54 = vld [vmem:[#allocation2 + $0x48] sm:$0x1]  ;;  %v2904_v32 = vor.u32 %v2902_v20, %v2901_v26  ;;  %v2907_v45 = vshrl.u32 %v6558_v12, 16  ;;  %v2910_v62 = vshll.u32 %v6558_v12, 16  ;;  %v2905_v22 = vrot.slane %v2901_v26, 4 }
 0x306   : > { %v3056_v30 = vsel %vm9365_vm12, 0, %v3055_v54  ;;  %v3089_v2 = vld [vmem:[#allocation2 + $0x5c] sm:$0x1]  ;;  %v2926_v8 = vrot.slane %v2924_v25, 7 }
 0x307   : > { %3057 = vst [vmem:[#allocation2 + $0x48] sm:$0x1] %v3056_v30  ;;  %v3090_v17 = vsel %vm9407_vm14, 0, %v3089_v2  ;;  %v3086_v44 = vld [vmem:[#allocation2 + $0x50] sm:$0x1]  ;;  %v3024_v36 = vsel %vm9358_vm11, %v2904_v32, %v3023_v56  ;;  %v2909_v0 = vrot.slane %v2907_v45, 7 }
 0x308   : > { %3091 = vst [vmem:[#allocation2 + $0x5c] sm:$0x1] %v3090_v17  ;;  %v3087_v15 = vsel %vm9407_vm14, 0, %v3086_v44  ;;  %v3064_v60 = vld [vmem:[#allocation2 + $0x6c] sm:$0x1]  ;;  %v2929_v58 = vor.u32 %v2927_v38, %v2926_v8  ;;  %v2931_v43 = vrot.slane %v2926_v8, 4 }
 0x309   : > { %3088 = vst [vmem:[#allocation2 + $0x50] sm:$0x1] %v3087_v15  ;;  %v3065_v59 = vsel %vm9365_vm12, 0, %v3064_v60  ;;  %3025 = vst [vmem:[#allocation2 + $0x60] sm:$0xf] %v3024_v36  ;;  %v2912_v50 = vor.u32 %v2910_v62, %v2909_v0  ;;  %v2914_v29 = vrot.slane %v2909_v0, 4 }
 0x30a   : > { %3066 = vst [vmem:[#allocation2 + $0x6c] sm:$0x1] %v3065_v59  ;;  %v2930_v18 = vsel %vm9371_vm13, %v2922_v35, %v2929_v58  ;;  %v3035_v41 = vsel %vm9365_vm12, %v2931_v43, %v3034_v14 }
 0x30b   : > { %v2913_v39 = vsel %vm9371_vm13, %v2905_v22, %v2912_v50  ;;  %v3028_v23 = vsel %vm9365_vm12, %v2914_v29, %v3027_v31  ;;  %3033 = vst [vmem:[#allocation2 + $0x70] sm:$0xf] %v2930_v18  ;;  %3036 = vst [vmem:[#allocation2 + $0x74] sm:$0x1] %v3035_v41 }
 0x30c   : > { %3026 = vst [vmem:[#allocation2 + $0x64] sm:$0xf] %v2913_v39  ;;  %3029 = vst [vmem:[#allocation2 + $0x68] sm:$0x1] %v3028_v23 }
 0x30f   : > { %3101 = sbr.rel (%p6362_p3) target bundleno = 790 (0x316), region = 64 }
 0x310   : > { %v3061_v9 = vld [vmem:[#allocation2 + $0x60] sm:$0x1] }
 0x311   : > { %v3062_v24 = vsel %vm9365_vm12, 0, %v3061_v9 }
 0x312   : > { %3063 = vst [vmem:[#allocation2 + $0x60] sm:$0x1] %v3062_v24  ;;  %v3095_v52 = vld [vmem:[#allocation2 + $0x74] sm:$0x1] }
 0x313   : > { %v3092_v55 = vld [vmem:[#allocation2 + $0x68] sm:$0x1]  ;;  %v3096_v53 = vsel %vm9407_vm14, 0, %v3095_v52 }
 0x314   : > { %v3093_v13 = vsel %vm9407_vm14, 0, %v3092_v55  ;;  %3097 = vst [vmem:[#allocation2 + $0x74] sm:$0x1] %v3096_v53 }
 0x315   : > { %3094 = vst [vmem:[#allocation2 + $0x68] sm:$0x1] %v3093_v13 }
 0x316 PF: > { %p6363_p4 = scmp.ne.s32.totalorder %s8358_s24, 1 }
 0x317   : > { %v8384_v5 = vmov (!%p6363_p4), 0  }
 0x318   : > { %3108 = sbr.rel (%p6363_p4) target bundleno = 799 (0x31f), region = 68  ;;  %3110 = vst [vmem:[#allocation2 + $0x6c] sm:$0xf] (!%p6363_p4), %v8384_v5  ;;  %3111 = vst [vmem:[#allocation2 + $0x70] sm:$0xf] (!%p6363_p4), %v8384_v5 }
 0x319   : > { %3112 = vst [vmem:[#allocation2 + $0x74] sm:$0x1] (!%p6363_p4), %v8384_v5 }
 0x31f PF: > { %v8006_v21 = vld [vmem:[#allocation9 + $0x40] sm:$0xff]   ;;  %v8007_v61 = vld [vmem:[#allocation9 + $0x48] sm:$0xff]   ;;  %v8008_v27 = vld [vmem:[#allocation9 + $0x50] sm:$0xff]   ;;  %s10373_s25 = sld [smem:[#allocation19_spill]]  ;;  %s6561_s30 = sshll.u32 %s8358_s24, 4 }
 0x320   : > { %7192 = vmatprep.subr.bf16.mxu1 %v8006_v21  ;;  %v8009_v34 = vld [vmem:[#allocation9 + $0x58] sm:$0xff]   ;;  %v9550_v47 = vld [vmem:[#allocation2] sm:$0xf]  ;;  %v9552_v51 = vld [vmem:[#allocation2 + $0x4] sm:$0xf]  ;;  %s6076_s9 = sshll.u32 %s9546_s19, 4  ;;  %s10190_s9 = int_to_ptr.vmem [resolvable:$true] %s6076_s9 }
 0x321   : > { %7193 = vmatpush3.bf16.msra.mxu1 %v8006_v21  ;;  %v9554_v42 = vld [vmem:[#allocation2 + $0x8] sm:$0x1]  ;;  %v3154_v28 = vshrl.u32 %v9550_v47, 16  ;;  %v3157_v19 = vshll.u32 %v9550_v47, 16  ;;  %v3163_v6 = vshll.u32 %v9552_v51, 16  ;;  %v3167_v37 = vshrl.u32 %v9552_v51, 16 }
 0x322   : > { %7194 = vmatprep.subr.bf16.mxu1 %v8007_v61  ;;  %v9560_v4 = vld [vmem:[#allocation2 + $0xc] sm:$0xf]  ;;  %v8010_v1 = vld [vmem:[#allocation9 + $0x60] sm:$0xff]   ;;  %v3173_v7 = vshll.u32 %v9554_v42, 16  ;;  %v9563_v11 = vld [vmem:[#allocation2 + $0x10] sm:$0xf] }
 0x323   : > { %v3146_v54 = vld [vmem:[#allocation2 + $0x14] sm:$0x1]  ;;  %v3156_v26 = vrot.slane %v3154_v28, 4  ;;  %v3159_v20 = vrot.slane %v3157_v19, 5  ;;  %v3165_v30 = vrot.slane %v3163_v6, 5  ;;  %v3169_v2 = vrot.slane %v3167_v37, 4 }
 0x324   : > { %v3175_v56 = vrot.slane %v3173_v7, 5  ;;  %v3178_v57 = vshrl.u32 %v9560_v4, 16  ;;  %v3181_v12 = vshll.u32 %v9560_v4, 16  ;;  %v3187_v17 = vshll.u32 %v9563_v11, 16  ;;  %v9572_v62 = vld [vmem:[#allocation2 + $0x18] sm:$0xf] }
 0x325   : > { %7195 = vmatpush3.bf16.msra.mxu1 %v8007_v61  ;;  %v3160_v32 = vor.u32 %v3159_v20, %v3156_v26  ;;  %v3170_v44 = vor.u32 %v3169_v2, %v3165_v30  ;;  %v3191_v25 = vshrl.u32 %v9563_v11, 16  ;;  %v3197_v45 = vshll.u32 %v3146_v54, 16  ;;  %v8011_v35 = vld [vmem:[#allocation9 + $0x68] sm:$0xff]   ;;  %v9578_v43 = vld [vmem:[#allocation2 + $0x1c] sm:$0xf]  ;;  %v8012_v9 = vld [vmem:[#allocation9 + $0x70] sm:$0xff]  }
 0x326   : > { %7196 = vmatprep.subr.bf16.mxu1 %v8008_v27  ;;  %v3180_v15 = vrot.slane %v3178_v57, 4  ;;  %v3183_v60 = vrot.slane %v3181_v12, 5  ;;  %v9569_v36 = vrot.slane %v3187_v17, 5  ;;  %v3765_v38 = vrot.slane %v9563_v11, 5  ;;  %v9585_v41 = vld [vmem:[#allocation2 + $0x20] sm:$0x1] }
 0x327   : > { %v3161_v59 = vrot.slane %v3160_v32, 4  ;;  %v3171_v8 = vrot.slane %v3170_v44, 4  ;;  %v3193_v0 = vrot.slane %v3191_v25, 4  ;;  %v9574_v14 = vrot.slane %v3197_v45, 5  ;;  %v9588_v23 = vld [vmem:[#allocation2 + $0x24] sm:$0xf] }
 0x328   : > { %v3184_v22 = vor.u32 %v3183_v60, %v3180_v15  ;;  %v3767_v31 = vrot.slane %v3765_v38, 4  ;;  %v3768_v58 = vrot.slane %v3146_v54, 5  ;;  %v3202_v39 = vshrl.u32 %v9572_v62, 16  ;;  %v9595_v13 = vld [vmem:[#allocation2 + $0x28] sm:$0xf]  ;;  %v8013_v57 = vld [vmem:[#allocation9 + $0x78] sm:$0xff]  }
 0x329   : > { %7197 = vmatpush3.bf16.msra.mxu1 %v8008_v27  ;;  %v3166_v50 = vsel %vm8932_vm5, %v3161_v59, %v3165_v30  ;;  %v3176_v29 = vsel %vm8932_vm5, %v3171_v8, %v3175_v56  ;;  %v3194_v18 = vor.u32 %v3193_v0, %v9569_v36  ;;  %v3205_v53 = vshll.u32 %v9572_v62, 16  ;;  %v9599_v27 = vld [vmem:[#allocation2 + $0x2c] sm:$0x1]  ;;  %v9611_v56 = vld [vmem:[#allocation2 + $0x30] sm:$0xf]  ;;  %s6536_s5 = sshll.u32 %s10373_s25, 5 }
 0x32a   : > { %7198 = vmatprep.subr.bf16.mxu1 %v8009_v34  ;;  %v6364_v24 = vcombine.low %v3166_v50, %v3176_v29  ;;  %v3185_v52 = vrot.slane %v3184_v22, 4  ;;  %v9592_v55 = vsel %vm8830_vm2, %v3767_v31, %v3768_v58  ;;  %v3204_v5 = vrot.slane %v3202_v39, 4  ;;  %v9615_v25 = vld [vmem:[#allocation2 + $0x34] sm:$0xf]  ;;  %v9618_v60 = vld [vmem:[#allocation2 + $0x38] sm:$0x1]  ;;  %s6073_s18 = sadd.s32 %s6561_s30, %s6536_s5 }
 0x32b   : > { %v3195_v46 = vrot.slane %v3194_v18, 4  ;;  %v3211_v21 = vshll.u32 %v9578_v43, 16  ;;  %v3215_v61 = vshrl.u32 %v9578_v43, 16  ;;  %v3207_v28 = vrot.slane %v3205_v53, 5  ;;  %v8014_v31 = vld [vmem:[#allocation9] sm:$0xff]   ;;  %s6537_s1 = sshll.u32 %s6073_s18, 7 }
 0x32c   : > { %7208 = vmatprep.mubr.bf16.mxu1 %v6364_v24  ;;  %v3221_v19 = vshll.u32 %v9585_v41, 16  ;;  %v3226_v6 = vshrl.u32 %v9588_v23, 16  ;;  %v3190_v37 = vsel %vm8932_vm5, %v3185_v52, %v9569_v36  ;;  %v3229_v54 = vshll.u32 %v9588_v23, 16  ;;  %v9630_v39 = vld [vmem:[#allocation2 + $0x40] sm:$0xf]  ;;  %s10376_s29 = sld [smem:[#allocation20_spill]] }
 0x32d   : > { %7199 = vmatpush3.bf16.msra.mxu1 %v8009_v34  ;;  %v3761_v34 = vrot.slane %v9554_v42, 5  ;;  %v3217_v7 = vrot.slane %v3215_v61, 4  ;;  %v3200_v26 = vsel %vm8932_vm5, %v3195_v46, %v9574_v14  ;;  %v3208_v20 = vor.u32 %v3207_v28, %v3204_v5  ;;  %v9624_v14 = vld [vmem:[#allocation2 + $0x3c] sm:$0xf]  ;;  %s10377_s16 = sld [smem:[#allocation34_spill]]  ;;  %s10197_s2 = scalar_lea.sflag [#allocation5], %s308_s10 }
 0x32e   : > { %7200 = vmatprep.subr.bf16.mxu1 %v8010_v1  ;;  %v3223_v30 = vrot.slane %v3221_v19, 5  ;;  %v3228_v2 = vrot.slane %v3226_v6, 4  ;;  %v3231_v17 = vrot.slane %v3229_v54, 5  ;;  %v3235_v32 = vshll.u32 %v9595_v13, 16  ;;  %s8244_s7 = scalar_lea.vmem %s10190_s9, 2048  ;;  %s8385_s6 = smov [#allocation12]  }
 0x32f   : > { %v3239_v44 = vshrl.u32 %v9595_v13, 16  ;;  %v3209_v45 = vrot.slane %v3208_v20, 4  ;;  %v3245_v15 = vshll.u32 %v9599_v27, 16  ;;  %v3250_v36 = vshrl.u32 %v9611_v56, 16  ;;  %v9642_v20 = vld [vmem:[#allocation2 + $0x44] sm:$0x1]  ;;  %p8245_p6 = scmp.ne.s32.totalorder %s10190_s9, %s8244_s7 }
 0x330   : > { %v3253_v59 = vshll.u32 %v9611_v56, 16  ;;  %v3232_v0 = vor.u32 %v3231_v17, %v3228_v2  ;;  %v3259_v46 = vshll.u32 %v9615_v25, 16  ;;  %v3269_v61 = vshll.u32 %v9618_v60, 16  ;;  %v9645_v2 = vld [vmem:[#allocation2 + $0x48] sm:$0xf]  ;;  %s8248_s17 = sshll.u32 %s8385_s6, 4  ;;  %s8249_s17 = int_to_ptr.vmem [resolvable:$false] %s8248_s17 }
 0x331   : > { %7201 = vmatpush3.bf16.msra.mxu1 %v8010_v1  ;;  %v3213_v1 = vrot.slane %v3211_v21, 5  ;;  %v3241_v22 = vrot.slane %v3239_v44, 4  ;;  %v9628_v50 = vrot.slane %v3245_v15, 5  ;;  %v3252_v29 = vrot.slane %v3250_v36, 4  ;;  %v8015_v44 = vld [vmem:[#allocation9 + $0x8] sm:$0xff]   ;;  %s8250_s25 = scalar_lea.vmem %s8249_s17, 4096  ;;  %p8251_p0 = scmp.lt.s32.totalorder %s10190_s9, %s8249_s17 }
 0x332   : > { %7202 = vmatprep.subr.bf16.mxu1 %v8011_v35  ;;  %v3255_v18 = vrot.slane %v3253_v59, 5  ;;  %v3233_v52 = vrot.slane %v3232_v0, 4  ;;  %v3263_v21 = vshrl.u32 %v9615_v25, 16  ;;  %v6365_v28 = vcombine.low %v3190_v37, %v3200_v26  ;;  %p10378_p10 = scmp.ne.s32.totalorder %s10376_s29, 0  ;;  %p8252_p5 = scmp.lt.s32.totalorder %s8250_s25, %s8244_s7 }
 0x333   : > { %v3218_v12 = vor.u32 %v3217_v7, %v3213_v1  ;;  %v3214_v58 = vsel %vm8932_vm5, %v3209_v45, %v3213_v1  ;;  %v3261_v6 = vrot.slane %v3259_v46, 5  ;;  %v3274_v1 = vshrl.u32 %v9624_v14, 16  ;;  %s10188_s12 = scalar_lea.hbm %s10377_s16, %s6537_s1 }
 0x334   : > { %v3256_v5 = vor.u32 %v3255_v18, %v3252_v29  ;;  %v3265_v54 = vrot.slane %v3263_v21, 4  ;;  %v3283_v37 = vshll.u32 %v9630_v39, 16  ;;  %v3287_v26 = vshrl.u32 %v9630_v39, 16  ;;  %v9665_v21 = vld [vmem:[#allocation2 + $0x58] sm:$0xf]  ;;  %p8246_p13 = pnand %p8245_p6, %p10378_p10  ;;  %p8253_p8 = por %p8252_p5, %p8251_p0 }
 0x335   : > { %7203 = vmatpush3.bf16.msra.mxu1 %v8011_v35  ;;  %v3219_v8 = vrot.slane %v3218_v12, 4  ;;  %v9622_v35 = vrot.slane %v3235_v32, 5  ;;  %v3276_v17 = vrot.slane %v3274_v1, 4  ;;  %v9649_v32 = vld [vmem:[#allocation2 + $0x4c] sm:$0xf]  ;;  %v3271_v36 = vrot.slane %v3269_v61, 5 }
 0x336   : > { %7204 = vmatprep.subr.bf16.mxu1 %v8012_v9  ;;  %v3257_v12 = vrot.slane %v3256_v5, 4  ;;  %v3266_v15 = vor.u32 %v3265_v54, %v3261_v6  ;;  %v3289_v0 = vrot.slane %v3287_v26, 4  ;;  %v3311_v5 = vshrl.u32 %v9649_v32, 16  ;;  %v8016_v61 = vld [vmem:[#allocation9 + $0x10] sm:$0xff]   ;;  %p8247_p11 = pneg %p8246_p13 }
 0x337   : > { %v3224_v24 = vsel %vm8932_vm5, %v3219_v8, %v3223_v30  ;;  %v3242_v53 = vor.u32 %v3241_v22, %v9622_v35  ;;  %v3238_v7 = vsel %vm8932_vm5, %v3233_v52, %v9622_v35  ;;  %v3277_v30 = vshll.u32 %v9624_v14, 16  ;;  %v9654_v8 = vld [vmem:[#allocation2 + $0x50] sm:$0x1] }
 0x338   : > { %v3293_v35 = vshll.u32 %v9642_v20, 16  ;;  %v3298_v22 = vshrl.u32 %v9645_v2, 16  ;;  %v3267_v29 = vrot.slane %v3266_v15, 4  ;;  %v3262_v52 = vsel %vm8932_vm5, %v3257_v12, %v3261_v6  ;;  %p8254_p12 = pnand %p8253_p8, %p8247_p11 }
 0x339   : > { %7205 = vmatpush3.bf16.msra.mxu1 %v8012_v9  ;;  %v3243_v19 = vrot.slane %v3242_v53, 4  ;;  %v6366_v9 = vcombine.low %v3214_v58, %v3224_v24  ;;  %v3279_v59 = vrot.slane %v3277_v30, 5  ;;  %v9658_v58 = vld [vmem:[#allocation2 + $0x54] sm:$0xf]  ;;  %v3301_v24 = vshll.u32 %v9645_v2, 16 }
 0x33a   : > { %7206 = vmatprep.subr.bf16.mxu1 %v8013_v57  ;;  %v3300_v46 = vrot.slane %v3298_v22, 4  ;;  %v9669_v30 = vld [vmem:[#allocation2 + $0x5c] sm:$0x1]  ;;  %v3317_v6 = vshll.u32 %v9654_v8, 16  ;;  %v3322_v26 = vshrl.u32 %v9658_v58, 16  ;;  %v3325_v15 = vshll.u32 %v9658_v58, 16 }
 0x33b   : > { %v3248_v45 = vsel %vm8932_vm5, %v3243_v19, %v9628_v50  ;;  %v3280_v18 = vor.u32 %v3279_v59, %v3276_v17  ;;  %v3307_v50 = vshll.u32 %v9649_v32, 16  ;;  %v3295_v19 = vrot.slane %v3293_v35, 5  ;;  %v8017_v22 = vld [vmem:[#allocation9 + $0x18] sm:$0xff]  }
 0x33c   : > { %v3303_v1 = vrot.slane %v3301_v24, 5  ;;  %v3313_v17 = vrot.slane %v3311_v5, 4  ;;  %v6367_v12 = vcombine.low %v3238_v7, %v3248_v45  ;;  %v3331_v35 = vshll.u32 %v9665_v21, 16  ;;  %v8018_v5 = vld [vmem:[#allocation9 + $0x20] sm:$0xff]  }
 0x33d   : > { %7207 = vmatpush3.bf16.msra.mxu1 %v8013_v57  ;;  %v3285_v57 = vrot.slane %v3283_v37, 5  ;;  %v3309_v54 = vrot.slane %v3307_v50, 5  ;;  %v3327_v24 = vrot.slane %v3325_v15, 5  ;;  %v3335_v7 = vshrl.u32 %v9665_v21, 16 }
 0x33e   : > { %7224 = vmatprep.subr.bf16.mxu1 %v8014_v31  ;;  %v3304_v37 = vor.u32 %v3303_v1, %v3300_v46  ;;  %v3341_v45 = vshll.u32 %v9669_v30, 16  ;;  %v3758_v15 = vrot.slane %v9552_v51, 5  ;;  %v3779_v42 = vrot.slane %v9595_v13, 5 }
 0x33f   : > { %v3290_v53 = vor.u32 %v3289_v0, %v3285_v57  ;;  %v3314_v0 = vor.u32 %v3313_v17, %v3309_v54  ;;  %v3337_v17 = vrot.slane %v3335_v7, 4 }
 0x340   : > { %7209 = vmatmul.mubr.bf16.vlgmr.msra.gmra.mrb[20].mxu1 %v6365_v28  ;;  %v3272_v28 = vsel %vm8932_vm5, %v3267_v29, %v3271_v36  ;;  %v3319_v36 = vrot.slane %v3317_v6, 5  ;;  %v3305_v29 = vrot.slane %v3304_v37, 4 }
 0x341   : > { %7225 = vmatpush3.bf16.msra.mxu1 %v8014_v31  ;;  %7212 = vmatprep.mubr.bf16.mxu1 %v6366_v9  ;;  %v3281_v31 = vrot.slane %v3280_v18, 4  ;;  %v3291_v9 = vrot.slane %v3290_v53, 4  ;;  %v6368_v59 = vcombine.low %v3262_v52, %v3272_v28  ;;  %v3324_v18 = vrot.slane %v3322_v26, 4 }
 0x342   : > { %7226 = vmatprep.subr.bf16.mxu1 %v8015_v44  ;;  %v3315_v50 = vrot.slane %v3314_v0, 4  ;;  %v3333_v53 = vrot.slane %v3331_v35, 5  ;;  %v3310_v28 = vsel %vm8932_vm5, %v3305_v29, %v3309_v54  ;;  %v3772_v54 = vrot.slane %v9578_v43, 5 }
 0x343   : > { %v3328_v52 = vor.u32 %v3327_v24, %v3324_v18  ;;  %v3296_v46 = vsel %vm8932_vm5, %v3291_v9, %v3295_v19  ;;  %v3760_v35 = vrot.slane %v3758_v15, 4  ;;  %v3775_v29 = vrot.slane %v9585_v41, 5 }
 0x344   : > { %v3320_v1 = vsel %vm8932_vm5, %v3315_v50, %v3319_v36  ;;  %v3338_v37 = vor.u32 %v3337_v17, %v3333_v53  ;;  %v3734_v50 = vld [vmem:[#allocation2 + $0x18] sm:$0xe]  ;;  %v3774_v7 = vrot.slane %v3772_v54, 4  ;;  %v3782_v17 = vrot.slane %v9599_v27, 5 }
 0x345   : > { %7227 = vmatpush3.bf16.msra.mxu1 %v8015_v44  ;;  %v3286_v44 = vsel %vm8932_vm5, %v3281_v31, %v3285_v57  ;;  %v3329_v6 = vrot.slane %v3328_v52, 4  ;;  %v8019_v57 = vld [vmem:[#allocation9 + $0x28] sm:$0xff]   ;;  %v6370_v31 = vcombine.low %v3310_v28, %v3320_v1  ;;  %v9706_v41 = vsel %vm8830_vm2, %v3760_v35, %v3761_v34  ;;  %v8021_v35 = vld [vmem:[#allocation9 + $0x38] sm:$0xff]  }
 0x346   : > { %7228 = vmatprep.subr.bf16.mxu1 %v8016_v61  ;;  %v6369_v26 = vcombine.low %v3286_v44, %v3296_v46  ;;  %v3339_v19 = vrot.slane %v3338_v37, 4  ;;  %v6398_v44 = vrot.slane %v3734_v50, 9  ;;  %v3735_v52 = vld [vmem:[#allocation2 + $0x24] sm:$0xe]  ;;  %v9714_v46 = vsel %vm8830_vm2, %v3774_v7, %v3775_v29  ;;  %v3738_v29 = vld [vmem:[#allocation2 + $0x48] sm:$0xe] }
 0x347   : > { %v3334_v36 = vsel %vm8932_vm5, %v3329_v6, %v3333_v53  ;;  %v8020_v53 = vld [vmem:[#allocation9 + $0x30] sm:$0xff]   ;;  %v6399_v28 = vrot.slane %v3735_v52, 9  ;;  %v3786_v6 = vrot.slane %v9615_v25, 5  ;;  %v6380_v27 = vcombine.low %v9550_v47, %v9552_v51 }
 0x348   : > { %7213 = vmatmul.mubr.bf16.gmra.mrb[24].mxu1 %v6367_v12  ;;  %v3343_v12 = vrot.slane %v3341_v45, 5  ;;  %v9719_v1 = vsel %vm8830_vm2, %v6398_v44, %v3772_v54  ;;  %v3800_v7 = vrot.slane %v9649_v32, 5  ;;  %v3803_v44 = vrot.slane %v9654_v8, 5 }
 0x349   : > { %7229 = vmatpush3.bf16.msra.mxu1 %v8016_v61  ;;  %7216 = vmatprep.mubr.bf16.mxu1 %v6368_v59  ;;  %v3732_v61 = vld [vmem:[#allocation2] sm:$0xe]  ;;  %v3733_v59 = vld [vmem:[#allocation2 + $0xc] sm:$0xe]  ;;  %v9727_v37 = vsel %vm8830_vm2, %v6399_v28, %v3779_v42 }
 0x34a   : > { %7230 = vmatprep.subr.bf16.mxu1 %v8017_v22  ;;  %v6396_v9 = vrot.slane %v3732_v61, 9  ;;  %v6397_v0 = vrot.slane %v3733_v59, 9  ;;  %v3344_v18 = vsel %vm8932_vm5, %v3339_v19, %v3343_v12  ;;  %v6406_v12 = vcombine.low %v9719_v1, %v9714_v46  ;;  %v3737_v61 = vld [vmem:[#allocation2 + $0x3c] sm:$0xe]  ;;  %v9819_v46 = vld [vmem:[#allocation2 + $0x10] sm:$0xf] }
 0x34b   : > { %v6371_v34 = vcombine.low %v3334_v36, %v3344_v18  ;;  %v3789_v59 = vrot.slane %v9618_v60, 5  ;;  %v6401_v19 = vrot.slane %v3737_v61, 9  ;;  %v3796_v36 = vrot.slane %v9642_v20, 5  ;;  %v3739_v18 = vld [vmem:[#allocation2 + $0x54] sm:$0xe]  ;;  %v8050_v1 = vld [vmem:[#allocation2 + $0x24] sm:$0xff]  }
 0x34c   : > { %v9694_v24 = vsel %vm8830_vm2, %v6396_v9, %v3758_v15  ;;  %v3788_v15 = vrot.slane %v3786_v6, 4  ;;  %v3793_v9 = vrot.slane %v9630_v39, 5  ;;  %v6402_v20 = vrot.slane %v3738_v29, 9 }
 0x34d   : > { %7231 = vmatpush3.bf16.msra.mxu1 %v8017_v22  ;;  %v9700_v22 = vsel %vm8830_vm2, %v6397_v0, %v3765_v38  ;;  %v6404_v38 = vcombine.low %v9694_v24, %v9706_v41  ;;  %v6403_v28 = vrot.slane %v3739_v18, 9  ;;  %v3802_v8 = vrot.slane %v3800_v7, 4  ;;  %v8046_v24 = vld [vmem:[#allocation2 + $0xc] sm:$0xff]   ;;  %v8048_v41 = vld [vmem:[#allocation9 + $0x100] sm:$0xff]  }
 0x34e   : > { %7232 = vmatprep.subr.bf16.mxu1 %v8018_v5  ;;  %v6405_v45 = vcombine.low %v9700_v22, %v9592_v55  ;;  %v9750_v47 = vsel %vm8830_vm2, %v6401_v19, %v3793_v9  ;;  %v3795_v51 = vrot.slane %v3793_v9, 4  ;;  %v8025_v9 = vld [vmem:[#allocation9 + $0x88] sm:$0xff]   ;;  %v8042_v55 = vld [vmem:[#allocation9 + $0xe0] sm:$0xff]   ;;  %v8045_v22 = vld [vmem:[#allocation9 + $0xf8] sm:$0xff]  }
 0x34f   : > { %v9823_v18 = vld [vmem:[#allocation2 + $0x1c] sm:$0xf] }
 0x350   : > { %7217 = vmatmul.mubr.bf16.gmra.mrb[28].mxu1 %v6369_v26  ;;  %v3781_v26 = vrot.slane %v3779_v42, 4  ;;  %v9758_v52 = vsel %vm8830_vm2, %v3795_v51, %v3796_v36  ;;  %v3807_v42 = vrot.slane %v9665_v21, 5  ;;  %v8029_v36 = vld [vmem:[#allocation9 + $0x98] sm:$0xff]  }
 0x351   : > { %7233 = vmatpush3.bf16.msra.mxu1 %v8018_v5  ;;  %7220 = vmatprep.mubr.bf16.mxu1 %v6370_v31  ;;  %v3736_v5 = vld [vmem:[#allocation2 + $0x30] sm:$0xe] }
 0x352   : > { %7234 = vmatprep.subr.bf16.mxu1 %v8019_v57  ;;  %v6400_v31 = vrot.slane %v3736_v5, 9  ;;  %v9735_v0 = vsel %vm8830_vm2, %v3781_v26, %v3782_v17  ;;  %v3810_v17 = vrot.slane %v9669_v30, 5  ;;  %v6409_v5 = vcombine.low %v9750_v47, %v9758_v52  ;;  %v8052_v47 = vld [vmem:[#allocation9 + $0x110] sm:$0xff]  }
 0x353   : > { %v6407_v60 = vcombine.low %v9727_v37, %v9735_v0  ;;  %v9770_v26 = vsel %vm8830_vm2, %v6403_v28, %v3807_v42  ;;  %v9774_v30 = vsel %vm8830_vm2, %v3802_v8, %v3803_v44 }
 0x354   : > { %v9739_v54 = vsel %vm8830_vm2, %v6400_v31, %v3786_v6  ;;  %v9766_v6 = vsel %vm8830_vm2, %v6402_v20, %v3800_v7  ;;  %v3809_v31 = vrot.slane %v3807_v42, 4  ;;  %v9825_v20 = vld [vmem:[#allocation2 + $0x14] sm:$0x1]  ;;  %v4323_v42 = vshll.u32 %v9823_v18, 16 }
 0x355   : > { %7235 = vmatpush3.bf16.msra.mxu1 %v8019_v57  ;;  %v9746_v57 = vsel %vm8830_vm2, %v3788_v15, %v3789_v59  ;;  %v6410_v61 = vcombine.low %v9766_v6, %v9774_v30  ;;  %v6382_v59 = vcombine.low %v9572_v62, %v9578_v43  ;;  %v8032_v62 = vld [vmem:[#allocation9 + $0xa0] sm:$0xff]   ;;  %v6385_v43 = vcombine.low %v9624_v14, %v9630_v39  ;;  %v8039_v39 = vld [vmem:[#allocation9 + $0xc8] sm:$0xff]   ;;  %v8053_v6 = vld [vmem:[#allocation9 + $0x118] sm:$0xff]  }
 0x356   : > { %7236 = vmatprep.subr.bf16.mxu1 %v8020_v53  ;;  %v6408_v50 = vcombine.low %v9739_v54, %v9746_v57  ;;  %v9782_v15 = vsel %vm8830_vm2, %v3809_v31, %v3810_v17  ;;  %v8038_v14 = vld [vmem:[#allocation9 + $0xc0] sm:$0xff]   ;;  %v4299_v54 = vshll.u32 %v9819_v46, 16  ;;  %v4327_v17 = vshrl.u32 %v9823_v18, 16 }
 0x357   : > { %v6411_v19 = vcombine.low %v9770_v26, %v9782_v15  ;;  %v4268_v57 = vld [vmem:[#allocation2 + $0x18] sm:$0xf]  ;;  %v9831_v26 = vld [vmem:[#allocation2 + $0x28] sm:$0xf]  ;;  %v4309_v30 = vshll.u32 %v9825_v20, 16 }
 0x358   : > { %7221 = vmatmul.mubr.bf16.gmra.mrb[32].mxu1 %v6371_v34  ;;  %v8024_v34 = vld [vmem:[#allocation9 + $0x80] sm:$0xff]   ;;  %v9827_v7 = vrot.slane %v4299_v54, 5  ;;  %v4314_v52 = vshrl.u32 %v4268_v57, 16  ;;  %v4317_v28 = vshll.u32 %v4268_v57, 16 }
 0x359   : > { %7237 = vmatpush3.bf16.msra.mxu1 %v8020_v53  ;;  %7240 = vmatprep.mubr.bf16.mxu1 %v6380_v27  ;;  %v6381_v53 = vcombine.low %v9560_v4, %v9563_v11  ;;  %v8028_v4 = vld [vmem:[#allocation9 + $0x90] sm:$0xff]   ;;  %v6383_v11 = vcombine.low %v9588_v23, %v9595_v13  ;;  %v6384_v27 = vcombine.low %v9611_v56, %v9615_v25  ;;  %v8033_v23 = vld [vmem:[#allocation9 + $0xa8] sm:$0xff]   ;;  %v8037_v25 = vld [vmem:[#allocation9 + $0xb8] sm:$0xff]  }
 0x35a   : > { %7238 = vmatprep.subr.bf16.mxu1 %v8021_v35  ;;  %v8036_v13 = vld [vmem:[#allocation9 + $0xb0] sm:$0xff]   ;;  %v6387_v56 = vcombine.low %v9658_v58, %v9665_v21  ;;  %v8043_v58 = vld [vmem:[#allocation9 + $0xe8] sm:$0xff]   ;;  %v4319_v15 = vrot.slane %v4317_v28, 5 }
 0x35b   : > { %v8044_v21 = vld [vmem:[#allocation9 + $0xf0] sm:$0xff]  }
 0x35d   : > { %7239 = vmatpush3.bf16.msra.mxu1 %v8021_v35  ;;  %v6386_v35 = vcombine.low %v9645_v2, %v9649_v32  ;;  %v8040_v2 = vld [vmem:[#allocation9 + $0xd0] sm:$0xff]   ;;  %v8041_v32 = vld [vmem:[#allocation9 + $0xd8] sm:$0xff]  }
 0x35e   : > { %7256 = vmatprep.subr.bf16.mxu1 %v8024_v34 }
 0x360   : > { %7241 = vmatmul.mubr.bf16.vlgmr.msra.gmra.mrb[20].mxu1 %v6381_v53  ;;  %v9835_v53 = vld [vmem:[#allocation2 + $0x20] sm:$0x1] }
 0x361   : > { %7257 = vmatpush3.bf16.msra.mxu1 %v8024_v34  ;;  %7244 = vmatprep.mubr.bf16.mxu1 %v6382_v59  ;;  %v4271_v34 = vld [vmem:[#allocation2 + $0x24] sm:$0xf]  ;;  %v9837_v59 = vrot.slane %v4323_v42, 5 }
 0x362   : > { %7258 = vmatprep.subr.bf16.mxu1 %v8025_v9 }
 0x365   : > { %7259 = vmatpush3.bf16.msra.mxu1 %v8025_v9  ;;  %v4338_v9 = vshrl.u32 %v4271_v34, 16 }
 0x366   : > { %7260 = vmatprep.subr.bf16.mxu1 %v8028_v4 }
 0x368   : > { %7245 = vmatmul.mubr.bf16.gmra.mrb[24].mxu1 %v6383_v11  ;;  %v4347_v11 = vshll.u32 %v9831_v26, 16 }
 0x369   : > { %7261 = vmatpush3.bf16.msra.mxu1 %v8028_v4  ;;  %7248 = vmatprep.mubr.bf16.mxu1 %v6384_v27  ;;  %v4341_v4 = vshll.u32 %v4271_v34, 16  ;;  %v4351_v27 = vshrl.u32 %v9831_v26, 16 }
 0x36a   : > { %7262 = vmatprep.subr.bf16.mxu1 %v8029_v36 }
 0x36d   : > { %7263 = vmatpush3.bf16.msra.mxu1 %v8029_v36  ;;  %v8055_v36 = vld [vmem:[#allocation2 + $0x48] sm:$0xff]  }
 0x36e   : > { %7264 = vmatprep.subr.bf16.mxu1 %v8032_v62 }
 0x370   : > { %7249 = vmatmul.mubr.bf16.gmra.mrb[28].mxu1 %v6385_v43 }
 0x371   : > { %7265 = vmatpush3.bf16.msra.mxu1 %v8032_v62  ;;  %7252 = vmatprep.mubr.bf16.mxu1 %v6386_v35  ;;  %v8056_v62 = vld [vmem:[#allocation9 + $0x120] sm:$0xff]   ;;  %v4333_v35 = vshll.u32 %v9835_v53, 16 }
 0x372   : > { %7266 = vmatprep.subr.bf16.mxu1 %v8033_v23 }
 0x375   : > { %7267 = vmatpush3.bf16.msra.mxu1 %v8033_v23  ;;  %v8058_v23 = vld [vmem:[#allocation2 + $0x54] sm:$0xff]  }
 0x376   : > { %7268 = vmatprep.subr.bf16.mxu1 %v8036_v13 }
 0x378   : > { %7253 = vmatmul.mubr.bf16.gmra.mrb[32].mxu1 %v6387_v56 }
 0x379   : > { %7269 = vmatpush3.bf16.msra.mxu1 %v8036_v13  ;;  %7272 = vmatprep.mubr.bf16.mxu1 %v6404_v38  ;;  %v8047_v38 = vld [vmem:[#allocation2 + $0x18] sm:$0xff]   ;;  %v4274_v13 = vld [vmem:[#allocation2 + $0x30] sm:$0xf] }
 0x37a   : > { %7270 = vmatprep.subr.bf16.mxu1 %v8037_v25 }
 0x37d   : > { %7271 = vmatpush3.bf16.msra.mxu1 %v8037_v25  ;;  %v4311_v25 = vrot.slane %v4309_v30, 5 }
 0x37e   : > { %7288 = vmatprep.subr.bf16.mxu1 %v8038_v14 }
 0x380   : > { %7273 = vmatmul.mubr.bf16.vlgmr.msra.gmra.mrb[20].mxu1 %v6405_v45  ;;  %v4265_v45 = vld [vmem:[#allocation2 + $0xc] sm:$0xf] }
 0x381   : > { %7289 = vmatpush3.bf16.msra.mxu1 %v8038_v14  ;;  %7276 = vmatprep.mubr.bf16.mxu1 %v6406_v12  ;;  %v8049_v12 = vld [vmem:[#allocation9 + $0x108] sm:$0xff]   ;;  %v4290_v37 = vshrl.u32 %v4265_v45, 16  ;;  %v4293_v0 = vshll.u32 %v4265_v45, 16 }
 0x382   : > { %7290 = vmatprep.subr.bf16.mxu1 %v8039_v39 }
 0x383   : > { %v4292_v51 = vrot.slane %v4290_v37, 4  ;;  %v4295_v29 = vrot.slane %v4293_v0, 5  ;;  %v4365_v37 = vshll.u32 %v4274_v13, 16 }
 0x385   : > { %7291 = vmatpush3.bf16.msra.mxu1 %v8039_v39  ;;  %v4296_v8 = vor.u32 %v4295_v29, %v4292_v51 }
 0x386   : > { %7292 = vmatprep.subr.bf16.mxu1 %v8040_v2 }
 0x387   : > { %v4297_v43 = vrot.slane %v4296_v8, 4 }
 0x388   : > { %7277 = vmatmul.mubr.bf16.gmra.mrb[24].mxu1 %v6407_v60  ;;  %v4303_v60 = vshrl.u32 %v9819_v46, 16 }
 0x389   : > { %7293 = vmatpush3.bf16.msra.mxu1 %v8040_v2  ;;  %7280 = vmatprep.mubr.bf16.mxu1 %v6408_v50  ;;  %v8051_v50 = vld [vmem:[#allocation2 + $0x30] sm:$0xff]   ;;  %v4302_v45 = vsel %vm8932_vm5, %v4297_v43, %v9827_v7 }
 0x38a   : > { %7294 = vmatprep.subr.bf16.mxu1 %v8041_v32  ;;  %v4305_v44 = vrot.slane %v4303_v60, 4  ;;  %v9843_v2 = vld [vmem:[#allocation2 + $0x34] sm:$0xf] }
 0x38b   : > { %v4371_v0 = vshll.u32 %v9843_v2, 16  ;;  %v4375_v54 = vshrl.u32 %v9843_v2, 16 }
 0x38c   : > { %v4306_v31 = vor.u32 %v4305_v44, %v9827_v7 }
 0x38d   : > { %7295 = vmatpush3.bf16.msra.mxu1 %v8041_v32  ;;  %v4277_v32 = vld [vmem:[#allocation2 + $0x3c] sm:$0xf]  ;;  %v9864_v8 = vrot.slane %v4371_v0, 5  ;;  %v4377_v34 = vrot.slane %v4375_v54, 4 }
 0x38e   : > { %7296 = vmatprep.subr.bf16.mxu1 %v8042_v55  ;;  %v4307_v56 = vrot.slane %v4306_v31, 4  ;;  %v4386_v60 = vshrl.u32 %v4277_v32, 16  ;;  %v4389_v57 = vshll.u32 %v4277_v32, 16  ;;  %v9866_v31 = vld [vmem:[#allocation2 + $0x44] sm:$0x1] }
 0x390   : > { %7281 = vmatmul.mubr.bf16.gmra.mrb[28].mxu1 %v6409_v5  ;;  %v8054_v5 = vld [vmem:[#allocation2 + $0x3c] sm:$0xff]   ;;  %v4312_v51 = vsel %vm8932_vm5, %v4307_v56, %v4311_v25  ;;  %v4388_v30 = vrot.slane %v4386_v60, 4 }
 0x391   : > { %7297 = vmatpush3.bf16.msra.mxu1 %v8042_v55  ;;  %7284 = vmatprep.mubr.bf16.mxu1 %v6410_v61  ;;  %v4316_v61 = vrot.slane %v4314_v52, 4  ;;  %v4340_v55 = vrot.slane %v4338_v9, 4 }
 0x392   : > { %7298 = vmatprep.subr.bf16.mxu1 %v8043_v58 }
 0x393   : > { %v4320_v14 = vor.u32 %v4319_v15, %v4316_v61  ;;  %v4391_v61 = vrot.slane %v4389_v57, 5  ;;  %v8059_v15 = vld [vmem:[#allocation2 + $0x60] sm:$0xff]  }
 0x394   : > { %v8062_v57 = vld [vmem:[#allocation9 + $0x140] sm:$0xff]  }
 0x395   : > { %7299 = vmatpush3.bf16.msra.mxu1 %v8043_v58  ;;  %v4343_v58 = vrot.slane %v4341_v4, 5  ;;  %v4321_v29 = vrot.slane %v4320_v14, 4  ;;  %v4283_v14 = vld [vmem:[#allocation2 + $0x54] sm:$0xf]  ;;  %v4392_v32 = vor.u32 %v4391_v61, %v4388_v30 }
 0x396   : > { %7300 = vmatprep.subr.bf16.mxu1 %v8044_v21  ;;  %v4434_v54 = vshrl.u32 %v4283_v14, 16  ;;  %v4437_v60 = vshll.u32 %v4283_v14, 16 }
 0x397   : > { %v4344_v52 = vor.u32 %v4343_v58, %v4340_v55  ;;  %v4326_v9 = vsel %vm8932_vm5, %v4321_v29, %v9837_v59 }
 0x398   : > { %7285 = vmatmul.mubr.bf16.gmra.mrb[32].mxu1 %v6411_v19  ;;  %v4329_v19 = vrot.slane %v4327_v17, 4  ;;  %v9862_v17 = vld [vmem:[#allocation2 + $0x38] sm:$0x1] }
 0x399   : > { %7301 = vmatpush3.bf16.msra.mxu1 %v8044_v21  ;;  %7304 = vmatprep.mubr.bf16.mxu1 %v8046_v24  ;;  %v9845_v21 = vrot.slane %v4347_v11, 5  ;;  %v4353_v24 = vrot.slane %v4351_v27, 4  ;;  %v4280_v27 = vld [vmem:[#allocation2 + $0x48] sm:$0xf]  ;;  %v4381_v25 = vshll.u32 %v9862_v17, 16 }
 0x39a   : > { %7302 = vmatprep.subr.bf16.mxu1 %v8045_v22  ;;  %v4330_v39 = vor.u32 %v4329_v19, %v9837_v59  ;;  %v6436_v19 = vcombine.low %v4302_v45, %v4312_v51  ;;  %v4405_v59 = vshll.u32 %v9866_v31, 16  ;;  %v4410_v55 = vshrl.u32 %v4280_v27, 16 }
 0x39b   : > { %v4354_v28 = vor.u32 %v4353_v24, %v9845_v21  ;;  %v4413_v58 = vshll.u32 %v4280_v27, 16  ;;  %v9880_v24 = vld [vmem:[#allocation2 + $0x58] sm:$0xf]  ;;  %v4383_v29 = vrot.slane %v4381_v25, 5 }
 0x39c   : > { %v4331_v44 = vrot.slane %v4330_v39, 4  ;;  %v4378_v39 = vor.u32 %v4377_v34, %v9864_v8 }
 0x39d   : > { %7303 = vmatpush3.bf16.msra.mxu1 %v8045_v22  ;;  %v9847_v22 = vld [vmem:[#allocation2 + $0x40] sm:$0xf]  ;;  %v4355_v43 = vrot.slane %v4354_v28, 4  ;;  %v4412_v28 = vrot.slane %v4410_v55, 4 }
 0x39e   : > { %7320 = vmatprep.subr.bf16.mxu1 %v8048_v41  ;;  %v4399_v7 = vshrl.u32 %v9847_v22, 16 }
 0x3a0   : > { %7305 = vmatmul.mubr.bf16.vlgmr.msra.gmra.mrb[20].mxu1 %v8047_v38  ;;  %v4335_v38 = vrot.slane %v4333_v35, 5  ;;  %v4401_v11 = vrot.slane %v4399_v7, 4  ;;  %v4447_v7 = vshrl.u32 %v9880_v24, 16 }
 0x3a1   : > { %7321 = vmatpush3.bf16.msra.mxu1 %v8048_v41  ;;  %7308 = vmatprep.mubr.bf16.mxu1 %v8050_v1  ;;  %v8057_v41 = vld [vmem:[#allocation9 + $0x128] sm:$0xff]   ;;  %v9852_v1 = vld [vmem:[#allocation2 + $0x2c] sm:$0x1] }
 0x3a2   : > { %7322 = vmatprep.subr.bf16.mxu1 %v8049_v12  ;;  %v4357_v42 = vshll.u32 %v9852_v1, 16 }
 0x3a4   : > { %v4359_v35 = vrot.slane %v4357_v42, 5  ;;  %v8063_v42 = vld [vmem:[#allocation9 + $0x148] sm:$0xff]  }
 0x3a5   : > { %7323 = vmatpush3.bf16.msra.mxu1 %v8049_v12  ;;  %v4362_v12 = vshrl.u32 %v4274_v13, 16  ;;  %v8061_v13 = vld [vmem:[#allocation9 + $0x138] sm:$0xff]  }
 0x3a6   : > { %7324 = vmatprep.subr.bf16.mxu1 %v8052_v47  ;;  %v4360_v0 = vsel %vm8932_vm5, %v4355_v43, %v4359_v35 }
 0x3a8   : > { %7309 = vmatmul.mubr.bf16.gmra.mrb[24].mxu1 %v8051_v50  ;;  %v4395_v50 = vshll.u32 %v9847_v22, 16 }
 0x3a9   : > { %7325 = vmatpush3.bf16.msra.mxu1 %v8052_v47  ;;  %7312 = vmatprep.mubr.bf16.mxu1 %v8054_v5  ;;  %v8060_v47 = vld [vmem:[#allocation9 + $0x130] sm:$0xff]   ;;  %v4364_v5 = vrot.slane %v4362_v12, 4 }
 0x3aa   : > { %7326 = vmatprep.subr.bf16.mxu1 %v8053_v6  ;;  %v9871_v4 = vrot.slane %v4395_v50, 5  ;;  %v4443_v50 = vshll.u32 %v9880_v24, 16 }
 0x3ac   : > { %v4402_v45 = vor.u32 %v4401_v11, %v9871_v4  ;;  %v9894_v11 = vld [vmem:[#allocation2 + $0x64] sm:$0xf]  ;;  %v4445_v27 = vrot.slane %v4443_v50, 5  ;;  %v8065_v50 = vld [vmem:[#allocation9 + $0x158] sm:$0xff]  }
 0x3ad   : > { %7327 = vmatpush3.bf16.msra.mxu1 %v8053_v6  ;;  %v4367_v6 = vrot.slane %v4365_v37, 5  ;;  %v4471_v55 = vshrl.u32 %v9894_v11, 16 }
 0x3ae   : > { %7328 = vmatprep.subr.bf16.mxu1 %v8056_v62 }
 0x3af   : > { %v4368_v56 = vor.u32 %v4367_v6, %v4364_v5  ;;  %v4403_v5 = vrot.slane %v4402_v45, 4  ;;  %v4415_v6 = vrot.slane %v4413_v58, 5  ;;  %v8064_v58 = vld [vmem:[#allocation9 + $0x150] sm:$0xff]  }
 0x3b0   : > { %7313 = vmatmul.mubr.bf16.gmra.mrb[28].mxu1 %v8055_v36  ;;  %v4336_v36 = vsel %vm8932_vm5, %v4331_v44, %v4335_v38  ;;  %v4379_v44 = vrot.slane %v4378_v39, 4 }
 0x3b1   : > { %7329 = vmatpush3.bf16.msra.mxu1 %v8056_v62  ;;  %7316 = vmatprep.mubr.bf16.mxu1 %v8058_v23  ;;  %v4345_v62 = vrot.slane %v4344_v52, 4  ;;  %v9875_v23 = vld [vmem:[#allocation2 + $0x4c] sm:$0xf]  ;;  %v4369_v51 = vrot.slane %v4368_v56, 4  ;;  %v4407_v52 = vrot.slane %v4405_v59, 5  ;;  %v4416_v59 = vor.u32 %v4415_v6, %v4412_v28 }
 0x3b2   : > { %7330 = vmatprep.subr.bf16.mxu1 %v8057_v41  ;;  %v4419_v38 = vshll.u32 %v9875_v23, 16  ;;  %v4423_v12 = vshrl.u32 %v9875_v23, 16  ;;  %v4384_v43 = vsel %vm8932_vm5, %v4379_v44, %v4383_v29  ;;  %v9902_v56 = vld [vmem:[#allocation2 + $0x5c] sm:$0x1]  ;;  %v4473_v29 = vrot.slane %v4471_v55, 4 }
 0x3b3   : > { %v4350_v37 = vsel %vm8932_vm5, %v4345_v62, %v9845_v21  ;;  %v9892_v21 = vld [vmem:[#allocation2 + $0x50] sm:$0x1]  ;;  %v4374_v62 = vsel %vm8932_vm5, %v4369_v51, %v9864_v8  ;;  %v4408_v25 = vsel %vm8932_vm5, %v4403_v5, %v4407_v52  ;;  %v9912_v52 = vld [vmem:[#allocation2 + $0x68] sm:$0x1] }
 0x3b4   : > { %v4421_v34 = vrot.slane %v4419_v38, 5  ;;  %v4425_v30 = vrot.slane %v4423_v12, 4  ;;  %v6438_v61 = vcombine.low %v4350_v37, %v4360_v0  ;;  %v4429_v35 = vshll.u32 %v9892_v21, 16 }
 0x3b5   : > { %7331 = vmatpush3.bf16.msra.mxu1 %v8057_v41  ;;  %v6437_v41 = vcombine.low %v4326_v9, %v4336_v36  ;;  %v4286_v9 = vld [vmem:[#allocation2 + $0x60] sm:$0xf]  ;;  %v4449_v36 = vrot.slane %v4447_v7, 4  ;;  %v4453_v38 = vshll.u32 %v9902_v56, 16  ;;  %v4417_v37 = vrot.slane %v4416_v59, 4 }
 0x3b6   : > { %7332 = vmatprep.subr.bf16.mxu1 %v8060_v47  ;;  %v4426_v14 = vor.u32 %v4425_v30, %v4421_v34  ;;  %v4458_v8 = vshrl.u32 %v4286_v9, 16  ;;  %v4461_v39 = vshll.u32 %v4286_v9, 16  ;;  %v4477_v30 = vshll.u32 %v9912_v52, 16 }
 0x3b7   : > { %v4450_v45 = vor.u32 %v4449_v36, %v4445_v27  ;;  %v4422_v28 = vsel %vm8932_vm5, %v4417_v37, %v4421_v34  ;;  %v4725_v9 = vrot.slane %v9819_v46, 5  ;;  %v4691_v34 = vld [vmem:[#allocation2 + $0xc] sm:$0xe] }
 0x3b8   : > { %7317 = vmatmul.mubr.bf16.gmra.mrb[32].mxu1 %v8059_v15  ;;  %v4436_v15 = vrot.slane %v4434_v54, 4  ;;  %v4427_v0 = vrot.slane %v4426_v14, 4  ;;  %v4431_v54 = vrot.slane %v4429_v35, 5  ;;  %v6452_v59 = vrot.slane %v4691_v34, 9 }
 0x3b9   : > { %7333 = vmatpush3.bf16.msra.mxu1 %v8060_v47  ;;  %7336 = vmatprep.mubr.bf16.mxu1 %v6436_v19  ;;  %v4393_v47 = vrot.slane %v4392_v32, 4  ;;  %v4439_v19 = vrot.slane %v4437_v60, 5  ;;  %v4467_v32 = vshll.u32 %v9894_v11, 16  ;;  %v4460_v60 = vrot.slane %v4458_v8, 4 }
 0x3ba   : > { %7334 = vmatprep.subr.bf16.mxu1 %v8061_v13  ;;  %v4451_v44 = vrot.slane %v4450_v45, 4  ;;  %v4727_v14 = vrot.slane %v4725_v9, 4  ;;  %v4728_v8 = vrot.slane %v9825_v20, 5  ;;  %v4726_v55 = vsel %vm8830_vm2, %v6452_v59, %v4725_v9  ;;  %v4692_v20 = vld [vmem:[#allocation2 + $0x18] sm:$0xe] }
 0x3bb   : > { %v4469_v51 = vrot.slane %v4467_v32, 5  ;;  %v8068_v32 = vld [vmem:[#allocation9 + $0x170] sm:$0xff]   ;;  %v4693_v45 = vld [vmem:[#allocation2 + $0x24] sm:$0xe]  ;;  %v4760_v34 = vrot.slane %v9875_v23, 5  ;;  %v8073_v23 = vld [vmem:[#allocation9 + $0x198] sm:$0xff]  }
 0x3bd   : > { %7335 = vmatpush3.bf16.msra.mxu1 %v8061_v13  ;;  %v4398_v13 = vsel %vm8932_vm5, %v4393_v47, %v9871_v4  ;;  %v6439_v4 = vcombine.low %v4374_v62, %v4384_v43  ;;  %v4455_v47 = vrot.slane %v4453_v38, 5  ;;  %v4474_v6 = vor.u32 %v4473_v29, %v4469_v51 }
 0x3be   : > { %7352 = vmatprep.subr.bf16.mxu1 %v8062_v57  ;;  %v6440_v12 = vcombine.low %v4398_v13, %v4408_v25  ;;  %v4479_v13 = vrot.slane %v4477_v30, 5  ;;  %v8067_v25 = vld [vmem:[#allocation9 + $0x168] sm:$0xff]   ;;  %v4746_v29 = vrot.slane %v9843_v2, 5  ;;  %v4749_v30 = vrot.slane %v9862_v17, 5 }
 0x3bf   : > { %v4475_v35 = vrot.slane %v4474_v6, 4  ;;  %v8071_v2 = vld [vmem:[#allocation9 + $0x188] sm:$0xff]  }
 0x3c0   : > { %7337 = vmatmul.mubr.bf16.vlgmr.msra.gmra.mrb[20].mxu1 %v6437_v41  ;;  %v4440_v41 = vor.u32 %v4439_v19, %v4436_v15  ;;  %v4456_v19 = vsel %vm8932_vm5, %v4451_v44, %v4455_v47  ;;  %v4753_v44 = vrot.slane %v9847_v22, 5  ;;  %v4695_v47 = vld [vmem:[#allocation2 + $0x3c] sm:$0xe]  ;;  %v4748_v6 = vrot.slane %v4746_v29, 4 }
 0x3c1   : > { %7353 = vmatpush3.bf16.msra.mxu1 %v8062_v57  ;;  %7340 = vmatprep.mubr.bf16.mxu1 %v6438_v61  ;;  %v4463_v57 = vrot.slane %v4461_v39, 5  ;;  %v8066_v61 = vld [vmem:[#allocation9 + $0x160] sm:$0xff]   ;;  %v4480_v46 = vsel %vm8932_vm5, %v4475_v35, %v4479_v13  ;;  %v4732_v39 = vrot.slane %v9823_v18, 5  ;;  %v8069_v18 = vld [vmem:[#allocation9 + $0x178] sm:$0xff]  }
 0x3c2   : > { %7354 = vmatprep.subr.bf16.mxu1 %v8063_v42  ;;  %v4441_v7 = vrot.slane %v4440_v41, 4  ;;  %v4739_v41 = vrot.slane %v9831_v26, 5  ;;  %v4750_v9 = vsel %vm8830_vm2, %v4748_v6, %v4749_v30  ;;  %v4697_v35 = vld [vmem:[#allocation2 + $0x54] sm:$0xe] }
 0x3c3   : > { %v4464_v5 = vor.u32 %v4463_v57, %v4460_v60  ;;  %v4734_v37 = vrot.slane %v4732_v39, 4  ;;  %v4742_v57 = vrot.slane %v9852_v1, 5  ;;  %v4694_v1 = vld [vmem:[#allocation2 + $0x30] sm:$0xe] }
 0x3c4   : > { %v4446_v15 = vsel %vm8932_vm5, %v4441_v7, %v4445_v27  ;;  %v4741_v60 = vrot.slane %v4739_v41, 4 }
 0x3c5   : > { %7355 = vmatpush3.bf16.msra.mxu1 %v8063_v42  ;;  %v4432_v42 = vsel %vm8932_vm5, %v4427_v0, %v4431_v54  ;;  %v6442_v62 = vcombine.low %v4446_v15, %v4456_v19  ;;  %v4465_v43 = vrot.slane %v4464_v5, 4  ;;  %v4735_v0 = vrot.slane %v9835_v53, 5 }
 0x3c6   : > { %7356 = vmatprep.subr.bf16.mxu1 %v8064_v58  ;;  %v6441_v36 = vcombine.low %v4422_v28, %v4432_v42  ;;  %v6454_v54 = vrot.slane %v4693_v45, 9  ;;  %v4743_v7 = vsel %vm8830_vm2, %v4741_v60, %v4742_v57  ;;  %v6455_v5 = vrot.slane %v4694_v1, 9  ;;  %v8078_v60 = vld [vmem:[#allocation2 + $0x18] sm:$0xff]  }
 0x3c7   : > { %v4470_v27 = vsel %vm8932_vm5, %v4465_v43, %v4469_v51  ;;  %v4736_v51 = vsel %vm8830_vm2, %v4734_v37, %v4735_v0  ;;  %v4755_v15 = vrot.slane %v4753_v44, 4  ;;  %v4756_v19 = vrot.slane %v9866_v31, 5  ;;  %v4696_v31 = vld [vmem:[#allocation2 + $0x48] sm:$0xe]  ;;  %v8077_v57 = vld [vmem:[#allocation9 + $0x1b8] sm:$0xff]  }
 0x3c8   : > { %7341 = vmatmul.mubr.bf16.gmra.mrb[24].mxu1 %v6439_v4  ;;  %v6443_v38 = vcombine.low %v4470_v27, %v4480_v46  ;;  %v4740_v53 = vsel %vm8830_vm2, %v6454_v54, %v4739_v41  ;;  %v4747_v22 = vsel %vm8830_vm2, %v6455_v5, %v4746_v29  ;;  %v4767_v43 = vrot.slane %v9880_v24, 5  ;;  %v8075_v37 = vld [vmem:[#allocation9 + $0x1a8] sm:$0xff]   ;;  %v9975_v29 = vld [vmem:[#allocation2 + $0x1c] sm:$0xf]  ;;  %v8084_v5 = vld [vmem:[#allocation9 + $0x1d0] sm:$0xff]  }
 0x3c9   : > { %7357 = vmatpush3.bf16.msra.mxu1 %v8064_v58  ;;  %7344 = vmatprep.mubr.bf16.mxu1 %v6440_v12  ;;  %v4729_v58 = vsel %vm8830_vm2, %v4727_v14, %v4728_v8  ;;  %v6453_v12 = vrot.slane %v4692_v20, 9  ;;  %v6462_v42 = vcombine.low %v4740_v53, %v4743_v7  ;;  %v6463_v13 = vcombine.low %v4747_v22, %v4750_v9  ;;  %v8081_v53 = vld [vmem:[#allocation9 + $0x1c8] sm:$0xff]  }
 0x3ca   : > { %7358 = vmatprep.subr.bf16.mxu1 %v8065_v50  ;;  %v6460_v4 = vcombine.low %v4726_v55, %v4729_v58  ;;  %v6457_v59 = vrot.slane %v4696_v31, 9  ;;  %v4762_v14 = vrot.slane %v4760_v34, 4  ;;  %v4763_v8 = vrot.slane %v9892_v21, 5  ;;  %v8074_v58 = vld [vmem:[#allocation9 + $0x1a0] sm:$0xff]   ;;  %v5238_v31 = vld [vmem:[#allocation2 + $0x30] sm:$0xf] }
 0x3cb   : > { %v4733_v26 = vsel %vm8830_vm2, %v6453_v12, %v4732_v39  ;;  %v6458_v27 = vrot.slane %v4697_v35, 9  ;;  %v4769_v46 = vrot.slane %v4767_v43, 4  ;;  %v4770_v39 = vrot.slane %v9902_v56, 5  ;;  %v4698_v56 = vld [vmem:[#allocation2 + $0x60] sm:$0xe] }
 0x3cc   : > { %v6461_v28 = vcombine.low %v4733_v26, %v4736_v51  ;;  %v4761_v24 = vsel %vm8830_vm2, %v6457_v59, %v4760_v34  ;;  %v4774_v55 = vrot.slane %v9894_v11, 5  ;;  %v4777_v12 = vrot.slane %v9912_v52, 5  ;;  %v8080_v52 = vld [vmem:[#allocation9 + $0x1c0] sm:$0xff]   ;;  %v8079_v51 = vld [vmem:[#allocation2 + $0x24] sm:$0xff]   ;;  %v9989_v59 = vld [vmem:[#allocation2 + $0x34] sm:$0xf] }
 0x3cd   : > { %7359 = vmatpush3.bf16.msra.mxu1 %v8065_v50  ;;  %v8070_v50 = vld [vmem:[#allocation9 + $0x180] sm:$0xff]   ;;  %v4768_v21 = vsel %vm8830_vm2, %v6458_v27, %v4767_v43  ;;  %v4771_v20 = vsel %vm8830_vm2, %v4769_v46, %v4770_v39  ;;  %v9993_v27 = vld [vmem:[#allocation2 + $0x2c] sm:$0x1]  ;;  %v5305_v46 = vshrl.u32 %v5238_v31, 16  ;;  %v5308_v39 = vshll.u32 %v5238_v31, 16 }
 0x3ce   : > { %7360 = vmatprep.subr.bf16.mxu1 %v8066_v61  ;;  %v6466_v45 = vcombine.low %v4768_v21, %v4771_v20  ;;  %v5232_v26 = vld [vmem:[#allocation2 + $0x18] sm:$0xf]  ;;  %v8083_v34 = vld [vmem:[#allocation2 + $0x3c] sm:$0xff]  }
 0x3cf   : > { %v5257_v7 = vshrl.u32 %v5232_v26, 16  ;;  %v5260_v1 = vshll.u32 %v5232_v26, 16 }
 0x3d0   : > { %7345 = vmatmul.mubr.bf16.gmra.mrb[28].mxu1 %v6441_v36  ;;  %v8072_v36 = vld [vmem:[#allocation9 + $0x190] sm:$0xff]  }
 0x3d1   : > { %7361 = vmatpush3.bf16.msra.mxu1 %v8066_v61  ;;  %7348 = vmatprep.mubr.bf16.mxu1 %v6442_v62  ;;  %v6456_v61 = vrot.slane %v4695_v47, 9  ;;  %v4757_v62 = vsel %vm8830_vm2, %v4755_v15, %v4756_v19  ;;  %v5270_v47 = vshrl.u32 %v9975_v29, 16  ;;  %v5259_v15 = vrot.slane %v5257_v7, 4 }
 0x3d2   : > { %7362 = vmatprep.subr.bf16.mxu1 %v8067_v25  ;;  %v5262_v19 = vrot.slane %v5260_v1, 5 }
 0x3d3   : > { %v4754_v17 = vsel %vm8830_vm2, %v6456_v61, %v4753_v44  ;;  %v5266_v44 = vshll.u32 %v9975_v29, 16  ;;  %v5272_v9 = vrot.slane %v5270_v47, 4 }
 0x3d5   : > { %7363 = vmatpush3.bf16.msra.mxu1 %v8067_v25  ;;  %v6464_v25 = vcombine.low %v4754_v17, %v4757_v62  ;;  %v9983_v22 = vrot.slane %v5266_v44, 5  ;;  %v8085_v17 = vld [vmem:[#allocation9 + $0x1d8] sm:$0xff]   ;;  %v8086_v62 = vld [vmem:[#allocation2 + $0x48] sm:$0xff]  }
 0x3d6   : > { %7364 = vmatprep.subr.bf16.mxu1 %v8068_v32 }
 0x3d8   : > { %7349 = vmatmul.mubr.bf16.gmra.mrb[32].mxu1 %v6443_v38  ;;  %v6459_v38 = vrot.slane %v4698_v56, 9  ;;  %v5300_v56 = vshll.u32 %v9993_v27, 16 }
 0x3d9   : > { %7365 = vmatpush3.bf16.msra.mxu1 %v8068_v32  ;;  %7368 = vmatprep.mubr.bf16.mxu1 %v6460_v4  ;;  %v4764_v32 = vsel %vm8830_vm2, %v4762_v14, %v4763_v8  ;;  %v4776_v4 = vrot.slane %v4774_v55, 4  ;;  %v5263_v14 = vor.u32 %v5262_v19, %v5259_v15  ;;  %v5273_v8 = vor.u32 %v5272_v9, %v9983_v22 }
 0x3da   : > { %7366 = vmatprep.subr.bf16.mxu1 %v8069_v18  ;;  %v6465_v41 = vcombine.low %v4761_v24, %v4764_v32  ;;  %v4775_v11 = vsel %vm8830_vm2, %v6459_v38, %v4774_v55  ;;  %v5314_v24 = vshll.u32 %v9989_v59, 16  ;;  %v5318_v32 = vshrl.u32 %v9989_v59, 16  ;;  %v8087_v55 = vld [vmem:[#allocation2 + $0x54] sm:$0xff]  }
 0x3db   : > { %v4778_v0 = vsel %vm8830_vm2, %v4776_v4, %v4777_v12  ;;  %v5264_v38 = vrot.slane %v5263_v14, 4  ;;  %v5274_v4 = vrot.slane %v5273_v8, 4  ;;  %v5302_v1 = vrot.slane %v5300_v56, 5 }
 0x3dc   : > { %v6467_v54 = vcombine.low %v4775_v11, %v4778_v0  ;;  %v5307_v11 = vrot.slane %v5305_v46, 4  ;;  %v5310_v0 = vrot.slane %v5308_v39, 5 }
 0x3dd   : > { %7367 = vmatpush3.bf16.msra.mxu1 %v8069_v18  ;;  %v8076_v18 = vld [vmem:[#allocation9 + $0x1b0] sm:$0xff]  }
 0x3de   : > { %7384 = vmatprep.subr.bf16.mxu1 %v8070_v50  ;;  %v5311_v19 = vor.u32 %v5310_v0, %v5307_v11 }
 0x3e0   : > { %7369 = vmatmul.mubr.bf16.vlgmr.msra.gmra.mrb[20].mxu1 %v6461_v28  ;;  %v5235_v28 = vld [vmem:[#allocation2 + $0x24] sm:$0xf] }
 0x3e1   : > { %7385 = vmatpush3.bf16.msra.mxu1 %v8070_v50  ;;  %7372 = vmatprep.mubr.bf16.mxu1 %v6462_v42  ;;  %v8082_v50 = vld [vmem:[#allocation2 + $0x30] sm:$0xff]   ;;  %v9979_v42 = vld [vmem:[#allocation2 + $0x28] sm:$0xf]  ;;  %v5281_v6 = vshrl.u32 %v5235_v28, 16  ;;  %v5284_v30 = vshll.u32 %v5235_v28, 16 }
 0x3e2   : > { %7386 = vmatprep.subr.bf16.mxu1 %v8071_v2  ;;  %v5294_v61 = vshrl.u32 %v9979_v42, 16 }
 0x3e3   : > { %v5283_v43 = vrot.slane %v5281_v6, 4  ;;  %v5286_v35 = vrot.slane %v5284_v30, 5  ;;  %v5269_v30 = vsel %vm8932_vm5, %v5264_v38, %v9983_v22 }
 0x3e5   : > { %7387 = vmatpush3.bf16.msra.mxu1 %v8071_v2  ;;  %v5290_v2 = vshll.u32 %v9979_v42, 16  ;;  %v5287_v21 = vor.u32 %v5286_v35, %v5283_v43  ;;  %v10023_v35 = vld [vmem:[#allocation2 + $0x44] sm:$0x1] }
 0x3e6   : > { %7388 = vmatprep.subr.bf16.mxu1 %v8072_v36  ;;  %v5348_v56 = vshll.u32 %v10023_v35, 16 }
 0x3e8   : > { %7373 = vmatmul.mubr.bf16.gmra.mrb[24].mxu1 %v6463_v13  ;;  %v9987_v13 = vrot.slane %v5290_v2, 5 }
 0x3e9   : > { %7389 = vmatpush3.bf16.msra.mxu1 %v8072_v36  ;;  %7376 = vmatprep.mubr.bf16.mxu1 %v6464_v25  ;;  %v9985_v36 = vld [vmem:[#allocation2 + $0x20] sm:$0x1]  ;;  %v5296_v25 = vrot.slane %v5294_v61, 4 }
 0x3ea   : > { %7390 = vmatprep.subr.bf16.mxu1 %v8073_v23 }
 0x3eb   : > { %v5297_v20 = vor.u32 %v5296_v25, %v9987_v13  ;;  %v8091_v25 = vld [vmem:[#allocation2 + $0x6c] sm:$0xff]  }
 0x3ed   : > { %7391 = vmatpush3.bf16.msra.mxu1 %v8073_v23  ;;  %v5276_v23 = vshll.u32 %v9985_v36, 16  ;;  %v5298_v7 = vrot.slane %v5297_v20, 4 }
 0x3ee   : > { %7392 = vmatprep.subr.bf16.mxu1 %v8074_v58 }
 0x3ef   : > { %v5278_v12 = vrot.slane %v5276_v23, 5  ;;  %v5303_v31 = vsel %vm8932_vm5, %v5298_v7, %v5302_v1 }
 0x3f0   : > { %7377 = vmatmul.mubr.bf16.gmra.mrb[28].mxu1 %v6465_v41  ;;  %v5241_v41 = vld [vmem:[#allocation2 + $0x3c] sm:$0xf] }
 0x3f1   : > { %7393 = vmatpush3.bf16.msra.mxu1 %v8074_v58  ;;  %7380 = vmatprep.mubr.bf16.mxu1 %v6466_v45  ;;  %v8088_v58 = vld [vmem:[#allocation9 + $0x1e0] sm:$0xff]   ;;  %v5332_v26 = vshll.u32 %v5241_v41, 16  ;;  %v5279_v2 = vsel %vm8932_vm5, %v5274_v4, %v5278_v12 }
 0x3f2   : > { %7394 = vmatprep.subr.bf16.mxu1 %v8075_v37  ;;  %v8090_v45 = vld [vmem:[#allocation2 + $0x60] sm:$0xff]   ;;  %v6492_v39 = vcombine.low %v5269_v30, %v5279_v2 }
 0x3f5   : > { %7395 = vmatpush3.bf16.msra.mxu1 %v8075_v37  ;;  %v9999_v37 = vld [vmem:[#allocation2 + $0x38] sm:$0x1] }
 0x3f6   : > { %7396 = vmatprep.subr.bf16.mxu1 %v8076_v18  ;;  %v5324_v44 = vshll.u32 %v9999_v37, 16 }
 0x3f8   : > { %7381 = vmatmul.mubr.bf16.gmra.mrb[32].mxu1 %v6467_v54  ;;  %v5244_v54 = vld [vmem:[#allocation2 + $0x48] sm:$0xf]  ;;  %v5326_v43 = vrot.slane %v5324_v44, 5 }
 0x3f9   : > { %7397 = vmatpush3.bf16.msra.mxu1 %v8076_v18  ;;  %7400 = vmatprep.mubr.bf16.mxu1 %v8078_v60  ;;  %v10001_v18 = vld [vmem:[#allocation2 + $0x40] sm:$0xf]  ;;  %v10003_v60 = vrot.slane %v5314_v24, 5  ;;  %v5356_v6 = vshll.u32 %v5244_v54, 16  ;;  %v10027_v24 = vld [vmem:[#allocation2 + $0x50] sm:$0x1] }
 0x3fa   : > { %7398 = vmatprep.subr.bf16.mxu1 %v8077_v57  ;;  %v5338_v47 = vshll.u32 %v10001_v18, 16  ;;  %v5342_v28 = vshrl.u32 %v10001_v18, 16  ;;  %v5372_v11 = vshll.u32 %v10027_v24, 16 }
 0x3fb   : > { %v5358_v46 = vrot.slane %v5356_v6, 5 }
 0x3fc   : > { %v10025_v14 = vrot.slane %v5338_v47, 5  ;;  %v5344_v8 = vrot.slane %v5342_v28, 4  ;;  %v5350_v47 = vrot.slane %v5348_v56, 5  ;;  %v8094_v28 = vld [vmem:[#allocation9 + $0x200] sm:$0xff]  }
 0x3fd   : > { %7399 = vmatpush3.bf16.msra.mxu1 %v8077_v57  ;;  %v5320_v57 = vrot.slane %v5318_v32, 4 }
 0x3fe   : > { %7416 = vmatprep.subr.bf16.mxu1 %v8080_v52  ;;  %v5345_v4 = vor.u32 %v5344_v8, %v10025_v14 }
 0x3ff   : > { %v5321_v9 = vor.u32 %v5320_v57, %v10003_v60  ;;  %v10036_v57 = vld [vmem:[#allocation2 + $0x64] sm:$0xf] }
 0x400   : > { %7401 = vmatmul.mubr.bf16.vlgmr.msra.gmra.mrb[20].mxu1 %v8079_v51  ;;  %v10005_v51 = vld [vmem:[#allocation2 + $0x4c] sm:$0xf]  ;;  %v5410_v30 = vshll.u32 %v10036_v57, 16  ;;  %v5414_v2 = vshrl.u32 %v10036_v57, 16 }
 0x401   : > { %7417 = vmatpush3.bf16.msra.mxu1 %v8080_v52  ;;  %7404 = vmatprep.mubr.bf16.mxu1 %v8082_v50  ;;  %v5329_v52 = vshrl.u32 %v5241_v41, 16  ;;  %v8089_v50 = vld [vmem:[#allocation9 + $0x1e8] sm:$0xff]   ;;  %v5362_v61 = vshll.u32 %v10005_v51, 16  ;;  %v5366_v15 = vshrl.u32 %v10005_v51, 16  ;;  %v10032_v41 = vld [vmem:[#allocation2 + $0x58] sm:$0xf] }
 0x402   : > { %7418 = vmatprep.subr.bf16.mxu1 %v8081_v53 }
 0x403   : > { %v10029_v32 = vrot.slane %v5362_v61, 5  ;;  %v5346_v61 = vrot.slane %v5345_v4, 4 }
 0x405   : > { %7419 = vmatpush3.bf16.msra.mxu1 %v8081_v53  ;;  %v5288_v53 = vrot.slane %v5287_v21, 4  ;;  %v5322_v21 = vrot.slane %v5321_v9, 4 }
 0x406   : > { %7420 = vmatprep.subr.bf16.mxu1 %v8084_v5 }
 0x407   : > { %v5293_v22 = vsel %vm8932_vm5, %v5288_v53, %v9987_v13  ;;  %v5312_v13 = vrot.slane %v5311_v19, 4  ;;  %v5390_v53 = vshrl.u32 %v10032_v41, 16  ;;  %v5327_v1 = vsel %vm8932_vm5, %v5322_v21, %v5326_v43 }
 0x408   : > { %7405 = vmatmul.mubr.bf16.gmra.mrb[24].mxu1 %v8083_v34  ;;  %v5331_v34 = vrot.slane %v5329_v52, 4  ;;  %v6493_v38 = vcombine.low %v5293_v22, %v5303_v31  ;;  %v5374_v19 = vrot.slane %v5372_v11, 5  ;;  %v8095_v31 = vld [vmem:[#allocation9 + $0x208] sm:$0xff]  }
 0x409   : > { %7421 = vmatpush3.bf16.msra.mxu1 %v8084_v5  ;;  %7408 = vmatprep.mubr.bf16.mxu1 %v8086_v62  ;;  %v5353_v5 = vshrl.u32 %v5244_v54, 16  ;;  %v8092_v62 = vld [vmem:[#allocation9 + $0x1f0] sm:$0xff]   ;;  %v5250_v54 = vld [vmem:[#allocation2 + $0x60] sm:$0xf]  ;;  %v5317_v7 = vsel %vm8932_vm5, %v5312_v13, %v10003_v60  ;;  %v5392_v22 = vrot.slane %v5390_v53, 4  ;;  %v5351_v13 = vsel %vm8932_vm5, %v5346_v61, %v5350_v47 }
 0x40a   : > { %7422 = vmatprep.subr.bf16.mxu1 %v8085_v17  ;;  %v5404_v6 = vshll.u32 %v5250_v54, 16  ;;  %v6494_v43 = vcombine.low %v5317_v7, %v5327_v1 }
 0x40b   : > { %v5355_v23 = vrot.slane %v5353_v5, 4  ;;  %v5401_v5 = vshrl.u32 %v5250_v54, 16 }
 0x40d   : > { %7423 = vmatpush3.bf16.msra.mxu1 %v8085_v17  ;;  %v5334_v17 = vrot.slane %v5332_v26, 5  ;;  %v5359_v12 = vor.u32 %v5358_v46, %v5355_v23  ;;  %v5403_v8 = vrot.slane %v5401_v5, 4  ;;  %v5406_v23 = vrot.slane %v5404_v6, 5 }
 0x40e   : > { %7424 = vmatprep.subr.bf16.mxu1 %v8088_v58  ;;  %v5412_v46 = vrot.slane %v5410_v30, 5  ;;  %v8097_v30 = vld [vmem:[#allocation9 + $0x218] sm:$0xff]  }
 0x40f   : > { %v5335_v20 = vor.u32 %v5334_v17, %v5331_v34  ;;  %v10048_v17 = vld [vmem:[#allocation2 + $0x5c] sm:$0x1] }
 0x410   : > { %7409 = vmatmul.mubr.bf16.gmra.mrb[28].mxu1 %v8087_v55  ;;  %v5368_v55 = vrot.slane %v5366_v15, 4  ;;  %v5360_v15 = vrot.slane %v5359_v12, 4  ;;  %v5396_v21 = vshll.u32 %v10048_v17, 16 }
 0x411   : > { %7425 = vmatpush3.bf16.msra.mxu1 %v8088_v58  ;;  %7412 = vmatprep.mubr.bf16.mxu1 %v8090_v45  ;;  %v5247_v58 = vld [vmem:[#allocation2 + $0x54] sm:$0xf]  ;;  %v5336_v44 = vrot.slane %v5335_v20, 4  ;;  %v10060_v20 = vld [vmem:[#allocation2 + $0x68] sm:$0x1] }
 0x412   : > { %7426 = vmatprep.subr.bf16.mxu1 %v8089_v50  ;;  %v8093_v45 = vld [vmem:[#allocation9 + $0x1f8] sm:$0xff]   ;;  %v5377_v0 = vshrl.u32 %v5247_v58, 16  ;;  %v5369_v52 = vor.u32 %v5368_v55, %v10029_v32  ;;  %v5380_v26 = vshll.u32 %v5247_v58, 16  ;;  %v5365_v56 = vsel %vm8932_vm5, %v5360_v15, %v10029_v32 }
 0x413   : > { %v10052_v55 = vld [vmem:[#allocation2 + $0x70] sm:$0xf]  ;;  %v5341_v58 = vsel %vm8932_vm5, %v5336_v44, %v10025_v14  ;;  %v5420_v32 = vshll.u32 %v10060_v20, 16  ;;  %v5398_v44 = vrot.slane %v5396_v21, 5 }
 0x414   : > { %v5379_v9 = vrot.slane %v5377_v0, 4  ;;  %v5370_v34 = vrot.slane %v5369_v52, 4  ;;  %v5382_v60 = vrot.slane %v5380_v26, 5  ;;  %v5434_v0 = vshll.u32 %v10052_v55, 16 }
 0x415   : > { %7427 = vmatpush3.bf16.msra.mxu1 %v8089_v50  ;;  %v5386_v50 = vshll.u32 %v10032_v41, 16  ;;  %v5438_v54 = vshrl.u32 %v10052_v55, 16  ;;  %v5407_v52 = vor.u32 %v5406_v23, %v5403_v8  ;;  %v5422_v15 = vrot.slane %v5420_v32, 5 }
 0x416   : > { %7428 = vmatprep.subr.bf16.mxu1 %v8092_v62  ;;  %v5383_v4 = vor.u32 %v5382_v60, %v5379_v9  ;;  %v5436_v5 = vrot.slane %v5434_v0, 5  ;;  %v5692_v23 = vrot.slane %v9975_v29, 5  ;;  %v8100_v0 = vld [vmem:[#allocation9 + $0x230] sm:$0xff]  }
 0x417   : > { %v5440_v6 = vrot.slane %v5438_v54, 4 }
 0x418   : > { %7413 = vmatmul.mubr.bf16.gmra.mrb[32].mxu1 %v8091_v25  ;;  %v5253_v25 = vld [vmem:[#allocation2 + $0x6c] sm:$0xf]  ;;  %v5384_v7 = vrot.slane %v5383_v4, 4 }
 0x419   : > { %7429 = vmatpush3.bf16.msra.mxu1 %v8092_v62  ;;  %7432 = vmatprep.mubr.bf16.mxu1 %v6492_v39  ;;  %v10050_v62 = vrot.slane %v5386_v50, 5  ;;  %v5416_v39 = vrot.slane %v5414_v2, 4  ;;  %v5425_v14 = vshrl.u32 %v5253_v25, 16  ;;  %v5428_v11 = vshll.u32 %v5253_v25, 16 }
 0x41a   : > { %7430 = vmatprep.subr.bf16.mxu1 %v8093_v45  ;;  %v6495_v50 = vcombine.low %v5341_v58, %v5351_v13  ;;  %v5408_v2 = vrot.slane %v5407_v52, 4  ;;  %v5706_v52 = vrot.slane %v9989_v59, 5 }
 0x41b   : > { %v5393_v12 = vor.u32 %v5392_v22, %v10050_v62  ;;  %v5417_v26 = vor.u32 %v5416_v39, %v5412_v46  ;;  %v5427_v47 = vrot.slane %v5425_v14, 4  ;;  %v5389_v9 = vsel %vm8932_vm5, %v5384_v7, %v10050_v62  ;;  %v5658_v62 = vld [vmem:[#allocation2 + $0x18] sm:$0xe] }
 0x41c   : > { %v5441_v22 = vor.u32 %v5440_v6, %v5436_v5  ;;  %v5413_v25 = vsel %vm8932_vm5, %v5408_v2, %v5412_v46  ;;  %v6508_v4 = vrot.slane %v5658_v62, 9  ;;  %v5695_v14 = vrot.slane %v9985_v36, 5  ;;  %v5659_v36 = vld [vmem:[#allocation2 + $0x24] sm:$0xe]  ;;  %v5662_v2 = vld [vmem:[#allocation2 + $0x48] sm:$0xe] }
 0x41d   : > { %7431 = vmatpush3.bf16.msra.mxu1 %v8093_v45  ;;  %v5375_v45 = vsel %vm8932_vm5, %v5370_v34, %v5374_v19  ;;  %v5394_v1 = vrot.slane %v5393_v12, 4  ;;  %v5418_v61 = vrot.slane %v5417_v26, 4  ;;  %v10071_v19 = vld [vmem:[#allocation2 + $0x74] sm:$0x1]  ;;  %v5694_v12 = vrot.slane %v5692_v23, 4 }
 0x41e   : > { %7448 = vmatprep.subr.bf16.mxu1 %v8094_v28  ;;  %v6496_v53 = vcombine.low %v5365_v56, %v5375_v45  ;;  %v5442_v21 = vrot.slane %v5441_v22, 4  ;;  %v8099_v45 = vld [vmem:[#allocation9 + $0x228] sm:$0xff]   ;;  %v5693_v54 = vsel %vm8830_vm2, %v6508_v4, %v5692_v23  ;;  %v5660_v26 = vld [vmem:[#allocation2 + $0x30] sm:$0xe]  ;;  %v5702_v7 = vrot.slane %v9993_v27, 5 }
 0x41f   : > { %v5399_v34 = vsel %vm8932_vm5, %v5394_v1, %v5398_v44  ;;  %v5423_v8 = vsel %vm8932_vm5, %v5418_v61, %v5422_v15  ;;  %v6510_v1 = vrot.slane %v5660_v26, 9  ;;  %v5708_v44 = vrot.slane %v5706_v52, 4  ;;  %v5663_v23 = vld [vmem:[#allocation2 + $0x54] sm:$0xe]  ;;  %v10135_v26 = vld [vmem:[#allocation11] ss:$0 sm:$0xff] }
 0x420   : > { %7433 = vmatmul.mubr.bf16.vlgmr.msra.gmra.mrb[20].mxu1 %v6493_v38  ;;  %v8096_v38 = vld [vmem:[#allocation9 + $0x210] sm:$0xff]   ;;  %v6497_v39 = vcombine.low %v5389_v9, %v5399_v34  ;;  %v6498_v58 = vcombine.low %v5413_v25, %v5423_v8  ;;  %v6512_v22 = vrot.slane %v5662_v2, 9  ;;  %v5727_v25 = vrot.slane %v10032_v41, 5 }
 0x421   : > { %7449 = vmatpush3.bf16.msra.mxu1 %v8094_v28  ;;  %7436 = vmatprep.mubr.bf16.mxu1 %v6494_v43  ;;  %v5430_v28 = vrot.slane %v5428_v11, 5  ;;  %v8098_v43 = vld [vmem:[#allocation9 + $0x220] sm:$0xff]   ;;  %v5699_v11 = vrot.slane %v9979_v42, 5  ;;  %v8101_v42 = vld [vmem:[#allocation9 + $0x238] sm:$0xff]   ;;  %v5707_v27 = vsel %vm8830_vm2, %v6510_v1, %v5706_v52  ;;  %v5734_v62 = vrot.slane %v10036_v57, 5 }
 0x422   : > { %7450 = vmatprep.subr.bf16.mxu1 %v8095_v31  ;;  %v5737_v41 = vrot.slane %v10060_v20, 5  ;;  %v5741_v57 = vrot.slane %v10052_v55, 5 }
 0x423   : > { %v5431_v60 = vor.u32 %v5430_v28, %v5427_v47  ;;  %v5701_v16 = vrot.slane %v5699_v11, 4  ;;  %v5709_v47 = vrot.slane %v9999_v37, 5  ;;  %v5720_v37 = vrot.slane %v10005_v51, 5 }
 0x424   : > { %v5736_v4 = vrot.slane %v5734_v62, 4 }
 0x425   : > { %7451 = vmatpush3.bf16.msra.mxu1 %v8095_v31  ;;  %v5444_v31 = vshll.u32 %v10071_v19, 16  ;;  %v5432_v13 = vrot.slane %v5431_v60, 4  ;;  %v5703_v28 = vsel %vm8830_vm2, %v5701_v16, %v5702_v7  ;;  %v5710_v6 = vsel %vm8830_vm2, %v5708_v44, %v5709_v47  ;;  %v10364_v7 = vld [vmem:[#allocation23_spill] sm:$0xff]  ;;  %v10365_v44 = vld [vmem:[#allocation22_spill] sm:$0xff] }
 0x426   : > { %7452 = vmatprep.subr.bf16.mxu1 %v8096_v38  ;;  %v6518_v15 = vcombine.low %v5707_v27, %v5710_v6  ;;  %v5716_v60 = vrot.slane %v10023_v35, 5  ;;  %v5721_v8 = vsel %vm8830_vm2, %v6512_v22, %v5720_v37  ;;  %v5996_v47 = vunpack.c.l.bf16 %v10365_v44 }
 0x427   : > { %v5446_v56 = vrot.slane %v5444_v31, 5  ;;  %v5437_v46 = vsel %vm8932_vm5, %v5432_v13, %v5436_v5  ;;  %v5713_v5 = vrot.slane %v10001_v18, 5  ;;  %v5722_v18 = vrot.slane %v5720_v37, 4 }
 0x428   : > { %7437 = vmatmul.mubr.bf16.gmra.mrb[24].mxu1 %v6495_v50  ;;  %v5723_v31 = vrot.slane %v10027_v24, 5  ;;  %v5664_v24 = vld [vmem:[#allocation2 + $0x60] sm:$0xe]  ;;  %v6513_v13 = vrot.slane %v5663_v23, 9 }
 0x429   : > { %7453 = vmatpush3.bf16.msra.mxu1 %v8096_v38  ;;  %7440 = vmatprep.mubr.bf16.mxu1 %v6496_v53  ;;  %v5447_v29 = vsel %vm8932_vm5, %v5442_v21, %v5446_v56  ;;  %v5696_v38 = vsel %vm8830_vm2, %v5694_v12, %v5695_v14  ;;  %v6509_v53 = vrot.slane %v5659_v36, 9  ;;  %v5715_v34 = vrot.slane %v5713_v5, 4 }
 0x42a   : > { %7454 = vmatprep.subr.bf16.mxu1 %v8097_v30  ;;  %v6499_v32 = vcombine.low %v5437_v46, %v5447_v29  ;;  %v6516_v50 = vcombine.low %v5693_v54, %v5696_v38  ;;  %v5724_v35 = vsel %vm8830_vm2, %v5722_v18, %v5723_v31  ;;  %v5729_v21 = vrot.slane %v5727_v25, 4  ;;  %v5665_v29 = vld [vmem:[#allocation2 + $0x6c] sm:$0xe] }
 0x42b   : > { %v5700_v59 = vsel %vm8830_vm2, %v6509_v53, %v5699_v11  ;;  %v5717_v51 = vsel %vm8830_vm2, %v5715_v34, %v5716_v60  ;;  %v5730_v56 = vrot.slane %v10048_v17, 5  ;;  %v5728_v12 = vsel %vm8830_vm2, %v6513_v13, %v5727_v25  ;;  %v10367_v60 = vld [vmem:[#allocation24_spill] sm:$0xff] }
 0x42c   : > { %v6517_v61 = vcombine.low %v5700_v59, %v5703_v28  ;;  %v5738_v17 = vsel %vm8830_vm2, %v5736_v4, %v5737_v41  ;;  %v6515_v20 = vrot.slane %v5665_v29, 9  ;;  %v5743_v54 = vrot.slane %v5741_v57, 4 }
 0x42d   : > { %7455 = vmatpush3.bf16.msra.mxu1 %v8097_v30  ;;  %v5661_v30 = vld [vmem:[#allocation2 + $0x3c] sm:$0xe]  ;;  %v5731_v14 = vsel %vm8830_vm2, %v5729_v21, %v5730_v56  ;;  %v5744_v38 = vrot.slane %v10071_v19, 5  ;;  %v5995_v53 = vunpack.c.l.bf16 %v8945_v40  ;;  %v5999_v22 = vunpack.c.l.bf16 %v10367_v60 }
 0x42e   : > { %7456 = vmatprep.subr.bf16.mxu1 %v8098_v43  ;;  %v6511_v9 = vrot.slane %v5661_v30, 9  ;;  %v6521_v11 = vcombine.low %v5728_v12, %v5731_v14  ;;  %v5742_v36 = vsel %vm8830_vm2, %v6515_v20, %v5741_v57  ;;  %v10370_v12 = vld [vmem:[#allocation30_spill] sm:$0xff]  ;;  %v10372_v20 = vld [vmem:[#allocation31_spill] sm:$0xff] }
 0x42f   : > { %v5745_v55 = vsel %vm8830_vm2, %v5743_v54, %v5744_v38  ;;  %v6005_v14 = vunpack.c.l.bf16 %v10370_v12  ;;  %v6006_v54 = vunpack.c.l.bf16 %v10372_v20 }
 0x430   : > { %7441 = vmatmul.mubr.bf16.gmra.mrb[28].mxu1 %v6497_v39  ;;  %v6523_v52 = vcombine.low %v5742_v36, %v5745_v55  ;;  %v10374_v55 = vld [vmem:[#allocation29_spill] sm:$0xff] }
 0x431   : > { %7457 = vmatpush3.bf16.msra.mxu1 %v8098_v43  ;;  %7444 = vmatprep.mubr.bf16.mxu1 %v6498_v58  ;;  %v5714_v43 = vsel %vm8830_vm2, %v6511_v9, %v5713_v5  ;;  %v6520_v58 = vcombine.low %v5721_v8, %v5724_v35  ;;  %v10369_v35 = vld [vmem:[#allocation25_spill] sm:$0xff] }
 0x432   : > { %7458 = vmatprep.subr.bf16.mxu1 %v8099_v45  ;;  %v6519_v39 = vcombine.low %v5714_v43, %v5717_v51  ;;  %v10368_v43 = vld [vmem:[#allocation27_spill] sm:$0xff]  ;;  %v6000_v23 = vunpack.c.l.bf16 %v10369_v35 }
 0x433   : > { %v6002_v51 = vunpack.c.l.bf16 %v10368_v43 }
 0x435   : > { %7459 = vmatpush3.bf16.msra.mxu1 %v8099_v45  ;;  %v6514_v45 = vrot.slane %v5664_v24, 9 }
 0x436   : > { %7460 = vmatprep.subr.bf16.mxu1 %v8100_v0 }
 0x437   : > { %v5735_v46 = vsel %vm8830_vm2, %v6514_v45, %v5734_v62 }
 0x438   : > { %7445 = vmatmul.mubr.bf16.gmra.mrb[32].mxu1 %v6499_v32  ;;  %v5997_v32 = vunpack.c.l.bf16 %v8984_v63 }
 0x439   : > { %7461 = vmatpush3.bf16.msra.mxu1 %v8100_v0  ;;  %7464 = vmatprep.mubr.bf16.mxu1 %v6516_v50  ;;  %v6522_v0 = vcombine.low %v5735_v46, %v5738_v17  ;;  %v10371_v17 = vld [vmem:[#allocation28_spill] sm:$0xff] }
 0x43a   : > { %7462 = vmatprep.subr.bf16.mxu1 %v8101_v42  ;;  %v6003_v29 = vunpack.c.l.bf16 %v10371_v17 }
 0x43d   : > { %7463 = vmatpush3.bf16.msra.mxu1 %v8101_v42  ;;  %v5998_v42 = vunpack.c.l.bf16 %v10364_v7 }
 0x440   : > { %7465 = vmatmul.mubr.bf16.vlgmr.msra.gmra.mrb[20].mxu1 %v6517_v61  ;;  %v10366_v61 = vld [vmem:[#allocation26_spill] sm:$0xff] }
 0x441   : > { %7468 = vmatprep.mubr.bf16.mxu1 %v6518_v15  ;;  %v6001_v15 = vunpack.c.l.bf16 %v10366_v61 }
 0x448   : > { %7469 = vmatmul.mubr.bf16.gmra.mrb[24].mxu1 %v6519_v39 }
 0x449   : > { %7472 = vmatprep.mubr.bf16.mxu1 %v6520_v58 }
 0x450   : > { %7473 = vmatmul.mubr.bf16.gmra.mrb[28].mxu1 %v6521_v11 }
 0x451   : > { %7476 = vmatprep.mubr.bf16.mxu1 %v6522_v0 }
 0x458   : > { %7477 = vmatmul.mubr.bf16.gmra.mrb[32].mxu1 %v6523_v52  ;;  %v6004_v52 = vunpack.c.l.bf16 %v10374_v55 }
 0x513   : > { %v7466_v50 = vpop.f32.mrb[20].mxu1 }
 0x514   : > { %v5965_v19 = vadd.f32 %v7466_v50, %v10135_v26  ;;  %v5877_v16 = vpop.f32.mrb[21].mxu1 }
 0x515   : > { %v5963_v1 = vadd.f32 %v10135_v26, %v5877_v16  ;;  %v7467_v10 = vpop.f32.mrb[22].mxu1 }
 0x516   : > { %v6013_v59 = vadd.f32 %v5997_v32, %v5965_v19  ;;  %v5966_v28 = vadd.f32 %v7467_v10, %v10135_v26  ;;  %v5880_v63 = vpop.f32.mrb[23].mxu1 }
 0x517   : > { %v6011_v5 = vadd.f32 %v5995_v53, %v5963_v1  ;;  %v5964_v40 = vadd.f32 %v10135_v26, %v5880_v63  ;;  %v6007_v63 = vunpack.c.l.bf16 %v9100_v49 }
 0x518   : > { %v6029_v27 = vmax.f32 %v6013_v59, 0.0  ;;  %v6014_v6 = vadd.f32 %v5998_v42, %v5966_v28 }
 0x519   : > { %v6027_v30 = vmax.f32 %v6011_v5, 0.0  ;;  %v6012_v37 = vadd.f32 %v5996_v47, %v5964_v40  ;;  %v6009_v47 = vunpack.c.l.bf16 %v9123_v48  ;;  %v6008_v48 = vunpack.c.l.bf16 %v9113_v33 }
 0x51a   : > { %6045 = vst [vmem:[%s9546_s19 + $0x10] sm:$0xff] %v6029_v27  ;;  %v6030_v2 = vmax.f32 %v6014_v6, 0.0  ;;  %v6010_v27 = vunpack.c.l.bf16 %v9148_v3 }
 0x51b   : > { %6043 = vst [vmem:[%s9546_s19] sm:$0xff] %v6027_v30  ;;  %v6028_v9 = vmax.f32 %v6012_v37, 0.0  ;;  %v7470_v34 = vpop.f32.mrb[24].mxu1 }
 0x51c   : > { %6046 = vst [vmem:[%s9546_s19 + $0x18] sm:$0xff] %v6030_v2  ;;  %v5969_v18 = vadd.f32 %v7470_v34, %v10135_v26  ;;  %v5893_v31 = vpop.f32.mrb[25].mxu1 }
 0x51d   : > { %6044 = vst [vmem:[%s9546_s19 + $0x8] sm:$0xff] %v6028_v9  ;;  %v5967_v25 = vadd.f32 %v10135_v26, %v5893_v31  ;;  %v7471_v8 = vpop.f32.mrb[26].mxu1 }
 0x51e   : > { %v6017_v62 = vadd.f32 %v6001_v15, %v5969_v18  ;;  %v5970_v24 = vadd.f32 %v7471_v8, %v10135_v26  ;;  %v5896_v39 = vpop.f32.mrb[27].mxu1 }
 0x51f   : > { %v6015_v58 = vadd.f32 %v5999_v22, %v5967_v25  ;;  %v5968_v13 = vadd.f32 %v10135_v26, %v5896_v39 }
 0x520   : > { %v6033_v21 = vmax.f32 %v6017_v62, 0.0  ;;  %v6018_v56 = vadd.f32 %v6002_v51, %v5970_v24 }
 0x521   : > { %v6031_v45 = vmax.f32 %v6015_v58, 0.0  ;;  %v6016_v4 = vadd.f32 %v6000_v23, %v5968_v13 }
 0x522   : > { %6049 = vst [vmem:[%s9546_s19 + $0x30] sm:$0xff] %v6033_v21  ;;  %v6034_v41 = vmax.f32 %v6018_v56, 0.0 }
 0x523   : > { %6047 = vst [vmem:[%s9546_s19 + $0x20] sm:$0xff] %v6031_v45  ;;  %v6032_v57 = vmax.f32 %v6016_v4, 0.0  ;;  %v7474_v46 = vpop.f32.mrb[28].mxu1 }
 0x524   : > { %6050 = vst [vmem:[%s9546_s19 + $0x38] sm:$0xff] %v6034_v41  ;;  %v5973_v11 = vadd.f32 %v7474_v46, %v10135_v26  ;;  %v5909_v0 = vpop.f32.mrb[29].mxu1 }
 0x525   : > { %6048 = vst [vmem:[%s9546_s19 + $0x28] sm:$0xff] %v6032_v57  ;;  %v5971_v38 = vadd.f32 %v10135_v26, %v5909_v0  ;;  %v7475_v36 = vpop.f32.mrb[30].mxu1 }
 0x526   : > { %v6021_v32 = vadd.f32 %v6005_v14, %v5973_v11  ;;  %v5974_v50 = vadd.f32 %v7475_v36, %v10135_v26  ;;  %v5912_v53 = vpop.f32.mrb[31].mxu1 }
 0x527   : > { %v6019_v19 = vadd.f32 %v6003_v29, %v5971_v38  ;;  %v5972_v16 = vadd.f32 %v10135_v26, %v5912_v53 }
 0x528   : > { %v6037_v7 = vmax.f32 %v6021_v32, 0.0  ;;  %v6022_v42 = vadd.f32 %v6006_v54, %v5974_v50 }
 0x529   : > { %v6035_v1 = vmax.f32 %v6019_v19, 0.0  ;;  %v6020_v10 = vadd.f32 %v6004_v52, %v5972_v16 }
 0x52a   : > { %6053 = vst [vmem:[%s9546_s19 + $0x50] sm:$0xff] %v6037_v7  ;;  %v6038_v44 = vmax.f32 %v6022_v42, 0.0 }
 0x52b   : > { %6051 = vst [vmem:[%s9546_s19 + $0x40] sm:$0xff] %v6035_v1  ;;  %v6036_v59 = vmax.f32 %v6020_v10, 0.0  ;;  %v7478_v28 = vpop.f32.mrb[32].mxu1 }
 0x52c   : > { %6054 = vst [vmem:[%s9546_s19 + $0x58] sm:$0xff] %v6038_v44  ;;  %v5977_v5 = vadd.f32 %v7478_v28, %v10135_v26  ;;  %v5925_v40 = vpop.f32.mrb[33].mxu1 }
 0x52d   : > { %6052 = vst [vmem:[%s9546_s19 + $0x48] sm:$0xff] %v6036_v59  ;;  %v5975_v6 = vadd.f32 %v10135_v26, %v5925_v40  ;;  %v7479_v30 = vpop.f32.mrb[34].mxu1 }
 0x52e   : > { %v6025_v37 = vadd.f32 %v6009_v47, %v5977_v5  ;;  %v5978_v2 = vadd.f32 %v7479_v30, %v10135_v26  ;;  %v5928_v49 = vpop.f32.mrb[35].mxu1 }
 0x52f   : > { %v6023_v61 = vadd.f32 %v6007_v63, %v5975_v6  ;;  %v5976_v15 = vadd.f32 %v10135_v26, %v5928_v49 }
 0x530   : > { %v6041_v3 = vmax.f32 %v6025_v37, 0.0  ;;  %v6026_v9 = vadd.f32 %v6010_v27, %v5978_v2 }
 0x531   : > { %v6039_v34 = vmax.f32 %v6023_v61, 0.0  ;;  %v6024_v60 = vadd.f32 %v6008_v48, %v5976_v15 }
 0x532   : > { %6057 = vst [vmem:[%s9546_s19 + $0x70] sm:$0xff] %v6041_v3  ;;  %v6042_v33 = vmax.f32 %v6026_v9, 0.0 }
 0x533   : > { %6055 = vst [vmem:[%s9546_s19 + $0x60] sm:$0xff] %v6039_v34  ;;  %v6040_v26 = vmax.f32 %v6024_v60, 0.0 }
 0x534   : > { %6058 = vst [vmem:[%s9546_s19 + $0x78] sm:$0xff] %v6042_v33 }
 0x535   : > { %6056 = vst [vmem:[%s9546_s19 + $0x68] sm:$0xff] %v6040_v26 }
 0x536   : > { %8257 = shalt.err (!%p8254_p12)
}
 0x537   : > { %s8258_s10 = scalar_lea.hbm %s10188_s12, 2048  ;;  %s8262_s5 = scalar_lea.hbm %s10377_s16, 8192 }
 0x538   : > { %p8259_p2 = scmp.ne.s32.totalorder %s10188_s12, %s8258_s10  ;;  %p8263_p1 = scmp.lt.u32.totalorder %s10188_s12, %s10377_s16 }
 0x539   : > { %p8264_p3 = scmp.lt.u32.totalorder %s8262_s5, %s8258_s10  ;;  %p8266_p6 = scmp.lt.u32.totalorder %s8258_s10, %s10188_s12 }
 0x53a   : > { %p8260_p7 = pnand %p8259_p2, %p10378_p10 }
 0x53b   : > { %p8265_p4 = por %p8264_p3, %p8263_p1 }
 0x53c   : > { %p8261_p9 = pneg %p8260_p7 }
 0x53d   : > { %p8267_p13 = por %p8266_p6, %p8265_p4 }
 0x53f   : > { %p8268_p11 = pnand %p8267_p13, %p8261_p9 }
 0x541   : > { %8271 = shalt.err (!%p8268_p11)
}
 0x542   : > { %s8386_s1 = smov 128   ;;  %s8387_s21 = smov 8  }
 0x543   : > { %7789 = dma.vmem_to_hbm [thread:$0]  (%p10378_p10), %s10190_s9, 2048, %s10188_s12, %s10197_s2, %s8386_s1, %s8386_s1, %s8387_s21  }
 0x544 PF: > { %s10379_s14 = sld [smem:[#allocation17_spill]]  ;;  %s10380_s7 = sld [smem:[#allocation21_spill]] }
 0x545   : > { %p7821_p0 = scmp.ge.s32.totalorder %s8374_s28, 2 }
 0x54a   : > { %s6091_s6 = sand.u32 1, %s10379_s14   ;;  %p10381_p5 = scmp.ne.s32.totalorder %s10380_s7, 0 }
 0x54b   : > { %s6092_s17 = scalar_lea.sflag [#allocation5], %s6091_s6 }
 0x54c   : > { %p7809_p8 = pnand %p7821_p0, %p10381_p5 }
 0x54e   : > { %8329 = dma.done.wait (!%p7809_p8), %s6092_s17, 2048  }
 0x54f   : > { %8331 = vsyncadd (!%p7809_p8), %s6092_s17, 4294965248  ;;  %s23_s28 = sadd.s32 1, %s8374_s28   ;;  %s10382_s18 = sld [smem:[#allocation18_spill]] }
 0x550   : > { %p20_p12 = scmp.ge.s32.totalorder %s23_s28, 6   ;;  %s10383_s19 = smov %s8342_s20 }
 0x551   : > { %s10384_s20 = smov %s8628_s8  ;;  %s10385_s21 = smov %s8350_s22 }
 0x552   : > { %s10386_s22 = smov %s8354_s23  ;;  %s10387_s23 = smov %s8625_s15 }
 0x553   : > { %s10388_s24 = smov %s8366_s26  ;;  %s10389_s25 = smov %s8370_s27 }
 0x554   : > { %s10390_s26 = smov %s10393_s11  ;;  %s10391_s27 = smov %s10397_s13 }
 0x555   :  { %22 = sbr.rel (!%p20_p12) target bundleno = 15 (0xf), region = 129 }
 0x55c   :  { %6097 = vsyncpa [#allocation4], 1 }
 0x55d   :  { %6099 = vsyncpa [#allocation4 + $0x1], 1 }
 0x55e   :  { %6100 = vsyncpa [#allocation7], 1 }
 0x55f   :  { %6101 = vsyncpa [#allocation10], 1 }
 0x560   :  { %6102 = vsyncpa [#allocation5], 1 }
 0x561   :  { %6104 = vsyncpa [#allocation5 + $0x1], 1 }

</bundles_post_ra>
